<compile_context>
chip_gen: v7x
topology: tpu7x:2x2x1
jax: 0.10.0
libtpu: 0.0.40
codegen_flags: <defaults>
</compile_context>

<pallas_src>
import functools

import jax
import jax.numpy as jnp
from jax.experimental import pallas as pl
from jax.experimental.pallas import tpu as pltpu


def _round_up(v, m):
    return (v + m - 1) // m * m


# ---------------------------------------------------------------------------
# Kernel: one chunk of Tb GRU steps (+ fused FC) per grid iteration.
# Hidden state carried across chunks in a VMEM scratch.
# ---------------------------------------------------------------------------
def _gru_fc_chunk_kernel(h0_ref, x_ref, wcomb_ref, wfc_ref, bfc_ref,
                         logits_ref, hout_ref,          # outputs
                         h_scr,                         # VMEM scratch (B, Hp) f32
                         *, hp, cp, tb, t_total):
    c = pl.program_id(0)

    @pl.when(c == 0)
    def _():
        h_scr[...] = h0_ref[...]

    h = h_scr[...]                         # (B, Hp) f32, padded lanes are exactly 0
    fc0 = 4 * hp
    rem = t_total % tb                     # >0 only if the last chunk is time-padded

    # Fully unrolled inner loop (tb is small & static); one fused MXU pass per step.
    for i in range(tb):
        x_t = x_ref[i]                                            # (B, Fp) f32
        xh = jnp.concatenate([x_t, h], axis=-1).astype(jnp.bfloat16)
        # Columns: [r_pre | z_pre | gi_n | gh_n | fc(h_{t-1})], biases folded via
        # the pinned 1.0 lane at x column F.  f32 accumulation on the MXU.
        out = jnp.dot(xh, wcomb_ref[...], preferred_element_type=jnp.float32)

        r = jax.nn.sigmoid(out[:, 0:hp])
        z = jax.nn.sigmoid(out[:, hp:2 * hp])
        n = jnp.tanh(out[:, 2 * hp:3 * hp] + r * out[:, 3 * hp:4 * hp])
        h_new = n + z * (h - n)                                   # (1-z)*n + z*h

        if rem != 0 and i >= rem:
            # Only the tail of the LAST chunk can hold time-padded steps; freeze h there.
            h = jnp.where(c * tb + i < t_total, h_new, h)
        else:
            h = h_new

        if i > 0:
            # fc columns act on h_{i-1}  ->  logits of the previous local step.
            logits_ref[i - 1] = out[:, fc0:fc0 + cp]

    # Chunk epilogue: logits of the chunk's last local step (from the updated hidden),
    # then carry the hidden.  (For a time-padded last chunk this lands in a padded
    # output row that the wrapper slices away.)
    logits_ref[tb - 1] = (
        jnp.dot(h.astype(jnp.bfloat16), wfc_ref[...],
                preferred_element_type=jnp.float32) + bfc_ref[...])
    h_scr[...] = h

    @pl.when(c == pl.num_programs(0) - 1)
    def _():
        hout_ref[...] = h


# ---------------------------------------------------------------------------
# Wrappers
# ---------------------------------------------------------------------------
def full_layer_forward_seq(xs, hidden, params, *, restart=False, time_block=8):
    """xs: (T, B, feature_num); hidden: (B, H) or None.

    Returns (logits (T, B, class_num), new_hidden (B, H)).
    The whole sequence runs in one pallas_call; weights stay VMEM-resident and the
    time axis is processed in chunks of `time_block` steps per grid iteration.
    """
    d = params["dims"]
    F, H, C = d["F"], d["H"], d["C"]
    Fp, Hp, Cp = d["Fp"], d["Hp"], d["Cp"]
    T, B, Fx = xs.shape
    assert Fx == F

    if restart or hidden is None:
        hidden = jnp.zeros((B, H), jnp.float32)

    tb = max(1, min(int(time_block), T))
    n_chunks = pl.cdiv(T, tb)
    t_pad = n_chunks * tb

    # Lane-pad x to Fp, pin the bias lane (column F) to 1.0 for ALL steps (including
    # time-padded ones, so the shifted fc logits of the last valid step keep b_fc).
    xs_p = jnp.zeros((t_pad, B, Fp), jnp.float32)
    xs_p = xs_p.at[:T, :, :F].set(xs.astype(jnp.float32))
    xs_p = xs_p.at[:, :, F].set(1.0)

    # Hidden padded lanes MUST be zero (the packed weights keep them at zero through
    # the recurrence).
    h_p = jnp.zeros((B, Hp), jnp.float32).at[:, :H].set(hidden.astype(jnp.float32))

    kernel = functools.partial(_gru_fc_chunk_kernel, hp=Hp, cp=Cp, tb=tb, t_total=T)

    grid_spec = pltpu.PrefetchScalarGridSpec(
        num_scalar_prefetch=0,
        grid=(n_chunks,),
        in_specs=[
            pl.BlockSpec((B, Hp), lambda c: (0, 0)),                  # h0 (resident)
            pl.BlockSpec((tb, B, Fp), lambda c: (c, 0, 0)),           # x chunk (streamed)
            pl.BlockSpec((Fp + Hp, 4 * Hp + Cp), lambda c: (0, 0)),   # fused gate+fc W
            pl.BlockSpec((Hp, Cp), lambda c: (0, 0)),                 # fc W (epilogue)
            pl.BlockSpec((1, Cp), lambda c: (0, 0)),                  # fc b (epilogue)
        ],
        out_specs=(
            pl.BlockSpec((tb, B, Cp), lambda c: (c, 0, 0)),           # logits chunk
            pl.BlockSpec((B, Hp), lambda c: (0, 0)),                  # final hidden
        ),
        scratch_shapes=[pltpu.VMEM((B, Hp), jnp.float32)],            # carried hidden
    )

    logits_p, h_out_p = pl.pallas_call(
        kernel,
        out_shape=(
            jax.ShapeDtypeStruct((t_pad, B, Cp), jnp.float32),
            jax.ShapeDtypeStruct((B, Hp), jnp.float32),
        ),
        grid_spec=grid_spec,
        compiler_params=pltpu.CompilerParams(
            dimension_semantics=("arbitrary",)),                      # sequential in time
    )(h_p, xs_p, params["w_comb"], params["w_fc"], params["b_fc"])

    return logits_p[:T, :, :C], h_out_p[:, :H]


def full_layer_forward(x, hidden, params, *, restart=False):
    """Single-step (module-style) call: x (B, feature_num).

    NOTE: launch overhead dominates a one-step kernel; prefer batching timesteps into
    full_layer_forward_seq in hot loops.
    """
    logits, h_new = full_layer_forward_seq(x[None], hidden, params,
                                           restart=restart, time_block=1)
    return logits[0], h_new


# ---------------------------------------------------------------------------
# Parameter init (PyTorch-style) and packing into the fused / padded layout.
# ---------------------------------------------------------------------------
def init_raw_params(key, feature_num, hidden_state_dim, class_num):
    """Raw weights mirroring PyTorch GRU / Linear uniform(-k, k) init."""
    H = hidden_state_dim
    k = H ** -0.5
    ks = jax.random.split(key, 6)
    return {
        "w_ih": jax.random.uniform(ks[0], (3 * H, feature_num), jnp.float32, -k, k),
        "w_hh": jax.random.uniform(ks[1], (3 * H, H), jnp.float32, -k, k),
        "b_ih": jax.random.uniform(ks[2], (3 * H,), jnp.float32, -k, k),
        "b_hh": jax.random.uniform(ks[3], (3 * H,), jnp.float32, -k, k),
        "w_fc": jax.random.uniform(ks[4], (class_num, H), jnp.float32, -k, k),
        "b_fc": jax.random.uniform(ks[5], (class_num,), jnp.float32, -k, k),
    }


def pack_params(raw):
    """Build the fused, 128-lane-padded, bf16 matmul weights for the kernel.

    Layout of w_comb (rows = [x padded to Fp | h padded to Hp], Fp >= F+1):
      * columns [0:Hp)        r pre-activation   (W_ih_r^T, W_hh_r^T, bias row)
      * columns [Hp:2Hp)      z pre-activation
      * columns [2Hp:3Hp)     gi_n  (x part + b_ih_n)
      * columns [3Hp:4Hp)     gh_n  (h part + b_hh_n)
      * columns [4Hp:4Hp+Cp)  fc(h) + b_fc   (logits of the PREVIOUS step)
    Row F (the pinned 1.0 lane of x) carries every bias.
    Padding invariant: all padded hidden columns/rows are zero, so zero-padded hidden
    lanes stay exactly zero through the recurrence (do not change this packing without
    re-checking that invariant).
    """
    w_ih, w_hh, b_ih, b_hh = raw["w_ih"], raw["w_hh"], raw["b_ih"], raw["b_hh"]
    H = w_hh.shape[1]
    F = w_ih.shape[1]
    C = raw["w_fc"].shape[0]
    Fp = _round_up(F + 1, 128)          # +1 guarantees a spare lane for the biases
    Hp = _round_up(H, 128)
    Cp = _round_up(C, 128)

    wih_r, wih_z, wih_n = w_ih[:H], w_ih[H:2 * H], w_ih[2 * H:]
    whh_r, whh_z, whh_n = w_hh[:H], w_hh[H:2 * H], w_hh[2 * H:]
    bih_r, bih_z, bih_n = b_ih[:H], b_ih[H:2 * H], b_ih[2 * H:]
    bhh_r, bhh_z, bhh_n = b_hh[:H], b_hh[H:2 * H], b_hh[2 * H:]

    w = jnp.zeros((Fp + Hp, 4 * Hp + Cp), jnp.float32)
    # x rows
    w = w.at[:F, 0:H].set(wih_r.T)
    w = w.at[:F, Hp:Hp + H].set(wih_z.T)
    w = w.at[:F, 2 * Hp:2 * Hp + H].set(wih_n.T)
    # h rows
    w = w.at[Fp:Fp + H, 0:H].set(whh_r.T)
    w = w.at[Fp:Fp + H, Hp:Hp + H].set(whh_z.T)
    w = w.at[Fp:Fp + H, 3 * Hp:3 * Hp + H].set(whh_n.T)
    w = w.at[Fp:Fp + H, 4 * Hp:4 * Hp + C].set(raw["w_fc"].T)
    # biases folded into the pinned 1.0 lane (row F of the x part)
    w = w.at[F, 0:H].set(bih_r + bhh_r)
    w = w.at[F, Hp:Hp + H].set(bih_z + bhh_z)
    w = w.at[F, 2 * Hp:2 * Hp + H].set(bih_n)
    w = w.at[F, 3 * Hp:3 * Hp + H].set(bhh_n)
    w = w.at[F, 4 * Hp:4 * Hp + C].set(raw["b_fc"])

    w_fc_p = jnp.zeros((Hp, Cp), jnp.float32).at[:H, :C].set(raw["w_fc"].T)
    b_fc_p = jnp.zeros((1, Cp), jnp.float32).at[0, :C].set(raw["b_fc"])

    return {
        "w_comb": w.astype(jnp.bfloat16),
        "w_fc": w_fc_p.astype(jnp.bfloat16),
        "b_fc": b_fc_p,
        "dims": {"F": F, "H": H, "C": C, "Fp": Fp, "Hp": Hp, "Cp": Cp},
    }


# ---------------------------------------------------------------------------
# Pure-JAX f32 reference (PyTorch nn.GRU semantics), for the sanity check.
# ---------------------------------------------------------------------------
def _reference_forward_seq(xs, h, raw):
    H = raw["w_hh"].shape[1]
    outs = []
    for t in range(xs.shape[0]):
        gi = xs[t] @ raw["w_ih"].T + raw["b_ih"]
        gh = h @ raw["w_hh"].T + raw["b_hh"]
        r = jax.nn.sigmoid(gi[:, :H] + gh[:, :H])
        z = jax.nn.sigmoid(gi[:, H:2 * H] + gh[:, H:2 * H])
        n = jnp.tanh(gi[:, 2 * H:] + r * gh[:, 2 * H:])
        h = (1.0 - z) * n + z * h
        outs.append(h @ raw["w_fc"].T + raw["b_fc"])
    return jnp.stack(outs), h


if __name__ == "__main__":
    batch, feature_num, hidden_state_dim, class_num = 8, 32, 64, 16
    seq_len = 13          # deliberately NOT a multiple of time_block -> exercises tail
    time_block = 8

    key = jax.random.PRNGKey(0)
    kp, kx, kx2 = jax.random.split(key, 3)
    raw = init_raw_params(kp, feature_num, hidden_state_dim, class_num)
    params = pack_params(raw)

    xs = jax.random.normal(kx, (seq_len, batch, feature_num), jnp.float32)
    x_extra = jax.random.normal(kx2, (batch, feature_num), jnp.float32)

    # Whole sequence in ONE pallas_call (2 time chunks of 8 steps).
    logits_seq, hidden = full_layer_forward_seq(xs, None, params,
                                                restart=True, time_block=time_block)
    # Module-style single-step continuation reusing the stored hidden.
    logits_step, hidden = full_layer_forward(x_extra, hidden, params, restart=False)
    jax.block_until_ready((logits_seq, logits_step, hidden))

    # Sanity check against the pure-f32 JAX reference (bf16 MXU operands -> looser tol).
    ref_seq, ref_h = _reference_forward_seq(
        xs, jnp.zeros((batch, hidden_state_dim), jnp.float32), raw)
    ref_step, ref_h = _reference_forward_seq(x_extra[None], ref_h, raw)

    assert jnp.allclose(logits_seq, ref_seq, atol=3e-2), "sequence logits mismatch"
    assert jnp.allclose(logits_step, ref_step[0], atol=3e-2), "step logits mismatch"
    assert jnp.allclose(hidden, ref_h, atol=3e-2), "hidden state mismatch"

    print("KERNEL_OK")
</pallas_src>

<mosaic_0001>
module attributes {stable_mosaic.version = 11 : i64} {
  func.func @_gru_fc_chunk_kernel(%arg0: i32, %arg1: memref<8x128xf32, #tpu.memory_space<vmem>>, %arg2: memref<8x8x128xf32, #tpu.memory_space<vmem>>, %arg3: memref<256x640xbf16, #tpu.memory_space<vmem>>, %arg4: memref<128x128xbf16, #tpu.memory_space<vmem>>, %arg5: memref<1x128xf32, #tpu.memory_space<vmem>>, %arg6: memref<8x8x128xf32, #tpu.memory_space<vmem>>, %arg7: memref<8x128xf32, #tpu.memory_space<vmem>>, %arg8: memref<8x128xf32, #tpu.memory_space<vmem>>) attributes {dimension_semantics = [#tpu.dimension_semantics<arbitrary>], iteration_bounds = array<i64: 2>, scalar_prefetch = 0 : i64, scratch_operands = 1 : i64, tpu.core_type = #tpu.core_type<tc>, window_params = [{pipeline_mode = #tpu.pipeline_mode<synchronous>, transform_indices = @transform_0, window_bounds = array<i64: 8, 128>}, {transform_indices = @transform_1, window_bounds = array<i64: 8, 8, 128>}, {pipeline_mode = #tpu.pipeline_mode<synchronous>, transform_indices = @transform_2, window_bounds = array<i64: 256, 640>}, {pipeline_mode = #tpu.pipeline_mode<synchronous>, transform_indices = @transform_3, window_bounds = array<i64: 128, 128>}, {pipeline_mode = #tpu.pipeline_mode<synchronous>, transform_indices = @transform_4, window_bounds = array<i64: 1, 128>}, {transform_indices = @transform_5, window_bounds = array<i64: 8, 8, 128>}, {pipeline_mode = #tpu.pipeline_mode<synchronous>, transform_indices = @transform_6, window_bounds = array<i64: 8, 128>}]} {
    %c0_i32 = arith.constant 0 : i32
    %0 = arith.cmpi eq, %arg0, %c0_i32 : i32
    %1 = arith.extui %0 : i1 to i32
    %c0_i32_0 = arith.constant 0 : i32
    %2 = arith.cmpi ne, %1, %c0_i32_0 : i32
    scf.if %2 {
      %c0_94 = arith.constant 0 : index
      %c0_95 = arith.constant 0 : index
      %265 = vector.load %arg1[%c0_94, %c0_95] : memref<8x128xf32, #tpu.memory_space<vmem>>, vector<8x128xf32>
      %c0_96 = arith.constant 0 : index
      %c0_97 = arith.constant 0 : index
      %266 = vector.load %arg8[%c0_96, %c0_97] : memref<8x128xf32, #tpu.memory_space<vmem>>, vector<8x128xf32>
      tpu.vector_store %arg8[%c0_96, %c0_97], %265 {strides = array<i32>} : memref<8x128xf32, #tpu.memory_space<vmem>>, vector<8x128xf32>,
    } else {
    }
    %c0 = arith.constant 0 : index
    %c0_1 = arith.constant 0 : index
    %3 = vector.load %arg8[%c0, %c0_1] : memref<8x128xf32, #tpu.memory_space<vmem>>, vector<8x128xf32>
    %c0_2 = arith.constant 0 : index
    %c0_3 = arith.constant 0 : index
    %c0_4 = arith.constant 0 : index
    %4 = vector.load %arg2[%c0_2, %c0_3, %c0_4] : memref<8x8x128xf32, #tpu.memory_space<vmem>>, vector<1x8x128xf32>
    %5 = vector.shape_cast %4 : vector<1x8x128xf32> to vector<8x128xf32>
    %6 = tpu.concatenate %5, %3 in 1 : vector<8x128xf32>, vector<8x128xf32> -> vector<8x256xf32>
    %7 = arith.truncf %6 : vector<8x256xf32> to vector<8x256xbf16>
    %c0_5 = arith.constant 0 : index
    %c0_6 = arith.constant 0 : index
    %8 = vector.load %arg3[%c0_5, %c0_6] : memref<256x640xbf16, #tpu.memory_space<vmem>>, vector<256x640xbf16>
    %cst = arith.constant dense<0.000000e+00> : vector<8x640xf32>
    %9 = tpu.matmul %7, %8, %cst {dimension_numbers = #tpu.dot_dimension_numbers<[1], [0], [0], [1], [0, 0, 1, 1], [], []>} : vector<8x256xbf16>, vector<256x640xbf16>, vector<8x640xf32> -> vector<8x640xf32>
    %10 = vector.extract_strided_slice %9 {offsets = [0, 0], sizes = [8, 128], strides = [1, 1]} : vector<8x640xf32> to vector<8x128xf32>
    %11 = arith.negf %10 : vector<8x128xf32>
    %12 = math.exp %11 : vector<8x128xf32>
    %cst_7 = arith.constant 1.000000e+00 : f32
    %13 = vector.broadcast %cst_7 : f32 to vector<8x128xf32>
    %14 = arith.addf %13, %12 : vector<8x128xf32>
    %15 = arith.divf %13, %14 : vector<8x128xf32>
    %16 = vector.extract_strided_slice %9 {offsets = [0, 128], sizes = [8, 128], strides = [1, 1]} : vector<8x640xf32> to vector<8x128xf32>
    %17 = arith.negf %16 : vector<8x128xf32>
    %18 = math.exp %17 : vector<8x128xf32>
    %cst_8 = arith.constant 1.000000e+00 : f32
    %19 = vector.broadcast %cst_8 : f32 to vector<8x128xf32>
    %20 = arith.addf %19, %18 : vector<8x128xf32>
    %21 = arith.divf %19, %20 : vector<8x128xf32>
    %22 = vector.extract_strided_slice %9 {offsets = [0, 256], sizes = [8, 128], strides = [1, 1]} : vector<8x640xf32> to vector<8x128xf32>
    %23 = vector.extract_strided_slice %9 {offsets = [0, 384], sizes = [8, 128], strides = [1, 1]} : vector<8x640xf32> to vector<8x128xf32>
    %24 = arith.mulf %15, %23 : vector<8x128xf32>
    %25 = arith.addf %22, %24 : vector<8x128xf32>
    %26 = math.tanh %25 : vector<8x128xf32>
    %27 = arith.subf %3, %26 : vector<8x128xf32>
    %28 = arith.mulf %21, %27 : vector<8x128xf32>
    %29 = arith.addf %26, %28 : vector<8x128xf32>
    %c1 = arith.constant 1 : index
    %c0_9 = arith.constant 0 : index
    %c0_10 = arith.constant 0 : index
    %30 = vector.load %arg2[%c1, %c0_9, %c0_10] : memref<8x8x128xf32, #tpu.memory_space<vmem>>, vector<1x8x128xf32>
    %31 = vector.shape_cast %30 : vector<1x8x128xf32> to vector<8x128xf32>
    %32 = tpu.concatenate %31, %29 in 1 : vector<8x128xf32>, vector<8x128xf32> -> vector<8x256xf32>
    %33 = arith.truncf %32 : vector<8x256xf32> to vector<8x256xbf16>
    %c0_11 = arith.constant 0 : index
    %c0_12 = arith.constant 0 : index
    %34 = vector.load %arg3[%c0_11, %c0_12] : memref<256x640xbf16, #tpu.memory_space<vmem>>, vector<256x640xbf16>
    %cst_13 = arith.constant dense<0.000000e+00> : vector<8x640xf32>
    %35 = tpu.matmul %33, %34, %cst_13 {dimension_numbers = #tpu.dot_dimension_numbers<[1], [0], [0], [1], [0, 0, 1, 1], [], []>} : vector<8x256xbf16>, vector<256x640xbf16>, vector<8x640xf32> -> vector<8x640xf32>
    %36 = vector.extract_strided_slice %35 {offsets = [0, 0], sizes = [8, 128], strides = [1, 1]} : vector<8x640xf32> to vector<8x128xf32>
    %37 = arith.negf %36 : vector<8x128xf32>
    %38 = math.exp %37 : vector<8x128xf32>
    %cst_14 = arith.constant 1.000000e+00 : f32
    %39 = vector.broadcast %cst_14 : f32 to vector<8x128xf32>
    %40 = arith.addf %39, %38 : vector<8x128xf32>
    %41 = arith.divf %39, %40 : vector<8x128xf32>
    %42 = vector.extract_strided_slice %35 {offsets = [0, 128], sizes = [8, 128], strides = [1, 1]} : vector<8x640xf32> to vector<8x128xf32>
    %43 = arith.negf %42 : vector<8x128xf32>
    %44 = math.exp %43 : vector<8x128xf32>
    %cst_15 = arith.constant 1.000000e+00 : f32
    %45 = vector.broadcast %cst_15 : f32 to vector<8x128xf32>
    %46 = arith.addf %45, %44 : vector<8x128xf32>
    %47 = arith.divf %45, %46 : vector<8x128xf32>
    %48 = vector.extract_strided_slice %35 {offsets = [0, 256], sizes = [8, 128], strides = [1, 1]} : vector<8x640xf32> to vector<8x128xf32>
    %49 = vector.extract_strided_slice %35 {offsets = [0, 384], sizes = [8, 128], strides = [1, 1]} : vector<8x640xf32> to vector<8x128xf32>
    %50 = arith.mulf %41, %49 : vector<8x128xf32>
    %51 = arith.addf %48, %50 : vector<8x128xf32>
    %52 = math.tanh %51 : vector<8x128xf32>
    %53 = arith.subf %29, %52 : vector<8x128xf32>
    %54 = arith.mulf %47, %53 : vector<8x128xf32>
    %55 = arith.addf %52, %54 : vector<8x128xf32>
    %56 = vector.extract_strided_slice %35 {offsets = [0, 512], sizes = [8, 128], strides = [1, 1]} : vector<8x640xf32> to vector<8x128xf32>
    %c0_16 = arith.constant 0 : index
    %c0_17 = arith.constant 0 : index
    %c0_18 = arith.constant 0 : index
    %57 = vector.load %arg6[%c0_16, %c0_17, %c0_18] : memref<8x8x128xf32, #tpu.memory_space<vmem>>, vector<1x8x128xf32>
    %58 = vector.shape_cast %57 : vector<1x8x128xf32> to vector<8x128xf32>
    %59 = vector.shape_cast %56 : vector<8x128xf32> to vector<1x8x128xf32>
    tpu.vector_store %arg6[%c0_16, %c0_17, %c0_18], %59 {strides = array<i32>} : memref<8x8x128xf32, #tpu.memory_space<vmem>>, vector<1x8x128xf32>,
    %c2 = arith.constant 2 : index
    %c0_19 = arith.constant 0 : index
    %c0_20 = arith.constant 0 : index
    %60 = vector.load %arg2[%c2, %c0_19, %c0_20] : memref<8x8x128xf32, #tpu.memory_space<vmem>>, vector<1x8x128xf32>
    %61 = vector.shape_cast %60 : vector<1x8x128xf32> to vector<8x128xf32>
    %62 = tpu.concatenate %61, %55 in 1 : vector<8x128xf32>, vector<8x128xf32> -> vector<8x256xf32>
    %63 = arith.truncf %62 : vector<8x256xf32> to vector<8x256xbf16>
    %c0_21 = arith.constant 0 : index
    %c0_22 = arith.constant 0 : index
    %64 = vector.load %arg3[%c0_21, %c0_22] : memref<256x640xbf16, #tpu.memory_space<vmem>>, vector<256x640xbf16>
    %cst_23 = arith.constant dense<0.000000e+00> : vector<8x640xf32>
    %65 = tpu.matmul %63, %64, %cst_23 {dimension_numbers = #tpu.dot_dimension_numbers<[1], [0], [0], [1], [0, 0, 1, 1], [], []>} : vector<8x256xbf16>, vector<256x640xbf16>, vector<8x640xf32> -> vector<8x640xf32>
    %66 = vector.extract_strided_slice %65 {offsets = [0, 0], sizes = [8, 128], strides = [1, 1]} : vector<8x640xf32> to vector<8x128xf32>
    %67 = arith.negf %66 : vector<8x128xf32>
    %68 = math.exp %67 : vector<8x128xf32>
    %cst_24 = arith.constant 1.000000e+00 : f32
    %69 = vector.broadcast %cst_24 : f32 to vector<8x128xf32>
    %70 = arith.addf %69, %68 : vector<8x128xf32>
    %71 = arith.divf %69, %70 : vector<8x128xf32>
    %72 = vector.extract_strided_slice %65 {offsets = [0, 128], sizes = [8, 128], strides = [1, 1]} : vector<8x640xf32> to vector<8x128xf32>
    %73 = arith.negf %72 : vector<8x128xf32>
    %74 = math.exp %73 : vector<8x128xf32>
    %cst_25 = arith.constant 1.000000e+00 : f32
    %75 = vector.broadcast %cst_25 : f32 to vector<8x128xf32>
    %76 = arith.addf %75, %74 : vector<8x128xf32>
    %77 = arith.divf %75, %76 : vector<8x128xf32>
    %78 = vector.extract_strided_slice %65 {offsets = [0, 256], sizes = [8, 128], strides = [1, 1]} : vector<8x640xf32> to vector<8x128xf32>
    %79 = vector.extract_strided_slice %65 {offsets = [0, 384], sizes = [8, 128], strides = [1, 1]} : vector<8x640xf32> to vector<8x128xf32>
    %80 = arith.mulf %71, %79 : vector<8x128xf32>
    %81 = arith.addf %78, %80 : vector<8x128xf32>
    %82 = math.tanh %81 : vector<8x128xf32>
    %83 = arith.subf %55, %82 : vector<8x128xf32>
    %84 = arith.mulf %77, %83 : vector<8x128xf32>
    %85 = arith.addf %82, %84 : vector<8x128xf32>
    %86 = vector.extract_strided_slice %65 {offsets = [0, 512], sizes = [8, 128], strides = [1, 1]} : vector<8x640xf32> to vector<8x128xf32>
    %c1_26 = arith.constant 1 : index
    %c0_27 = arith.constant 0 : index
    %c0_28 = arith.constant 0 : index
    %87 = vector.load %arg6[%c1_26, %c0_27, %c0_28] : memref<8x8x128xf32, #tpu.memory_space<vmem>>, vector<1x8x128xf32>
    %88 = vector.shape_cast %87 : vector<1x8x128xf32> to vector<8x128xf32>
    %89 = vector.shape_cast %86 : vector<8x128xf32> to vector<1x8x128xf32>
    tpu.vector_store %arg6[%c1_26, %c0_27, %c0_28], %89 {strides = array<i32>} : memref<8x8x128xf32, #tpu.memory_space<vmem>>, vector<1x8x128xf32>,
    %c3 = arith.constant 3 : index
    %c0_29 = arith.constant 0 : index
    %c0_30 = arith.constant 0 : index
    %90 = vector.load %arg2[%c3, %c0_29, %c0_30] : memref<8x8x128xf32, #tpu.memory_space<vmem>>, vector<1x8x128xf32>
    %91 = vector.shape_cast %90 : vector<1x8x128xf32> to vector<8x128xf32>
    %92 = tpu.concatenate %91, %85 in 1 : vector<8x128xf32>, vector<8x128xf32> -> vector<8x256xf32>
    %93 = arith.truncf %92 : vector<8x256xf32> to vector<8x256xbf16>
    %c0_31 = arith.constant 0 : index
    %c0_32 = arith.constant 0 : index
    %94 = vector.load %arg3[%c0_31, %c0_32] : memref<256x640xbf16, #tpu.memory_space<vmem>>, vector<256x640xbf16>
    %cst_33 = arith.constant dense<0.000000e+00> : vector<8x640xf32>
    %95 = tpu.matmul %93, %94, %cst_33 {dimension_numbers = #tpu.dot_dimension_numbers<[1], [0], [0], [1], [0, 0, 1, 1], [], []>} : vector<8x256xbf16>, vector<256x640xbf16>, vector<8x640xf32> -> vector<8x640xf32>
    %96 = vector.extract_strided_slice %95 {offsets = [0, 0], sizes = [8, 128], strides = [1, 1]} : vector<8x640xf32> to vector<8x128xf32>
    %97 = arith.negf %96 : vector<8x128xf32>
    %98 = math.exp %97 : vector<8x128xf32>
    %cst_34 = arith.constant 1.000000e+00 : f32
    %99 = vector.broadcast %cst_34 : f32 to vector<8x128xf32>
    %100 = arith.addf %99, %98 : vector<8x128xf32>
    %101 = arith.divf %99, %100 : vector<8x128xf32>
    %102 = vector.extract_strided_slice %95 {offsets = [0, 128], sizes = [8, 128], strides = [1, 1]} : vector<8x640xf32> to vector<8x128xf32>
    %103 = arith.negf %102 : vector<8x128xf32>
    %104 = math.exp %103 : vector<8x128xf32>
    %cst_35 = arith.constant 1.000000e+00 : f32
    %105 = vector.broadcast %cst_35 : f32 to vector<8x128xf32>
    %106 = arith.addf %105, %104 : vector<8x128xf32>
    %107 = arith.divf %105, %106 : vector<8x128xf32>
    %108 = vector.extract_strided_slice %95 {offsets = [0, 256], sizes = [8, 128], strides = [1, 1]} : vector<8x640xf32> to vector<8x128xf32>
    %109 = vector.extract_strided_slice %95 {offsets = [0, 384], sizes = [8, 128], strides = [1, 1]} : vector<8x640xf32> to vector<8x128xf32>
    %110 = arith.mulf %101, %109 : vector<8x128xf32>
    %111 = arith.addf %108, %110 : vector<8x128xf32>
    %112 = math.tanh %111 : vector<8x128xf32>
    %113 = arith.subf %85, %112 : vector<8x128xf32>
    %114 = arith.mulf %107, %113 : vector<8x128xf32>
    %115 = arith.addf %112, %114 : vector<8x128xf32>
    %116 = vector.extract_strided_slice %95 {offsets = [0, 512], sizes = [8, 128], strides = [1, 1]} : vector<8x640xf32> to vector<8x128xf32>
    %c2_36 = arith.constant 2 : index
    %c0_37 = arith.constant 0 : index
    %c0_38 = arith.constant 0 : index
    %117 = vector.load %arg6[%c2_36, %c0_37, %c0_38] : memref<8x8x128xf32, #tpu.memory_space<vmem>>, vector<1x8x128xf32>
    %118 = vector.shape_cast %117 : vector<1x8x128xf32> to vector<8x128xf32>
    %119 = vector.shape_cast %116 : vector<8x128xf32> to vector<1x8x128xf32>
    tpu.vector_store %arg6[%c2_36, %c0_37, %c0_38], %119 {strides = array<i32>} : memref<8x8x128xf32, #tpu.memory_space<vmem>>, vector<1x8x128xf32>,
    %c4 = arith.constant 4 : index
    %c0_39 = arith.constant 0 : index
    %c0_40 = arith.constant 0 : index
    %120 = vector.load %arg2[%c4, %c0_39, %c0_40] : memref<8x8x128xf32, #tpu.memory_space<vmem>>, vector<1x8x128xf32>
    %121 = vector.shape_cast %120 : vector<1x8x128xf32> to vector<8x128xf32>
    %122 = tpu.concatenate %121, %115 in 1 : vector<8x128xf32>, vector<8x128xf32> -> vector<8x256xf32>
    %123 = arith.truncf %122 : vector<8x256xf32> to vector<8x256xbf16>
    %c0_41 = arith.constant 0 : index
    %c0_42 = arith.constant 0 : index
    %124 = vector.load %arg3[%c0_41, %c0_42] : memref<256x640xbf16, #tpu.memory_space<vmem>>, vector<256x640xbf16>
    %cst_43 = arith.constant dense<0.000000e+00> : vector<8x640xf32>
    %125 = tpu.matmul %123, %124, %cst_43 {dimension_numbers = #tpu.dot_dimension_numbers<[1], [0], [0], [1], [0, 0, 1, 1], [], []>} : vector<8x256xbf16>, vector<256x640xbf16>, vector<8x640xf32> -> vector<8x640xf32>
    %126 = vector.extract_strided_slice %125 {offsets = [0, 0], sizes = [8, 128], strides = [1, 1]} : vector<8x640xf32> to vector<8x128xf32>
    %127 = arith.negf %126 : vector<8x128xf32>
    %128 = math.exp %127 : vector<8x128xf32>
    %cst_44 = arith.constant 1.000000e+00 : f32
    %129 = vector.broadcast %cst_44 : f32 to vector<8x128xf32>
    %130 = arith.addf %129, %128 : vector<8x128xf32>
    %131 = arith.divf %129, %130 : vector<8x128xf32>
    %132 = vector.extract_strided_slice %125 {offsets = [0, 128], sizes = [8, 128], strides = [1, 1]} : vector<8x640xf32> to vector<8x128xf32>
    %133 = arith.negf %132 : vector<8x128xf32>
    %134 = math.exp %133 : vector<8x128xf32>
    %cst_45 = arith.constant 1.000000e+00 : f32
    %135 = vector.broadcast %cst_45 : f32 to vector<8x128xf32>
    %136 = arith.addf %135, %134 : vector<8x128xf32>
    %137 = arith.divf %135, %136 : vector<8x128xf32>
    %138 = vector.extract_strided_slice %125 {offsets = [0, 256], sizes = [8, 128], strides = [1, 1]} : vector<8x640xf32> to vector<8x128xf32>
    %139 = vector.extract_strided_slice %125 {offsets = [0, 384], sizes = [8, 128], strides = [1, 1]} : vector<8x640xf32> to vector<8x128xf32>
    %140 = arith.mulf %131, %139 : vector<8x128xf32>
    %141 = arith.addf %138, %140 : vector<8x128xf32>
    %142 = math.tanh %141 : vector<8x128xf32>
    %143 = arith.subf %115, %142 : vector<8x128xf32>
    %144 = arith.mulf %137, %143 : vector<8x128xf32>
    %145 = arith.addf %142, %144 : vector<8x128xf32>
    %146 = vector.extract_strided_slice %125 {offsets = [0, 512], sizes = [8, 128], strides = [1, 1]} : vector<8x640xf32> to vector<8x128xf32>
    %c3_46 = arith.constant 3 : index
    %c0_47 = arith.constant 0 : index
    %c0_48 = arith.constant 0 : index
    %147 = vector.load %arg6[%c3_46, %c0_47, %c0_48] : memref<8x8x128xf32, #tpu.memory_space<vmem>>, vector<1x8x128xf32>
    %148 = vector.shape_cast %147 : vector<1x8x128xf32> to vector<8x128xf32>
    %149 = vector.shape_cast %146 : vector<8x128xf32> to vector<1x8x128xf32>
    tpu.vector_store %arg6[%c3_46, %c0_47, %c0_48], %149 {strides = array<i32>} : memref<8x8x128xf32, #tpu.memory_space<vmem>>, vector<1x8x128xf32>,
    %c5 = arith.constant 5 : index
    %c0_49 = arith.constant 0 : index
    %c0_50 = arith.constant 0 : index
    %150 = vector.load %arg2[%c5, %c0_49, %c0_50] : memref<8x8x128xf32, #tpu.memory_space<vmem>>, vector<1x8x128xf32>
    %151 = vector.shape_cast %150 : vector<1x8x128xf32> to vector<8x128xf32>
    %152 = tpu.concatenate %151, %145 in 1 : vector<8x128xf32>, vector<8x128xf32> -> vector<8x256xf32>
    %153 = arith.truncf %152 : vector<8x256xf32> to vector<8x256xbf16>
    %c0_51 = arith.constant 0 : index
    %c0_52 = arith.constant 0 : index
    %154 = vector.load %arg3[%c0_51, %c0_52] : memref<256x640xbf16, #tpu.memory_space<vmem>>, vector<256x640xbf16>
    %cst_53 = arith.constant dense<0.000000e+00> : vector<8x640xf32>
    %155 = tpu.matmul %153, %154, %cst_53 {dimension_numbers = #tpu.dot_dimension_numbers<[1], [0], [0], [1], [0, 0, 1, 1], [], []>} : vector<8x256xbf16>, vector<256x640xbf16>, vector<8x640xf32> -> vector<8x640xf32>
    %156 = vector.extract_strided_slice %155 {offsets = [0, 0], sizes = [8, 128], strides = [1, 1]} : vector<8x640xf32> to vector<8x128xf32>
    %157 = arith.negf %156 : vector<8x128xf32>
    %158 = math.exp %157 : vector<8x128xf32>
    %cst_54 = arith.constant 1.000000e+00 : f32
    %159 = vector.broadcast %cst_54 : f32 to vector<8x128xf32>
    %160 = arith.addf %159, %158 : vector<8x128xf32>
    %161 = arith.divf %159, %160 : vector<8x128xf32>
    %162 = vector.extract_strided_slice %155 {offsets = [0, 128], sizes = [8, 128], strides = [1, 1]} : vector<8x640xf32> to vector<8x128xf32>
    %163 = arith.negf %162 : vector<8x128xf32>
    %164 = math.exp %163 : vector<8x128xf32>
    %cst_55 = arith.constant 1.000000e+00 : f32
    %165 = vector.broadcast %cst_55 : f32 to vector<8x128xf32>
    %166 = arith.addf %165, %164 : vector<8x128xf32>
    %167 = arith.divf %165, %166 : vector<8x128xf32>
    %168 = vector.extract_strided_slice %155 {offsets = [0, 256], sizes = [8, 128], strides = [1, 1]} : vector<8x640xf32> to vector<8x128xf32>
    %169 = vector.extract_strided_slice %155 {offsets = [0, 384], sizes = [8, 128], strides = [1, 1]} : vector<8x640xf32> to vector<8x128xf32>
    %170 = arith.mulf %161, %169 : vector<8x128xf32>
    %171 = arith.addf %168, %170 : vector<8x128xf32>
    %172 = math.tanh %171 : vector<8x128xf32>
    %173 = arith.subf %145, %172 : vector<8x128xf32>
    %174 = arith.mulf %167, %173 : vector<8x128xf32>
    %175 = arith.addf %172, %174 : vector<8x128xf32>
    %c8_i32 = arith.constant 8 : i32
    %176 = arith.muli %arg0, %c8_i32 : i32
    %c5_i32 = arith.constant 5 : i32
    %177 = arith.addi %176, %c5_i32 : i32
    %c13_i32 = arith.constant 13 : i32
    %178 = arith.cmpi slt, %177, %c13_i32 : i32
    %179 = arith.select %178, %175, %145 : vector<8x128xf32>
    %180 = vector.extract_strided_slice %155 {offsets = [0, 512], sizes = [8, 128], strides = [1, 1]} : vector<8x640xf32> to vector<8x128xf32>
    %c4_56 = arith.constant 4 : index
    %c0_57 = arith.constant 0 : index
    %c0_58 = arith.constant 0 : index
    %181 = vector.load %arg6[%c4_56, %c0_57, %c0_58] : memref<8x8x128xf32, #tpu.memory_space<vmem>>, vector<1x8x128xf32>
    %182 = vector.shape_cast %181 : vector<1x8x128xf32> to vector<8x128xf32>
    %183 = vector.shape_cast %180 : vector<8x128xf32> to vector<1x8x128xf32>
    tpu.vector_store %arg6[%c4_56, %c0_57, %c0_58], %183 {strides = array<i32>} : memref<8x8x128xf32, #tpu.memory_space<vmem>>, vector<1x8x128xf32>,
    %c6 = arith.constant 6 : index
    %c0_59 = arith.constant 0 : index
    %c0_60 = arith.constant 0 : index
    %184 = vector.load %arg2[%c6, %c0_59, %c0_60] : memref<8x8x128xf32, #tpu.memory_space<vmem>>, vector<1x8x128xf32>
    %185 = vector.shape_cast %184 : vector<1x8x128xf32> to vector<8x128xf32>
    %186 = tpu.concatenate %185, %179 in 1 : vector<8x128xf32>, vector<8x128xf32> -> vector<8x256xf32>
    %187 = arith.truncf %186 : vector<8x256xf32> to vector<8x256xbf16>
    %c0_61 = arith.constant 0 : index
    %c0_62 = arith.constant 0 : index
    %188 = vector.load %arg3[%c0_61, %c0_62] : memref<256x640xbf16, #tpu.memory_space<vmem>>, vector<256x640xbf16>
    %cst_63 = arith.constant dense<0.000000e+00> : vector<8x640xf32>
    %189 = tpu.matmul %187, %188, %cst_63 {dimension_numbers = #tpu.dot_dimension_numbers<[1], [0], [0], [1], [0, 0, 1, 1], [], []>} : vector<8x256xbf16>, vector<256x640xbf16>, vector<8x640xf32> -> vector<8x640xf32>
    %190 = vector.extract_strided_slice %189 {offsets = [0, 0], sizes = [8, 128], strides = [1, 1]} : vector<8x640xf32> to vector<8x128xf32>
    %191 = arith.negf %190 : vector<8x128xf32>
    %192 = math.exp %191 : vector<8x128xf32>
    %cst_64 = arith.constant 1.000000e+00 : f32
    %193 = vector.broadcast %cst_64 : f32 to vector<8x128xf32>
    %194 = arith.addf %193, %192 : vector<8x128xf32>
    %195 = arith.divf %193, %194 : vector<8x128xf32>
    %196 = vector.extract_strided_slice %189 {offsets = [0, 128], sizes = [8, 128], strides = [1, 1]} : vector<8x640xf32> to vector<8x128xf32>
    %197 = arith.negf %196 : vector<8x128xf32>
    %198 = math.exp %197 : vector<8x128xf32>
    %cst_65 = arith.constant 1.000000e+00 : f32
    %199 = vector.broadcast %cst_65 : f32 to vector<8x128xf32>
    %200 = arith.addf %199, %198 : vector<8x128xf32>
    %201 = arith.divf %199, %200 : vector<8x128xf32>
    %202 = vector.extract_strided_slice %189 {offsets = [0, 256], sizes = [8, 128], strides = [1, 1]} : vector<8x640xf32> to vector<8x128xf32>
    %203 = vector.extract_strided_slice %189 {offsets = [0, 384], sizes = [8, 128], strides = [1, 1]} : vector<8x640xf32> to vector<8x128xf32>
    %204 = arith.mulf %195, %203 : vector<8x128xf32>
    %205 = arith.addf %202, %204 : vector<8x128xf32>
    %206 = math.tanh %205 : vector<8x128xf32>
    %207 = arith.subf %179, %206 : vector<8x128xf32>
    %208 = arith.mulf %201, %207 : vector<8x128xf32>
    %209 = arith.addf %206, %208 : vector<8x128xf32>
    %c8_i32_66 = arith.constant 8 : i32
    %210 = arith.muli %arg0, %c8_i32_66 : i32
    %c6_i32 = arith.constant 6 : i32
    %211 = arith.addi %210, %c6_i32 : i32
    %c13_i32_67 = arith.constant 13 : i32
    %212 = arith.cmpi slt, %211, %c13_i32_67 : i32
    %213 = arith.select %212, %209, %179 : vector<8x128xf32>
    %214 = vector.extract_strided_slice %189 {offsets = [0, 512], sizes = [8, 128], strides = [1, 1]} : vector<8x640xf32> to vector<8x128xf32>
    %c5_68 = arith.constant 5 : index
    %c0_69 = arith.constant 0 : index
    %c0_70 = arith.constant 0 : index
    %215 = vector.load %arg6[%c5_68, %c0_69, %c0_70] : memref<8x8x128xf32, #tpu.memory_space<vmem>>, vector<1x8x128xf32>
    %216 = vector.shape_cast %215 : vector<1x8x128xf32> to vector<8x128xf32>
    %217 = vector.shape_cast %214 : vector<8x128xf32> to vector<1x8x128xf32>
    tpu.vector_store %arg6[%c5_68, %c0_69, %c0_70], %217 {strides = array<i32>} : memref<8x8x128xf32, #tpu.memory_space<vmem>>, vector<1x8x128xf32>,
    %c7 = arith.constant 7 : index
    %c0_71 = arith.constant 0 : index
    %c0_72 = arith.constant 0 : index
    %218 = vector.load %arg2[%c7, %c0_71, %c0_72] : memref<8x8x128xf32, #tpu.memory_space<vmem>>, vector<1x8x128xf32>
    %219 = vector.shape_cast %218 : vector<1x8x128xf32> to vector<8x128xf32>
    %220 = tpu.concatenate %219, %213 in 1 : vector<8x128xf32>, vector<8x128xf32> -> vector<8x256xf32>
    %221 = arith.truncf %220 : vector<8x256xf32> to vector<8x256xbf16>
    %c0_73 = arith.constant 0 : index
    %c0_74 = arith.constant 0 : index
    %222 = vector.load %arg3[%c0_73, %c0_74] : memref<256x640xbf16, #tpu.memory_space<vmem>>, vector<256x640xbf16>
    %cst_75 = arith.constant dense<0.000000e+00> : vector<8x640xf32>
    %223 = tpu.matmul %221, %222, %cst_75 {dimension_numbers = #tpu.dot_dimension_numbers<[1], [0], [0], [1], [0, 0, 1, 1], [], []>} : vector<8x256xbf16>, vector<256x640xbf16>, vector<8x640xf32> -> vector<8x640xf32>
    %224 = vector.extract_strided_slice %223 {offsets = [0, 0], sizes = [8, 128], strides = [1, 1]} : vector<8x640xf32> to vector<8x128xf32>
    %225 = arith.negf %224 : vector<8x128xf32>
    %226 = math.exp %225 : vector<8x128xf32>
    %cst_76 = arith.constant 1.000000e+00 : f32
    %227 = vector.broadcast %cst_76 : f32 to vector<8x128xf32>
    %228 = arith.addf %227, %226 : vector<8x128xf32>
    %229 = arith.divf %227, %228 : vector<8x128xf32>
    %230 = vector.extract_strided_slice %223 {offsets = [0, 128], sizes = [8, 128], strides = [1, 1]} : vector<8x640xf32> to vector<8x128xf32>
    %231 = arith.negf %230 : vector<8x128xf32>
    %232 = math.exp %231 : vector<8x128xf32>
    %cst_77 = arith.constant 1.000000e+00 : f32
    %233 = vector.broadcast %cst_77 : f32 to vector<8x128xf32>
    %234 = arith.addf %233, %232 : vector<8x128xf32>
    %235 = arith.divf %233, %234 : vector<8x128xf32>
    %236 = vector.extract_strided_slice %223 {offsets = [0, 256], sizes = [8, 128], strides = [1, 1]} : vector<8x640xf32> to vector<8x128xf32>
    %237 = vector.extract_strided_slice %223 {offsets = [0, 384], sizes = [8, 128], strides = [1, 1]} : vector<8x640xf32> to vector<8x128xf32>
    %238 = arith.mulf %229, %237 : vector<8x128xf32>
    %239 = arith.addf %236, %238 : vector<8x128xf32>
    %240 = math.tanh %239 : vector<8x128xf32>
    %241 = arith.subf %213, %240 : vector<8x128xf32>
    %242 = arith.mulf %235, %241 : vector<8x128xf32>
    %243 = arith.addf %240, %242 : vector<8x128xf32>
    %c8_i32_78 = arith.constant 8 : i32
    %244 = arith.muli %arg0, %c8_i32_78 : i32
    %c7_i32 = arith.constant 7 : i32
    %245 = arith.addi %244, %c7_i32 : i32
    %c13_i32_79 = arith.constant 13 : i32
    %246 = arith.cmpi slt, %245, %c13_i32_79 : i32
    %247 = arith.select %246, %243, %213 : vector<8x128xf32>
    %248 = vector.extract_strided_slice %223 {offsets = [0, 512], sizes = [8, 128], strides = [1, 1]} : vector<8x640xf32> to vector<8x128xf32>
    %c6_80 = arith.constant 6 : index
    %c0_81 = arith.constant 0 : index
    %c0_82 = arith.constant 0 : index
    %249 = vector.load %arg6[%c6_80, %c0_81, %c0_82] : memref<8x8x128xf32, #tpu.memory_space<vmem>>, vector<1x8x128xf32>
    %250 = vector.shape_cast %249 : vector<1x8x128xf32> to vector<8x128xf32>
    %251 = vector.shape_cast %248 : vector<8x128xf32> to vector<1x8x128xf32>
    tpu.vector_store %arg6[%c6_80, %c0_81, %c0_82], %251 {strides = array<i32>} : memref<8x8x128xf32, #tpu.memory_space<vmem>>, vector<1x8x128xf32>,
    %252 = arith.truncf %247 : vector<8x128xf32> to vector<8x128xbf16>
    %c0_83 = arith.constant 0 : index
    %c0_84 = arith.constant 0 : index
    %253 = vector.load %arg4[%c0_83, %c0_84] : memref<128x128xbf16, #tpu.memory_space<vmem>>, vector<128x128xbf16>
    %cst_85 = arith.constant dense<0.000000e+00> : vector<8x128xf32>
    %254 = tpu.matmul %252, %253, %cst_85 {dimension_numbers = #tpu.dot_dimension_numbers<[1], [0], [0], [1], [0, 0, 1, 1], [], []>} : vector<8x128xbf16>, vector<128x128xbf16>, vector<8x128xf32> -> vector<8x128xf32>
    %c0_86 = arith.constant 0 : index
    %c0_87 = arith.constant 0 : index
    %255 = vector.load %arg5[%c0_86, %c0_87] : memref<1x128xf32, #tpu.memory_space<vmem>>, vector<1x128xf32>
    %256 = vector.broadcast %255 : vector<1x128xf32> to vector<8x128xf32>
    %257 = arith.addf %254, %256 : vector<8x128xf32>
    %c7_88 = arith.constant 7 : index
    %c0_89 = arith.constant 0 : index
    %c0_90 = arith.constant 0 : index
    %258 = vector.load %arg6[%c7_88, %c0_89, %c0_90] : memref<8x8x128xf32, #tpu.memory_space<vmem>>, vector<1x8x128xf32>
    %259 = vector.shape_cast %258 : vector<1x8x128xf32> to vector<8x128xf32>
    %260 = vector.shape_cast %257 : vector<8x128xf32> to vector<1x8x128xf32>
    tpu.vector_store %arg6[%c7_88, %c0_89, %c0_90], %260 {strides = array<i32>} : memref<8x8x128xf32, #tpu.memory_space<vmem>>, vector<1x8x128xf32>,
    %c0_91 = arith.constant 0 : index
    %c0_92 = arith.constant 0 : index
    %261 = vector.load %arg8[%c0_91, %c0_92] : memref<8x128xf32, #tpu.memory_space<vmem>>, vector<8x128xf32>
    tpu.vector_store %arg8[%c0_91, %c0_92], %247 {strides = array<i32>} : memref<8x128xf32, #tpu.memory_space<vmem>>, vector<8x128xf32>,
    %c1_i32 = arith.constant 1 : i32
    %262 = arith.cmpi eq, %arg0, %c1_i32 : i32
    %263 = arith.extui %262 : i1 to i32
    %c0_i32_93 = arith.constant 0 : i32
    %264 = arith.cmpi ne, %263, %c0_i32_93 : i32
    scf.if %264 {
      %c0_94 = arith.constant 0 : index
      %c0_95 = arith.constant 0 : index
      %265 = vector.load %arg7[%c0_94, %c0_95] : memref<8x128xf32, #tpu.memory_space<vmem>>, vector<8x128xf32>
      tpu.vector_store %arg7[%c0_94, %c0_95], %247 {strides = array<i32>} : memref<8x128xf32, #tpu.memory_space<vmem>>, vector<8x128xf32>,
    } else {
    }
    return
  }
  func.func @transform_0(%arg0: i32) -> (i32, i32) {
    %c0_i32 = arith.constant 0 : i32
    %c0_i32_0 = arith.constant 0 : i32
    %c0_i32_1 = arith.constant 0 : i32
    return %c0_i32, %c0_i32_0 : i32, i32
  }
  func.func @transform_1(%arg0: i32) -> (i32, i32, i32) {
    %c0_i32 = arith.constant 0 : i32
    %c0_i32_0 = arith.constant 0 : i32
    %c0_i32_1 = arith.constant 0 : i32
    return %arg0, %c0_i32, %c0_i32_0 : i32, i32, i32
  }
  func.func @transform_2(%arg0: i32) -> (i32, i32) {
    %c0_i32 = arith.constant 0 : i32
    %c0_i32_0 = arith.constant 0 : i32
    %c0_i32_1 = arith.constant 0 : i32
    return %c0_i32, %c0_i32_0 : i32, i32
  }
  func.func @transform_3(%arg0: i32) -> (i32, i32) {
    %c0_i32 = arith.constant 0 : i32
    %c0_i32_0 = arith.constant 0 : i32
    %c0_i32_1 = arith.constant 0 : i32
    return %c0_i32, %c0_i32_0 : i32, i32
  }
  func.func @transform_4(%arg0: i32) -> (i32, i32) {
    %c0_i32 = arith.constant 0 : i32
    %c0_i32_0 = arith.constant 0 : i32
    %c0_i32_1 = arith.constant 0 : i32
    return %c0_i32, %c0_i32_0 : i32, i32
  }
  func.func @transform_5(%arg0: i32) -> (i32, i32, i32) {
    %c0_i32 = arith.constant 0 : i32
    %c0_i32_0 = arith.constant 0 : i32
    %c0_i32_1 = arith.constant 0 : i32
    return %arg0, %c0_i32, %c0_i32_0 : i32, i32, i32
  }
  func.func @transform_6(%arg0: i32) -> (i32, i32) {
    %c0_i32 = arith.constant 0 : i32
    %c0_i32_0 = arith.constant 0 : i32
    %c0_i32_1 = arith.constant 0 : i32
    return %c0_i32, %c0_i32_0 : i32, i32
  }
}

</mosaic_0001>

<bundles_post_ra>
// kernel: tpu_custom_call.1
= control target key start
LH: loop header
LB: loop body
LE: loop exit
PB: predicated region body
PF: predicated region fallthrough
CT: control target
= control target key end

     0   :  { %s8288_s0 = inlined_call_operand.hbm [shape: f32[8,128], index: 0, kind: input, shape index: {}]   ;;  %s8289_s1 = inlined_call_operand.hbm [shape: f32[16,8,128], index: 1, kind: input, shape index: {}]   ;;  %s8290_s2 = inlined_call_operand.hbm [shape: bf16[256,640], index: 2, kind: input, shape index: {}]   ;;  %s8291_s3 = inlined_call_operand.hbm [shape: bf16[128,128], index: 3, kind: input, shape index: {}]   ;;  %s8292_s4 = inlined_call_operand.vmem [shape: f32[1,128], index: 4, kind: input, shape index: {}]   ;;  %s8293_s5 = inlined_call_operand.hbm [shape: f32[16,8,128], index: 5, kind: output, shape index: {0}]   ;;  %s8294_s6 = inlined_call_operand.hbm [shape: f32[8,128], index: 6, kind: output, shape index: {1}]  }
   0x1   :  { %8339 = sst [smem:[#allocation39_spill]] %s8288_s0 }
   0x2   :  { %12 = vsyncpa [#allocation4], 0 }
   0x3   :  { %13 = vsyncpa [#allocation7], 0 }
   0x4   :  { %15 = vsyncpa [#allocation7 + $0x1], 0 }
   0x5   :  { %16 = vsyncpa [#allocation10], 0 }
   0x6   :  { %17 = vsyncpa [#allocation5], 0 }
   0x7   :  { %19 = vsyncpa [#allocation5 + $0x1], 0 }
   0x8   :  { %20 = vsyncpa [#allocation13], 0  ;;  %s7135_s21 = smov 0   ;;  %s7137_s22 = smov 0  }
   0x9   :  { %s7139_s23 = smov 0   ;;  %s7141_s24 = smov 0  }
   0xa LB: > { %s7156_s25 = sadd.s32 4294967295, %s7082_s24   ;;  %s5308_s26 = sadd.s32 4294967294, %s7082_s24   ;;  %s7082_s24 = sphi %s7141_s24, %s8442_s24   ;;  %s7078_s23 = sphi %s7139_s23, %s8446_s23   ;;  %s7074_s22 = sphi %s7137_s22, %s8445_s22   ;;  %s7070_s21 = sphi %s7135_s21, %s8444_s21  }
   0xb   : > { %s7160_s27 = sadd.s32 1, %s7082_s24   ;;  %s54_s28 = sadd.s32 1, %s7078_s23 }
   0xc   : > { %8340 = sst [smem:[#allocation20_spill]] %s7160_s27  ;;  %s51_s29 = ssub.s32 %s7082_s24, %s7160_s27 }
   0xd   : > { %p61_p0 = scmp.ne.s32.totalorder %s7078_s23, %s7074_s22  ;;  %p52_p1 = scmp.eq.s32.totalorder %s51_s29, 0 }
   0xe   : > { %p62_p2 = scmp.eq.s32.totalorder %s7082_s24, 0  ;;  %p67_p3 = scmp.ne.s32.totalorder %s7074_s22, %s7070_s21 }
   0xf   : > { %p8296_p4 = scmp.eq.s32.totalorder %s7156_s25, 0  ;;  %p8295_p7 = scmp.eq.s32.totalorder %s7156_s25, 1 }
  0x10   : > { %s7172_s30 = scalar_select %p52_p1, %s7078_s23, %s54_s28  }
  0x11   : > { %p7174_p5 = por %p62_p2, %p61_p0  ;;  %p7180_p6 = por %p8296_p4, %p67_p3 }
  0x12   : > { %8341 = sst [smem:[#allocation21_spill]] %s7172_s30  ;;  %p160_p8 = scmp.eq.s32.totalorder %s5308_s26, 1 }
  0x13   : > { %s8342_s7 = scalar_select %p7174_p5, 1, 0 }
  0x14   : > { %s8343_s8 = scalar_select %p7180_p6, 1, 0 }
  0x15   : > { %p5309_p9 = scmp.ge.s32.totalorder %s7082_s24, 1  ;;  %p188_p10 = scmp.lt.s32.totalorder %s7082_s24, 3 }
  0x16   : > { %p7189_p11 = por %p8295_p7, %p61_p0  ;;  %p7193_p12 = por %p160_p8, %p67_p3 }
  0x17   : > { %p7197_p13 = pnand %p5309_p9, %p188_p10  ;;  %s7084_s12 = smov [#allocation8]  }
  0x18   : > { %s8344_s9 = scalar_select %p7189_p11, 1, 0 }
  0x19   : > { %s8345_s10 = scalar_select %p7193_p12, 1, 0 }
  0x1a   : > { %s8346_s11 = scalar_select %p7197_p13, 1, 0 }
  0x1b   : > { %p6137_p2 = pneg %p7197_p13  ;;  %s211_s13 = sshll.u32 %s7084_s12, 4  ;;  %s212_s13 = int_to_ptr.vmem [resolvable:$true] %s211_s13 }
  0x1c   : > { %s7085_s15 = smov [#allocation3]   ;;  %s6860_s19 = scalar_lea.hbm %s8290_s2, 10240 }
  0x1d   : > { %p7206_p0 = pnand %p6137_p2, %p8296_p4  ;;  %s201_s16 = sshll.u32 %s7085_s15, 4  ;;  %s202_s16 = int_to_ptr.vmem [resolvable:$true] %s201_s16 }
  0x1e   : > { %p6861_p9 = scmp.ne.s32.totalorder %s8290_s2, %s6860_s19  ;;  %p6867_p7 = scmp.lt.u32.totalorder %s6860_s19, %s8290_s2 }
  0x1f   : > { %p7220_p10 = pneg %p7206_p0 }
  0x21   : > { %p6863_p2 = pnand %p7220_p10, %p6861_p9 }
  0x23   : > { %p6864_p3 = pneg %p6863_p2 }
  0x25   : > { %p6869_p1 = pnand %p6867_p7, %p6864_p3 }
  0x27   : > { %6872 = shalt.err (!%p6869_p1)
}
  0x28   : > { %s6873_s15 = scalar_lea.vmem %s212_s13, 10240  ;;  %p6881_p11 = scmp.lt.s32.totalorder %s212_s13, %s212_s13 }
  0x29   : > { %p6874_p4 = scmp.ne.s32.totalorder %s212_s13, %s6873_s15  ;;  %p6882_p6 = scmp.lt.s32.totalorder %s6873_s15, %s6873_s15 }
  0x2b   : > { %p6876_p8 = pnand %p6874_p4, %p7220_p10  ;;  %p6883_p13 = por %p6882_p6, %p6881_p11 }
  0x2d   : > { %p6877_p12 = pneg %p6876_p8 }
  0x2f   : > { %p6884_p5 = pnand %p6883_p13, %p6877_p12 }
  0x31   : > { %6887 = shalt.err (!%p6884_p5)
}
  0x32   : > { %s7086_s17 = smov 320   ;;  %s7087_s18 = smov 20  }
  0x33   : > { %6143 = dma.hbm_to_vmem [thread:$0]  (!%p7206_p0), %s8290_s2, 10240, %s212_s13, [#allocation7], %s7086_s17, %s7086_s17, %s7087_s18  }
  0x34   : > { %p8349_p7 = scmp.ne.s32.totalorder %s8342_s7, 0  ;;  %p8350_p1 = scmp.lt.s32.totalorder %s7082_s24, 2 }
  0x35   : > { %s8352_s0 = sld [smem:[#allocation39_spill]] }
  0x36   : > { %p7240_p4 = pnand %p8350_p1, %p8349_p7 }
  0x38   : > { %s8351_s26 = scalar_select %p7240_p4, 1, 0 }
  0x3b   : > { %s6888_s15 = scalar_lea.hbm %s8352_s0, 128 }
  0x3c   : > { %p6889_p5 = scmp.ne.s32.totalorder %s8352_s0, %s6888_s15  ;;  %p6895_p12 = scmp.lt.u32.totalorder %s6888_s15, %s8352_s0 }
  0x3e   : > { %p6891_p6 = pnand %p6889_p5, %p7220_p10 }
  0x40   : > { %p6892_p11 = pneg %p6891_p6 }
  0x42   : > { %p6897_p13 = pnand %p6895_p12, %p6892_p11 }
  0x44   : > { %6900 = shalt.err (!%p6897_p13)
}
  0x45   : > { %s6901_s7 = scalar_lea.vmem %s202_s16, 128  ;;  %p6909_p2 = scmp.lt.s32.totalorder %s202_s16, %s202_s16 }
  0x46   : > { %p6902_p3 = scmp.ne.s32.totalorder %s202_s16, %s6901_s7  ;;  %p6910_p7 = scmp.lt.s32.totalorder %s6901_s7, %s6901_s7 }
  0x48   : > { %p6904_p8 = pnand %p6902_p3, %p7220_p10  ;;  %p6911_p1 = por %p6910_p7, %p6909_p2 }
  0x4a   : > { %p6905_p9 = pneg %p6904_p8 }
  0x4c   : > { %p6912_p4 = pnand %p6911_p1, %p6905_p9 }
  0x4e   : > { %6915 = shalt.err (!%p6912_p4)
}
  0x4f   : > { %6140 = dma.hbm_to_vmem [thread:$0]  (!%p7206_p0), %s8352_s0, 128, %s202_s16, [#allocation4]  }
  0x50   : > { %s7088_s17 = smov [#allocation9]   ;;  %s6916_s12 = scalar_lea.hbm %s8291_s3, 1024 }
  0x51   : > { %s224_s18 = sshll.u32 %s7088_s17, 4  ;;  %p6917_p5 = scmp.ne.s32.totalorder %s8291_s3, %s6916_s12  ;;  %s225_s18 = int_to_ptr.vmem [resolvable:$true] %s224_s18 }
  0x52   : > { %p6923_p11 = scmp.lt.u32.totalorder %s6916_s12, %s8291_s3 }
  0x53   : > { %p6919_p4 = pnand %p6917_p5, %p7220_p10 }
  0x55   : > { %p6920_p6 = pneg %p6919_p4 }
  0x57   : > { %p6925_p12 = pnand %p6923_p11, %p6920_p6 }
  0x59   : > { %6928 = shalt.err (!%p6925_p12)
}
  0x5a   : > { %s6929_s16 = scalar_lea.vmem %s225_s18, 1024  ;;  %p6937_p9 = scmp.lt.s32.totalorder %s225_s18, %s225_s18 }
  0x5b   : > { %p6930_p13 = scmp.ne.s32.totalorder %s225_s18, %s6929_s16  ;;  %p6938_p2 = scmp.lt.s32.totalorder %s6929_s16, %s6929_s16 }
  0x5d   : > { %p6932_p3 = pnand %p6930_p13, %p7220_p10  ;;  %p6939_p7 = por %p6938_p2, %p6937_p9 }
  0x5f   : > { %p6933_p8 = pneg %p6932_p3 }
  0x61   : > { %p6940_p1 = pnand %p6939_p7, %p6933_p8 }
  0x63   : > { %6943 = shalt.err (!%p6940_p1)
}
  0x64   : > { %s7089_s27 = smov 64   ;;  %s7090_s30 = smov 4  }
  0x65   : > { %6146 = dma.hbm_to_vmem [thread:$0]  (!%p7206_p0), %s8291_s3, 1024, %s225_s18, [#allocation10], %s7089_s27, %s7089_s27, %s7090_s30  }
  0x66   : > { %s241_s28 = sand.u32 1, %s7082_s24   ;;  %s243_s29 = sand.u32 1, %s7078_s23  }
  0x67   : > { %s5314_s12 = sshll.u32 %s243_s29, 6  ;;  %s5932_s15 = sshll.u32 %s7082_s24, 10 }
  0x68   : > { %s7286_s7 = scalar_lea.hbm %s8289_s1, %s5932_s15  ;;  %s245_s16 = scalar_lea.vmem [#allocation6], %s5314_s12 }
  0x69   : > { %s252_s0 = sshll.u32 %s245_s16, 4  ;;  %s7290_s14 = scalar_lea.sflag [#allocation7], %s241_s28  ;;  %s7288_s0 = int_to_ptr.vmem [resolvable:$true] %s252_s0 }
  0x6a   : > { %s6944_s18 = scalar_lea.hbm %s7286_s7, 1024  ;;  %p8353_p10 = scmp.ne.s32.totalorder %s8351_s26, 0 }
  0x6b   : > { %p6945_p0 = scmp.ne.s32.totalorder %s7286_s7, %s6944_s18  ;;  %s6949_s17 = scalar_lea.hbm %s8289_s1, 2048 }
  0x6c   : > { %p6946_p5 = pneg %p8353_p10  ;;  %p6950_p11 = scmp.lt.u32.totalorder %s7286_s7, %s8289_s1 }
  0x6d   : > { %p6951_p12 = scmp.lt.u32.totalorder %s6949_s17, %s6944_s18  ;;  %p6953_p3 = scmp.lt.u32.totalorder %s6944_s18, %s7286_s7 }
  0x6e   : > { %p6947_p4 = pnand %p6946_p5, %p6945_p0 }
  0x6f   : > { %p6952_p13 = por %p6951_p12, %p6950_p11 }
  0x70   : > { %p6948_p6 = pneg %p6947_p4 }
  0x71   : > { %p6954_p8 = por %p6953_p3, %p6952_p13 }
  0x73   : > { %p6955_p9 = pnand %p6954_p8, %p6948_p6 }
  0x75   : > { %6958 = shalt.err (!%p6955_p9)
}
  0x76   : > { %s6959_s28 = scalar_lea.vmem %s7288_s0, 1024  ;;  %s7091_s12 = smov [#allocation6]  }
  0x77   : > { %p6960_p2 = scmp.ne.s32.totalorder %s7288_s0, %s6959_s28  ;;  %s6964_s15 = sshll.u32 %s7091_s12, 4  ;;  %s6965_s15 = int_to_ptr.vmem [resolvable:$false] %s6964_s15 }
  0x78   : > { %s6966_s19 = scalar_lea.vmem %s6965_s15, 2048  ;;  %p6967_p0 = scmp.lt.s32.totalorder %s7288_s0, %s6965_s15 }
  0x79   : > { %p6962_p7 = pnand %p6960_p2, %p6946_p5  ;;  %p6968_p4 = scmp.lt.s32.totalorder %s6966_s19, %s6959_s28 }
  0x7b   : > { %p6963_p1 = pneg %p6962_p7  ;;  %p6969_p11 = por %p6968_p4, %p6967_p0 }
  0x7d   : > { %p6970_p12 = pnand %p6969_p11, %p6963_p1 }
  0x7f   : > { %6973 = shalt.err (!%p6970_p12)
}
  0x80   : > { %s7092_s13 = smov 128   ;;  %s7093_s16 = smov 8  }
  0x81   : > { %6150 = dma.hbm_to_vmem [thread:$0]  (!%p8353_p10), %s7286_s7, 1024, %s7288_s0, %s7290_s14, %s7092_s13, %s7092_s13, %s7093_s16  }
  0x82   : > { %p8354_p5 = scmp.ne.s32.totalorder %s8346_s11, 0 }
  0x84   : > { %264 = sbr.rel (%p8354_p5) target bundleno = 2594 (0xa22), region = 40 }
  0x8b   : > { %p8355_p6 = scmp.eq.s32.totalorder %s7156_s25, 0 }
  0x8d   : > { %7045 = dma.done.wait (%p8355_p6), [#allocation4], 128   ;;  %p8356_p13 = pmov %p8355_p6 }
  0x8e   : > { %s270_s18 = sand.u32 1, %s7156_s25   ;;  %s272_s27 = sand.u32 1, %s7074_s22  }
  0x8f   : > { %7047 = vsyncadd (%p8356_p13), [#allocation4], 4294967168  ;;  %s5319_s30 = sshll.u32 %s272_s27, 6  ;;  %s271_s17 = scalar_lea.sflag [#allocation7], %s270_s18 }
  0x90   : > { %s7328_s26 = scalar_lea.vmem [#allocation6], %s5319_s30  ;;  %p8357_p10 = scmp.ne.s32.totalorder %s8343_s8, 0 }
  0x92   : > { %7049 = dma.done.wait (%p8357_p10), %s271_s17, 1024  }
  0x93   : > { %7051 = vsyncadd (%p8357_p10), %s271_s17, 4294966272  ;;  %p8358_p3 = pmov %p8355_p6 }
  0x95   : > { %7053 = dma.done.wait (%p8358_p3), [#allocation7], 10240   ;;  %p8359_p8 = pmov %p8358_p3 }
  0x96   : > { %p8360_p9 = pmov %p8358_p3 }
  0x97   : > { %7055 = vsyncadd (%p8359_p8), [#allocation7], 4294957056 }
  0x98   : > { %7057 = dma.done.wait (%p8360_p9), [#allocation10], 1024   ;;  %p8361_p2 = pmov %p8358_p3 }
  0x99   : > { %s7342_s0 = scalar_lea.vmem [#allocation11], %s5319_s30  ;;  %p8362_p7 = scmp.ne.s32.totalorder %s7156_s25, 0 }
  0x9a   : > { %7059 = vsyncadd (%p8361_p2), [#allocation10], 4294966272  ;;  %v318_v0 = vld [vmem:[#allocation3] sm:$0xff] (!%p8362_p7) }
  0x9b   : > { %317 = sbr.rel (%p8362_p7) target bundleno = 162 (0xa2), region = 60  ;;  %319 = vst [vmem:[#allocation2] sm:$0xff] (!%p8362_p7), %v318_v0 }
  0xa2 PF: > { %v7346_v1 = vld [vmem:[#allocation8 + $0x4] ss:$20 sps:$4 sm:$0xff]   ;;  %v7348_v2 = vld [vmem:[#allocation8] ss:$20 sps:$4 sm:$0xff]   ;;  %v7354_v4 = vld [vmem:[#allocation8 + $0x28] ss:$20 sps:$4 sm:$0xff]  }
  0xa3   : > { %740 = vmatprep.subr.bf16.mxu0 %v7346_v1  ;;  %v7351_v3 = vld [vmem:[#allocation8 + $0x2c] ss:$20 sps:$4 sm:$0xff]   ;;  %v7357_v5 = vld [vmem:[#allocation8 + $0x54] ss:$20 sps:$4 sm:$0xff]   ;;  %v7360_v6 = vld [vmem:[#allocation8 + $0x50] ss:$20 sps:$4 sm:$0xff]  }
  0xa4   : > { %741 = vmatpush1.bf16.msra.mxu0 %v7348_v2  ;;  %v7362_v7 = vld [vmem:[#allocation8 + $0x7c] ss:$20 sps:$4 sm:$0xff]   ;;  %v7365_v8 = vld [vmem:[#allocation8 + $0xc] ss:$20 sps:$4 sm:$0xff]   ;;  %v7374_v11 = vld [vmem:[#allocation8 + $0x34] ss:$20 sps:$4 sm:$0xff]  }
  0xa5   : > { %742 = vmatprep.subr.bf16.mxu0 %v7351_v3  ;;  %v7367_v9 = vld [vmem:[#allocation8 + $0x8] ss:$20 sps:$4 sm:$0xff]   ;;  %v7369_v10 = vld [vmem:[#allocation8 + $0x78] ss:$20 sps:$4 sm:$0xff]   ;;  %781 = vmatprep.subr.bf16.mxu1 %v7365_v8  ;;  %v7376_v12 = vld [vmem:[#allocation8 + $0x30] ss:$20 sps:$4 sm:$0xff]  }
  0xa6   : > { %782 = vmatpush1.bf16.msra.mxu1 %v7367_v9  ;;  %v7379_v13 = vld [vmem:[#allocation8 + $0xa4] ss:$20 sps:$4 sm:$0xff]   ;;  %v7382_v14 = vld [vmem:[#allocation8 + $0xa0] ss:$20 sps:$4 sm:$0xff]   ;;  %v7384_v15 = vld [vmem:[#allocation8 + $0x5c] ss:$20 sps:$4 sm:$0xff]  }
  0xa7   : > { %783 = vmatprep.subr.bf16.mxu1 %v7374_v11  ;;  %v7387_v16 = vld [vmem:[#allocation8 + $0xcc] ss:$20 sps:$4 sm:$0xff]   ;;  %v7394_v18 = vld [vmem:[#allocation8 + $0x84] ss:$20 sps:$4 sm:$0xff]   ;;  %v7396_v19 = vld [vmem:[#allocation8 + $0xc8] ss:$20 sps:$4 sm:$0xff]  }
  0xa8   : > { %743 = vmatpush1.bf16.msra.mxu0 %v7354_v4  ;;  %v7390_v17 = vld [vmem:[#allocation8 + $0x58] ss:$20 sps:$4 sm:$0xff]   ;;  %v7399_v20 = vld [vmem:[#allocation8 + $0xf4] ss:$20 sps:$4 sm:$0xff]   ;;  %v7408_v23 = vld [vmem:[#allocation8 + $0xf0] ss:$20 sps:$4 sm:$0xff]  }
  0xa9   : > { %744 = vmatprep.subr.bf16.mxu0 %v7357_v5  ;;  %v7402_v21 = vld [vmem:[#allocation8 + $0x80] ss:$20 sps:$4 sm:$0xff]   ;;  %v7411_v24 = vld [vmem:[#allocation8 + $0x11c] ss:$20 sps:$4 sm:$0xff]   ;;  %v7420_v27 = vld [vmem:[#allocation8 + $0x118] ss:$20 sps:$4 sm:$0xff]  }
  0xaa   : > { %784 = vmatpush1.bf16.msra.mxu1 %v7376_v12  ;;  %v7406_v22 = vld [vmem:[#allocation8 + $0xac] ss:$20 sps:$4 sm:$0xff]   ;;  %v7414_v25 = vld [vmem:[#allocation8 + $0xa8] ss:$20 sps:$4 sm:$0xff]   ;;  %v7423_v28 = vld [vmem:[#allocation8 + $0x144] ss:$20 sps:$4 sm:$0xff]  }
  0xab   : > { %785 = vmatprep.subr.bf16.mxu1 %v7384_v15  ;;  %v7418_v26 = vld [vmem:[#allocation8 + $0xd4] ss:$20 sps:$4 sm:$0xff]   ;;  %v7426_v29 = vld [vmem:[#allocation8 + $0xd0] ss:$20 sps:$4 sm:$0xff]   ;;  %v7435_v32 = vld [vmem:[#allocation8 + $0x16c] ss:$20 sps:$4 sm:$0xff]  }
  0xac   : > { %745 = vmatpush1.bf16.msra.mxu0 %v7360_v6  ;;  %v7430_v30 = vld [vmem:[#allocation8 + $0xfc] ss:$20 sps:$4 sm:$0xff]   ;;  %v7432_v31 = vld [vmem:[#allocation8 + $0x140] ss:$20 sps:$4 sm:$0xff]   ;;  %v7438_v33 = vld [vmem:[#allocation8 + $0xf8] ss:$20 sps:$4 sm:$0xff]  }
  0xad   : > { %746 = vmatprep.subr.bf16.mxu0 %v7362_v7  ;;  %v7442_v34 = vld [vmem:[#allocation8 + $0x124] ss:$20 sps:$4 sm:$0xff]   ;;  %v7444_v35 = vld [vmem:[#allocation8 + $0x168] ss:$20 sps:$4 sm:$0xff]   ;;  %v7448_v36 = vld [vmem:[#allocation8 + $0x120] ss:$20 sps:$4 sm:$0xff]  }
  0xae   : > { %786 = vmatpush1.bf16.msra.mxu1 %v7390_v17  ;;  %v320_v37 = vld [vmem:[#allocation2] sm:$0xff]  ;;  %v7454_v39 = vld [vmem:[#allocation8 + $0x14c] ss:$20 sps:$4 sm:$0xff]   ;;  %v7460_v42 = vld [vmem:[#allocation8 + $0x148] ss:$20 sps:$4 sm:$0xff]   ;;  %s8174_s8 = sshll.u32 %s7156_s25, 3 }
  0xaf   : > { %787 = vmatprep.subr.bf16.mxu1 %v7394_v18  ;;  %v7451_v38 = vld [vmem:[#allocation8 + $0x194] ss:$20 sps:$4 sm:$0xff]   ;;  %v323_v40 = vpack.c.bf16 %v320_v37, %v320_v37  ;;  %v7456_v41 = vld [vmem:[#allocation8 + $0x190] ss:$20 sps:$4 sm:$0xff]   ;;  %v7468_v45 = vld [vmem:[#allocation8 + $0x1b8] ss:$20 sps:$4 sm:$0xff]  }
  0xb0   : > { %747 = vmatpush1.bf16.msra.mxu0 %v7369_v10  ;;  %v7463_v43 = vld [vmem:[#allocation8 + $0x1bc] ss:$20 sps:$4 sm:$0xff]   ;;  %v7466_v44 = vld [vmem:[#allocation8 + $0x174] ss:$20 sps:$4 sm:$0xff]   ;;  %v7470_v46 = vld [vmem:[#allocation8 + $0x1e4] ss:$20 sps:$4 sm:$0xff]  }
  0xb1   : > { %748 = vmatprep.subr.bf16.mxu0 %v7379_v13  ;;  %772 = vmatprep.mubr.bf16.mxu0 %v323_v40  ;;  %v7472_v47 = vld [vmem:[#allocation8 + $0x170] ss:$20 sps:$4 sm:$0xff]   ;;  %v7480_v49 = vld [vmem:[#allocation8 + $0x1e0] ss:$20 sps:$4 sm:$0xff]   ;;  %v7482_v50 = vld [vmem:[#allocation8 + $0x198] ss:$20 sps:$4 sm:$0xff]  }
  0xb2   : > { %788 = vmatpush1.bf16.msra.mxu1 %v7402_v21  ;;  %813 = vmatprep.mubr.bf16.mxu1 %v323_v40  ;;  %v7476_v48 = vld [vmem:[#allocation8 + $0x19c] ss:$20 sps:$4 sm:$0xff]   ;;  %v7484_v51 = vld [vmem:[#allocation8 + $0x20c] ss:$20 sps:$4 sm:$0xff]   ;;  %v7486_v52 = vld [vmem:[#allocation8 + $0x1c4] ss:$20 sps:$4 sm:$0xff]  }
  0xb3   : > { %789 = vmatprep.subr.bf16.mxu1 %v7406_v22  ;;  %v7492_v53 = vld [vmem:[#allocation8 + $0x208] ss:$20 sps:$4 sm:$0xff]   ;;  %v7494_v54 = vld [vmem:[#allocation8 + $0x1c0] ss:$20 sps:$4 sm:$0xff]   ;;  %v7504_v57 = vld [vmem:[#allocation8 + $0x230] ss:$20 sps:$4 sm:$0xff]  }
  0xb4   : > { %749 = vmatpush1.bf16.msra.mxu0 %v7382_v14  ;;  %v7496_v55 = vld [vmem:[#allocation8 + $0x234] ss:$20 sps:$4 sm:$0xff]   ;;  %v7498_v56 = vld [vmem:[#allocation8 + $0x1ec] ss:$20 sps:$4 sm:$0xff]   ;;  %8364 = vst [vmem:[#allocation23_spill] sm:$0xff] %v7504_v57  ;;  %s3712_s11 = sadd.s32 5, %s8174_s8 }
  0xb5   : > { %750 = vmatprep.subr.bf16.mxu0 %v7387_v16  ;;  %8363 = vst [vmem:[#allocation22_spill] sm:$0xff] %v7496_v55  ;;  %v7506_v58 = vld [vmem:[#allocation8 + $0x1e8] ss:$20 sps:$4 sm:$0xff]   ;;  %v7516_v61 = vld [vmem:[#allocation8 + $0x258] ss:$20 sps:$4 sm:$0xff]   ;;  %v321_v62 = vld [vmem:[%s7328_s26] sm:$0xff] }
  0xb6   : > { %790 = vmatpush1.bf16.msra.mxu1 %v7414_v25  ;;  %v7508_v59 = vld [vmem:[#allocation8 + $0x25c] ss:$20 sps:$4 sm:$0xff]   ;;  %v7510_v60 = vld [vmem:[#allocation8 + $0x214] ss:$20 sps:$4 sm:$0xff]   ;;  %v7527_v37 = vld [vmem:[#allocation8 + $0x238] ss:$20 sps:$4 sm:$0xff]   ;;  %v322_v40 = vpack.c.bf16 %v321_v62, %v321_v62 }
  0xb7   : > { %791 = vmatprep.subr.bf16.mxu1 %v7418_v26  ;;  %v7519_v63 = vld [vmem:[#allocation8 + $0x210] ss:$20 sps:$4 sm:$0xff]   ;;  %v6815_v62 = vld [vmem:[#allocation8 + $0x168] ss:$20 sps:$4 sm:$0xff]   ;;  %p3713_p1 = scmp.lt.s32.totalorder %s3712_s11, 13  ;;  %s4376_s14 = sadd.s32 6, %s8174_s8 }
  0xb8   : > { %751 = vmatpush1.bf16.msra.mxu0 %v7396_v19  ;;  %v7521_v0 = vld [vmem:[#allocation8 + $0x23c] ss:$20 sps:$4 sm:$0xff]   ;;  %p4377_p0 = scmp.lt.s32.totalorder %s4376_s14, 13  ;;  %vm7095_vm2 = vmmov 0   ;;  %s5040_s29 = sadd.s32 7, %s8174_s8 }
  0xb9   : > { %752 = vmatprep.subr.bf16.mxu0 %v7399_v20  ;;  %s3714_s7 = scalar_select %p3713_p1, 1, 0 }
  0xba   : > { %792 = vmatpush1.bf16.msra.mxu1 %v7426_v29  ;;  %s4378_s20 = scalar_select %p4377_p0, 1, 0 }
  0xbb   : > { %793 = vmatprep.subr.bf16.mxu1 %v7430_v30  ;;  %p5041_p4 = scmp.lt.s32.totalorder %s5040_s29, 13  ;;  %p5924_p11 = scmp.ne.s32.totalorder %s7156_s25, 1 }
  0xbc   : > { %753 = vmatpush1.bf16.msra.mxu0 %v7408_v23 }
  0xbd   : > { %754 = vmatprep.subr.bf16.mxu0 %v7411_v24  ;;  %s5042_s28 = scalar_select %p5041_p4, 1, 0 }
  0xbe   : > { %794 = vmatpush1.bf16.msra.mxu1 %v7438_v33 }
  0xbf   : > { %795 = vmatprep.subr.bf16.mxu1 %v7442_v34 }
  0xc0   : > { %755 = vmatpush1.bf16.msra.mxu0 %v7420_v27 }
  0xc1   : > { %756 = vmatprep.subr.bf16.mxu0 %v7423_v28 }
  0xc2   : > { %796 = vmatpush1.bf16.msra.mxu1 %v7448_v36 }
  0xc3   : > { %797 = vmatprep.subr.bf16.mxu1 %v7454_v39 }
  0xc4   : > { %757 = vmatpush1.bf16.msra.mxu0 %v7432_v31 }
  0xc5   : > { %758 = vmatprep.subr.bf16.mxu0 %v7435_v32 }
  0xc6   : > { %798 = vmatpush1.bf16.msra.mxu1 %v7460_v42 }
  0xc7   : > { %799 = vmatprep.subr.bf16.mxu1 %v7466_v44 }
  0xc8   : > { %759 = vmatpush1.bf16.msra.mxu0 %v7444_v35 }
  0xc9   : > { %760 = vmatprep.subr.bf16.mxu0 %v7451_v38 }
  0xca   : > { %800 = vmatpush1.bf16.msra.mxu1 %v7472_v47 }
  0xcb   : > { %801 = vmatprep.subr.bf16.mxu1 %v7476_v48 }
  0xcc   : > { %761 = vmatpush1.bf16.msra.mxu0 %v7456_v41 }
  0xcd   : > { %762 = vmatprep.subr.bf16.mxu0 %v7463_v43 }
  0xce   : > { %802 = vmatpush1.bf16.msra.mxu1 %v7482_v50 }
  0xcf   : > { %803 = vmatprep.subr.bf16.mxu1 %v7486_v52 }
  0xd0   : > { %763 = vmatpush1.bf16.msra.mxu0 %v7468_v45 }
  0xd1   : > { %764 = vmatprep.subr.bf16.mxu0 %v7470_v46 }
  0xd2   : > { %804 = vmatpush1.bf16.msra.mxu1 %v7494_v54 }
  0xd3   : > { %805 = vmatprep.subr.bf16.mxu1 %v7498_v56 }
  0xd4   : > { %765 = vmatpush1.bf16.msra.mxu0 %v7480_v49 }
  0xd5   : > { %766 = vmatprep.subr.bf16.mxu0 %v7484_v51 }
  0xd6   : > { %806 = vmatpush1.bf16.msra.mxu1 %v7506_v58 }
  0xd7   : > { %807 = vmatprep.subr.bf16.mxu1 %v7510_v60 }
  0xd8   : > { %767 = vmatpush1.bf16.msra.mxu0 %v7492_v53 }
  0xd9   : > { %768 = vmatprep.subr.bf16.mxu0 %v7496_v55  ;;  %v7529_v55 = vld [vmem:[#allocation8 + $0x264] ss:$20 sps:$4 sm:$0xff]  }
  0xda   : > { %808 = vmatpush1.bf16.msra.mxu1 %v7519_v63 }
  0xdb   : > { %809 = vmatprep.subr.bf16.mxu1 %v7521_v0 }
  0xdc   : > { %769 = vmatpush1.bf16.msra.mxu0 %v7504_v57  ;;  %v7535_v57 = vld [vmem:[#allocation8 + $0x260] ss:$20 sps:$4 sm:$0xff]  }
  0xdd   : > { %770 = vmatprep.subr.bf16.mxu0 %v7508_v59 }
  0xde   : > { %810 = vmatpush1.bf16.msra.mxu1 %v7527_v37 }
  0xdf   : > { %811 = vmatprep.subr.bf16.mxu1 %v7529_v55 }
  0xe0   : > { %771 = vmatpush1.bf16.msra.mxu0 %v7516_v61 }
  0xe1   : > { %940 = vmatprep.subr.bf16.mxu0 %v7346_v1  ;;  %v8365_v1 = vld [vmem:[#allocation22_spill] sm:$0xff] }
  0xe2   : > { %812 = vmatpush1.bf16.msra.mxu1 %v7535_v57 }
  0xe3   : > { %773 = vmatmul.mubr.bf16.vlgmr.msra.gmra.mrb[0].mxu0 %v322_v40  ;;  %981 = vmatprep.subr.bf16.mxu1 %v7365_v8 }
  0xe4   : > { %941 = vmatpush1.bf16.msra.mxu0 %v7348_v2  ;;  %v8366_v2 = vld [vmem:[#allocation23_spill] sm:$0xff] }
  0xe5   : > { %942 = vmatprep.subr.bf16.mxu0 %v7351_v3  ;;  %814 = vmatmul.mubr.bf16.vlgmr.msra.gmra.mrb[0].mxu1 %v322_v40  ;;  %v6795_v3 = vld [vmem:[#allocation8 + $0x4] ss:$20 sps:$4 sm:$0xff]  }
  0xe6   : > { %982 = vmatpush1.bf16.msra.mxu1 %v7367_v9  ;;  %v6819_v40 = vld [vmem:[#allocation8 + $0x1b8] ss:$20 sps:$4 sm:$0xff]  }
  0xe7   : > { %983 = vmatprep.subr.bf16.mxu1 %v7374_v11 }
  0xe8   : > { %943 = vmatpush1.bf16.msra.mxu0 %v7354_v4  ;;  %v6307_v4 = vld [vmem:[#allocation8 + $0x150] ss:$20 sps:$4 sm:$0xff]  }
  0xe9   : > { %944 = vmatprep.subr.bf16.mxu0 %v7357_v5 }
  0xea   : > { %984 = vmatpush1.bf16.msra.mxu1 %v7376_v12 }
  0xeb   : > { %985 = vmatprep.subr.bf16.mxu1 %v7384_v15 }
  0xec   : > { %945 = vmatpush1.bf16.msra.mxu0 %v7360_v6 }
  0xed   : > { %946 = vmatprep.subr.bf16.mxu0 %v7362_v7 }
  0xee   : > { %986 = vmatpush1.bf16.msra.mxu1 %v7390_v17 }
  0xef   : > { %987 = vmatprep.subr.bf16.mxu1 %v7394_v18 }
  0xf0   : > { %947 = vmatpush1.bf16.msra.mxu0 %v7369_v10 }
  0xf1   : > { %948 = vmatprep.subr.bf16.mxu0 %v7379_v13 }
  0xf2   : > { %988 = vmatpush1.bf16.msra.mxu1 %v7402_v21 }
  0xf3   : > { %989 = vmatprep.subr.bf16.mxu1 %v7406_v22 }
  0xf4   : > { %949 = vmatpush1.bf16.msra.mxu0 %v7382_v14 }
  0xf5   : > { %950 = vmatprep.subr.bf16.mxu0 %v7387_v16 }
  0xf6   : > { %990 = vmatpush1.bf16.msra.mxu1 %v7414_v25 }
  0xf7   : > { %991 = vmatprep.subr.bf16.mxu1 %v7418_v26 }
  0xf8   : > { %951 = vmatpush1.bf16.msra.mxu0 %v7396_v19 }
  0xf9   : > { %952 = vmatprep.subr.bf16.mxu0 %v7399_v20 }
  0xfa   : > { %992 = vmatpush1.bf16.msra.mxu1 %v7426_v29 }
  0xfb   : > { %993 = vmatprep.subr.bf16.mxu1 %v7430_v30 }
  0xfc   : > { %953 = vmatpush1.bf16.msra.mxu0 %v7408_v23  ;;  %v6796_v23 = vld [vmem:[#allocation2] sm:$0xff] }
  0xfd   : > { %954 = vmatprep.subr.bf16.mxu0 %v7411_v24 }
  0xfe   : > { %994 = vmatpush1.bf16.msra.mxu1 %v7438_v33  ;;  %v6310_v33 = vld [vmem:[#allocation8 + $0x38] ss:$20 sps:$4 sm:$0xff]  }
  0xff   : > { %995 = vmatprep.subr.bf16.mxu1 %v7442_v34  ;;  %v6311_v34 = vld [vmem:[#allocation8 + $0x1a0] ss:$20 sps:$4 sm:$0xff]  }
 0x100   : > { %955 = vmatpush1.bf16.msra.mxu0 %v7420_v27  ;;  %v5390_v27 = vld [vmem:[%s7328_s26 + $0x8] sm:$0xff] }
 0x101   : > { %956 = vmatprep.subr.bf16.mxu0 %v7423_v28  ;;  %v7606_v29 = vpack.c.bf16 %v5390_v27, %v5390_v27  ;;  %v6842_v27 = vld [vmem:[#allocation8 + $0x124] ss:$20 sps:$4 sm:$0xff]  }
 0x102   : > { %996 = vmatpush1.bf16.msra.mxu1 %v7448_v36  ;;  %v6798_v36 = vld [vmem:[#allocation8 + $0x2c] ss:$20 sps:$4 sm:$0xff]  }
 0x103   : > { %997 = vmatprep.subr.bf16.mxu1 %v7454_v39  ;;  %v6313_v39 = vld [vmem:[#allocation8 + $0x1c8] ss:$20 sps:$4 sm:$0xff]  }
 0x104   : > { %957 = vmatpush1.bf16.msra.mxu0 %v7432_v31  ;;  %v6308_v31 = vld [vmem:[#allocation8 + $0x10] ss:$20 sps:$4 sm:$0xff]  }
 0x105   : > { %958 = vmatprep.subr.bf16.mxu0 %v7435_v32  ;;  %v6309_v32 = vld [vmem:[#allocation8 + $0x178] ss:$20 sps:$4 sm:$0xff]  }
 0x106   : > { %998 = vmatpush1.bf16.msra.mxu1 %v7460_v42  ;;  %v6800_v42 = vld [vmem:[#allocation8 + $0x54] ss:$20 sps:$4 sm:$0xff]  }
 0x107   : > { %999 = vmatprep.subr.bf16.mxu1 %v7466_v44  ;;  %v6315_v44 = vld [vmem:[#allocation8 + $0x1f0] ss:$20 sps:$4 sm:$0xff]  }
 0x108   : > { %959 = vmatpush1.bf16.msra.mxu0 %v7444_v35  ;;  %v6797_v35 = vld [vmem:[#allocation8] ss:$20 sps:$4 sm:$0xff]  }
 0x109   : > { %960 = vmatprep.subr.bf16.mxu0 %v7451_v38  ;;  %v6312_v38 = vld [vmem:[#allocation8 + $0x60] ss:$20 sps:$4 sm:$0xff]  }
 0x10a   : > { %1000 = vmatpush1.bf16.msra.mxu1 %v7472_v47  ;;  %v6316_v47 = vld [vmem:[#allocation8 + $0xb0] ss:$20 sps:$4 sm:$0xff]  }
 0x10b   : > { %1001 = vmatprep.subr.bf16.mxu1 %v7476_v48  ;;  %v6317_v48 = vld [vmem:[#allocation8 + $0x218] ss:$20 sps:$4 sm:$0xff]  }
 0x10c   : > { %961 = vmatpush1.bf16.msra.mxu0 %v7456_v41  ;;  %v6799_v41 = vld [vmem:[#allocation8 + $0x28] ss:$20 sps:$4 sm:$0xff]  }
 0x10d   : > { %962 = vmatprep.subr.bf16.mxu0 %v7463_v43  ;;  %v6314_v43 = vld [vmem:[#allocation8 + $0x88] ss:$20 sps:$4 sm:$0xff]  }
 0x10e   : > { %1002 = vmatpush1.bf16.msra.mxu1 %v7482_v50  ;;  %v6804_v50 = vld [vmem:[#allocation8 + $0xa4] ss:$20 sps:$4 sm:$0xff]  }
 0x10f   : > { %1003 = vmatprep.subr.bf16.mxu1 %v7486_v52  ;;  %v6805_v52 = vld [vmem:[#allocation8 + $0xa0] ss:$20 sps:$4 sm:$0xff]  }
 0x110   : > { %963 = vmatpush1.bf16.msra.mxu0 %v7468_v45  ;;  %v6801_v45 = vld [vmem:[#allocation8 + $0x50] ss:$20 sps:$4 sm:$0xff]  }
 0x111   : > { %964 = vmatprep.subr.bf16.mxu0 %v7470_v46  ;;  %v6802_v46 = vld [vmem:[#allocation8 + $0x7c] ss:$20 sps:$4 sm:$0xff]  }
 0x112   : > { %1004 = vmatpush1.bf16.msra.mxu1 %v7494_v54  ;;  %v6807_v54 = vld [vmem:[#allocation8 + $0xc8] ss:$20 sps:$4 sm:$0xff]  }
 0x113   : > { %1005 = vmatprep.subr.bf16.mxu1 %v7498_v56  ;;  %v6809_v56 = vld [vmem:[#allocation8 + $0xf0] ss:$20 sps:$4 sm:$0xff]  }
 0x114   : > { %965 = vmatpush1.bf16.msra.mxu0 %v7480_v49  ;;  %v6803_v49 = vld [vmem:[#allocation8 + $0x78] ss:$20 sps:$4 sm:$0xff]  }
 0x115   : > { %966 = vmatprep.subr.bf16.mxu0 %v7484_v51  ;;  %v6318_v51 = vld [vmem:[#allocation8 + $0xd8] ss:$20 sps:$4 sm:$0xff]  }
 0x116   : > { %1006 = vmatpush1.bf16.msra.mxu1 %v7506_v58  ;;  %v6811_v58 = vld [vmem:[#allocation8 + $0x118] ss:$20 sps:$4 sm:$0xff]  }
 0x117   : > { %1007 = vmatprep.subr.bf16.mxu1 %v7510_v60  ;;  %v6813_v60 = vld [vmem:[#allocation8 + $0x140] ss:$20 sps:$4 sm:$0xff]  }
 0x118   : > { %967 = vmatpush1.bf16.msra.mxu0 %v7492_v53  ;;  %v6806_v53 = vld [vmem:[#allocation8 + $0xcc] ss:$20 sps:$4 sm:$0xff]  }
 0x119   : > { %968 = vmatprep.subr.bf16.mxu0 %v8365_v1  ;;  %v6820_v1 = vld [vmem:[#allocation8 + $0x1e4] ss:$20 sps:$4 sm:$0xff]  }
 0x11a   : > { %1008 = vmatpush1.bf16.msra.mxu1 %v7519_v63  ;;  %v6816_v63 = vld [vmem:[#allocation8 + $0x194] ss:$20 sps:$4 sm:$0xff]  }
 0x11b   : > { %1009 = vmatprep.subr.bf16.mxu1 %v7521_v0  ;;  %v6817_v0 = vld [vmem:[#allocation8 + $0x190] ss:$20 sps:$4 sm:$0xff]  }
 0x11c   : > { %969 = vmatpush1.bf16.msra.mxu0 %v8366_v2  ;;  %v6821_v2 = vld [vmem:[#allocation8 + $0x1e0] ss:$20 sps:$4 sm:$0xff]  }
 0x11d   : > { %970 = vmatprep.subr.bf16.mxu0 %v7508_v59  ;;  %v6812_v59 = vld [vmem:[#allocation8 + $0x144] ss:$20 sps:$4 sm:$0xff]  }
 0x11e   : > { %1010 = vmatpush1.bf16.msra.mxu1 %v7527_v37  ;;  %v6818_v37 = vld [vmem:[#allocation8 + $0x1bc] ss:$20 sps:$4 sm:$0xff]  }
 0x11f   : > { %1011 = vmatprep.subr.bf16.mxu1 %v7529_v55  ;;  %v6808_v55 = vld [vmem:[#allocation8 + $0xf4] ss:$20 sps:$4 sm:$0xff]  }
 0x120   : > { %971 = vmatpush1.bf16.msra.mxu0 %v7516_v61  ;;  %v6814_v61 = vld [vmem:[#allocation8 + $0x16c] ss:$20 sps:$4 sm:$0xff]  }
 0x121   : > { %5934 = vmatprep.subr.bf16.mxu0 %v6307_v4  ;;  %v6823_v4 = vld [vmem:[#allocation8 + $0x208] ss:$20 sps:$4 sm:$0xff]  }
 0x122   : > { %1012 = vmatpush1.bf16.msra.mxu1 %v7535_v57  ;;  %v6810_v57 = vld [vmem:[#allocation8 + $0x11c] ss:$20 sps:$4 sm:$0xff]  }
 0x123   : > { %1597 = vmatprep.subr.bf16.mxu1 %v6795_v3  ;;  %v6822_v3 = vld [vmem:[#allocation8 + $0x20c] ss:$20 sps:$4 sm:$0xff]  }
 0x1b6   : > { %v774_v5 = vpop.f32.mrb[0].mxu0 }
 0x1b7   : > { %v5388_v6 = vmul.f32 -1.442695, %v774_v5  ;;  %v776_v7 = vpop.f32.mrb[1].mxu0  ;;  %v6824_v5 = vld [vmem:[#allocation8 + $0x234] ss:$20 sps:$4 sm:$0xff]  }
 0x1b8   : > { %v778_v8 = vpop.f32.mrb[2].mxu0  ;;  %v815_v10 = vpop.f32.mrb[0].mxu1  ;;  %v5389_v13 = vmul.f32 -1.442695, %v776_v7  ;;  %v6826_v7 = vld [vmem:[#allocation8 + $0x25c] ss:$20 sps:$4 sm:$0xff]  }
 0x1b9   : > { %6715 = vpow2.f32 %v5388_v6  ;;  %v779_v9 = vpop.f32.mrb[3].mxu0  ;;  %v817_v11 = vpop.f32.mrb[1].mxu1  ;;  %v6825_v6 = vld [vmem:[#allocation8 + $0x230] ss:$20 sps:$4 sm:$0xff]   ;;  %v6827_v8 = vld [vmem:[#allocation8 + $0x258] ss:$20 sps:$4 sm:$0xff]  }
 0x1ba   : > { %v819_v12 = vpop.f32.mrb[2].mxu1  ;;  %6717 = vpow2.f32 %v5389_v13  ;;  %v6319_v9 = vld [vmem:[#allocation8 + $0x240] ss:$20 sps:$4 sm:$0xff]  }
 0x1bb   : > { %v820_v14 = vpop.f32.mrb[3].mxu1  ;;  %v6322_v12 = vld [vmem:[#allocation8 + $0x128] ss:$20 sps:$4 sm:$0xff]   ;;  %v6828_v13 = vld [vmem:[#allocation8 + $0xc] ss:$20 sps:$4 sm:$0xff]  }
 0x1bc   : > { %v6829_v14 = vld [vmem:[#allocation8 + $0x8] ss:$20 sps:$4 sm:$0xff]  }
 0x1c3   : > { %v6716_v15 = vpop.eup %6715 }
 0x1c4   : > { %v825_v16 = vadd.f32 1.0, %v6716_v15  ;;  %v6718_v17 = vpop.eup %6717  ;;  %v6830_v15 = vld [vmem:[#allocation8 + $0x34] ss:$20 sps:$4 sm:$0xff]  }
 0x1c5   : > { %v831_v20 = vadd.f32 1.0, %v6718_v17  ;;  %v6832_v17 = vld [vmem:[#allocation8 + $0x5c] ss:$20 sps:$4 sm:$0xff]  }
 0x1c6   : > { %6719 = vrcp.f32 %v825_v16  ;;  %v6831_v16 = vld [vmem:[#allocation8 + $0x30] ss:$20 sps:$4 sm:$0xff]  }
 0x1d0   : > { %v6720_v18 = vpop.eup %6719 }
 0x1d1   : > { %v834_v19 = vmul.f32 %v6720_v18, %v817_v11  ;;  %v6321_v11 = vld [vmem:[#allocation8 + $0x268] ss:$20 sps:$4 sm:$0xff]   ;;  %v6833_v18 = vld [vmem:[#allocation8 + $0x58] ss:$20 sps:$4 sm:$0xff]  }
 0x1d3   : > { %v835_v21 = vadd.f32 %v834_v19, %v815_v10  ;;  %v6320_v10 = vld [vmem:[#allocation8 + $0x100] ss:$20 sps:$4 sm:$0xff]   ;;  %v6834_v19 = vld [vmem:[#allocation8 + $0x84] ss:$20 sps:$4 sm:$0xff]  }
 0x1d5   : > { %6721 = vtanh.f32 %v835_v21  ;;  %v6836_v21 = vld [vmem:[#allocation8 + $0xac] ss:$20 sps:$4 sm:$0xff]  }
 0x1d6   : > { %6723 = vrcp.f32 %v831_v20  ;;  %v6835_v20 = vld [vmem:[#allocation8 + $0x80] ss:$20 sps:$4 sm:$0xff]  }
 0x1df   : > { %v6722_v22 = vpop.eup %6721 }
 0x1e0   : > { %v837_v24 = vsub.f32 %v6796_v23, %v6722_v22  ;;  %v6724_v25 = vpop.eup %6723  ;;  %v6838_v23 = vld [vmem:[#allocation8 + $0xd4] ss:$20 sps:$4 sm:$0xff]  }
 0x1e2   : > { %v838_v26 = vmul.f32 %v6724_v25, %v837_v24  ;;  %v6839_v24 = vld [vmem:[#allocation8 + $0xd0] ss:$20 sps:$4 sm:$0xff]  }
 0x1e3   : > { %v6840_v25 = vld [vmem:[#allocation8 + $0xfc] ss:$20 sps:$4 sm:$0xff]  }
 0x1e4   : > { %v7604_v28 = vadd.f32 %v6722_v22, %v838_v26  ;;  %v6837_v22 = vld [vmem:[#allocation8 + $0xa8] ss:$20 sps:$4 sm:$0xff]   ;;  %v6841_v26 = vld [vmem:[#allocation8 + $0xf8] ss:$20 sps:$4 sm:$0xff]  }
 0x1e6   : > { %v843_v30 = vpack.c.bf16 %v7604_v28, %v7604_v28 }
 0x1e8   : > { %972 = vmatprep.mubr.bf16.mxu0 %v843_v30  ;;  %1013 = vmatprep.mubr.bf16.mxu1 %v843_v30 }
 0x1e9   : > { %973 = vmatmul.mubr.bf16.vlgmr.msra.gmra.mrb[4].mxu0 %v7606_v29  ;;  %1014 = vmatmul.mubr.bf16.vlgmr.msra.gmra.mrb[4].mxu1 %v7606_v29 }
 0x1ea   : > { %1054 = vmatprep.mubr.bf16.mxu0 %v843_v30  ;;  %5935 = vmatpush3.bf16.msra.mxu0 %v6308_v31  ;;  %v6844_v30 = vld [vmem:[#allocation8 + $0x14c] ss:$20 sps:$4 sm:$0xff]   ;;  %v6845_v31 = vld [vmem:[#allocation8 + $0x148] ss:$20 sps:$4 sm:$0xff]  }
 0x1eb   : > { %5936 = vmatprep.subr.bf16.mxu0 %v6309_v32  ;;  %1598 = vmatpush1.bf16.msra.mxu1 %v6797_v35  ;;  %v6846_v32 = vld [vmem:[#allocation8 + $0x174] ss:$20 sps:$4 sm:$0xff]   ;;  %v6849_v35 = vld [vmem:[#allocation8 + $0x198] ss:$20 sps:$4 sm:$0xff]  }
 0x1ec   : > { %1599 = vmatprep.subr.bf16.mxu1 %v6798_v36  ;;  %v6850_v36 = vld [vmem:[#allocation8 + $0x1c4] ss:$20 sps:$4 sm:$0xff]  }
 0x1ee   : > { %5937 = vmatpush3.bf16.msra.mxu0 %v6310_v33  ;;  %v6847_v33 = vld [vmem:[#allocation8 + $0x170] ss:$20 sps:$4 sm:$0xff]  }
 0x1ef   : > { %5938 = vmatprep.subr.bf16.mxu0 %v6311_v34  ;;  %1600 = vmatpush1.bf16.msra.mxu1 %v6799_v41  ;;  %v6848_v34 = vld [vmem:[#allocation8 + $0x19c] ss:$20 sps:$4 sm:$0xff]  }
 0x1f0   : > { %1601 = vmatprep.subr.bf16.mxu1 %v6800_v42  ;;  %v6853_v41 = vld [vmem:[#allocation8 + $0x1e8] ss:$20 sps:$4 sm:$0xff]  }
 0x1f1   : > { %v6854_v42 = vld [vmem:[#allocation8 + $0x214] ss:$20 sps:$4 sm:$0xff]  }
 0x1f2   : > { %5939 = vmatpush3.bf16.msra.mxu0 %v6312_v38  ;;  %v6851_v38 = vld [vmem:[#allocation8 + $0x1c0] ss:$20 sps:$4 sm:$0xff]  }
 0x1f3   : > { %5940 = vmatprep.subr.bf16.mxu0 %v6313_v39  ;;  %1602 = vmatpush1.bf16.msra.mxu1 %v6801_v45  ;;  %v6852_v39 = vld [vmem:[#allocation8 + $0x1ec] ss:$20 sps:$4 sm:$0xff]  }
 0x1f4   : > { %1603 = vmatprep.subr.bf16.mxu1 %v6802_v46  ;;  %v6857_v45 = vld [vmem:[#allocation8 + $0x238] ss:$20 sps:$4 sm:$0xff]  }
 0x1f5   : > { %v6858_v46 = vld [vmem:[#allocation8 + $0x264] ss:$20 sps:$4 sm:$0xff]  }
 0x1f6   : > { %5941 = vmatpush3.bf16.msra.mxu0 %v6314_v43  ;;  %v6855_v43 = vld [vmem:[#allocation8 + $0x210] ss:$20 sps:$4 sm:$0xff]  }
 0x1f7   : > { %5942 = vmatprep.subr.bf16.mxu0 %v6315_v44  ;;  %1604 = vmatpush1.bf16.msra.mxu1 %v6803_v49  ;;  %v6856_v44 = vld [vmem:[#allocation8 + $0x23c] ss:$20 sps:$4 sm:$0xff]   ;;  %v7613_v49 = vld [vmem:[#allocation8 + $0x4] ss:$20 sps:$4 sm:$0xff]  }
 0x1f8   : > { %1605 = vmatprep.subr.bf16.mxu1 %v6804_v50 }
 0x1fa   : > { %5943 = vmatpush3.bf16.msra.mxu0 %v6316_v47  ;;  %v6859_v47 = vld [vmem:[#allocation8 + $0x260] ss:$20 sps:$4 sm:$0xff]  }
 0x1fb   : > { %5944 = vmatprep.subr.bf16.mxu0 %v6317_v48  ;;  %1606 = vmatpush1.bf16.msra.mxu1 %v6805_v52  ;;  %v6323_v48 = vld [vmem:[#allocation8 + $0x150] ss:$20 sps:$4 sm:$0xff]  }
 0x1fc   : > { %1607 = vmatprep.subr.bf16.mxu1 %v6806_v53 }
 0x1fe   : > { %5945 = vmatpush3.bf16.msra.mxu0 %v6318_v51 }
 0x1ff   : > { %1608 = vmatpush1.bf16.msra.mxu1 %v6807_v54  ;;  %5946 = vmatprep.subr.bf16.mxu0 %v6319_v9  ;;  %v6324_v9 = vld [vmem:[#allocation8 + $0x10] ss:$20 sps:$4 sm:$0xff]  }
 0x200   : > { %1609 = vmatprep.subr.bf16.mxu1 %v6808_v55 }
 0x202   : > { %5947 = vmatpush3.bf16.msra.mxu0 %v6320_v10  ;;  %v6325_v10 = vld [vmem:[#allocation8 + $0x178] ss:$20 sps:$4 sm:$0xff]  }
 0x203   : > { %1610 = vmatpush1.bf16.msra.mxu1 %v6809_v56  ;;  %5948 = vmatprep.subr.bf16.mxu0 %v6321_v11  ;;  %v7624_v11 = vld [vmem:[#allocation8] ss:$20 sps:$4 sm:$0xff]  }
 0x204   : > { %1611 = vmatprep.subr.bf16.mxu1 %v6810_v57 }
 0x206   : > { %5949 = vmatpush3.bf16.msra.mxu0 %v6322_v12  ;;  %v7626_v12 = vld [vmem:[#allocation8 + $0x2c] ss:$20 sps:$4 sm:$0xff]  }
 0x207   : > { %1612 = vmatpush1.bf16.msra.mxu1 %v6811_v58  ;;  %1638 = vmatprep.subr.bf16.mxu0 %v6828_v13  ;;  %v6327_v13 = vld [vmem:[#allocation8 + $0x1a0] ss:$20 sps:$4 sm:$0xff]  }
 0x208   : > { %1613 = vmatprep.subr.bf16.mxu1 %v6812_v59 }
 0x209   : > { %1055 = vmatmul.mubr.bf16.vlgmr.msra.gmra.mrb[8].mxu0 %v7606_v29  ;;  %v6843_v29 = vld [vmem:[#allocation8 + $0x120] ss:$20 sps:$4 sm:$0xff]  }
 0x20a   : > { %1639 = vmatpush1.bf16.msra.mxu0 %v6829_v14  ;;  %v7631_v14 = vld [vmem:[#allocation8 + $0x28] ss:$20 sps:$4 sm:$0xff]  }
 0x20b   : > { %1614 = vmatpush1.bf16.msra.mxu1 %v6813_v60  ;;  %1640 = vmatprep.subr.bf16.mxu0 %v6830_v15  ;;  %v7634_v15 = vld [vmem:[#allocation8 + $0x54] ss:$20 sps:$4 sm:$0xff]  }
 0x20c   : > { %1615 = vmatprep.subr.bf16.mxu1 %v6814_v61 }
 0x20e   : > { %1641 = vmatpush1.bf16.msra.mxu0 %v6831_v16  ;;  %v6328_v16 = vld [vmem:[#allocation8 + $0x60] ss:$20 sps:$4 sm:$0xff]  }
 0x20f   : > { %1616 = vmatpush1.bf16.msra.mxu1 %v6815_v62  ;;  %1642 = vmatprep.subr.bf16.mxu0 %v6832_v17  ;;  %v6332_v17 = vld [vmem:[#allocation8 + $0x1c8] ss:$20 sps:$4 sm:$0xff]  }
 0x210   : > { %1617 = vmatprep.subr.bf16.mxu1 %v6816_v63 }
 0x212   : > { %1643 = vmatpush1.bf16.msra.mxu0 %v6833_v18  ;;  %v7637_v18 = vld [vmem:[#allocation8 + $0x50] ss:$20 sps:$4 sm:$0xff]  }
 0x213   : > { %1618 = vmatpush1.bf16.msra.mxu1 %v6817_v0  ;;  %1644 = vmatprep.subr.bf16.mxu0 %v6834_v19  ;;  %v7640_v19 = vld [vmem:[#allocation8 + $0x7c] ss:$20 sps:$4 sm:$0xff]  }
 0x214   : > { %1619 = vmatprep.subr.bf16.mxu1 %v6818_v37 }
 0x216   : > { %1645 = vmatpush1.bf16.msra.mxu0 %v6835_v20  ;;  %v6333_v20 = vld [vmem:[#allocation8 + $0x88] ss:$20 sps:$4 sm:$0xff]  }
 0x217   : > { %1620 = vmatpush1.bf16.msra.mxu1 %v6819_v40  ;;  %1646 = vmatprep.subr.bf16.mxu0 %v6836_v21  ;;  %v6337_v21 = vld [vmem:[#allocation8 + $0x1f0] ss:$20 sps:$4 sm:$0xff]  }
 0x218   : > { %1621 = vmatprep.subr.bf16.mxu1 %v6820_v1 }
 0x21a   : > { %1647 = vmatpush1.bf16.msra.mxu0 %v6837_v22  ;;  %v7643_v22 = vld [vmem:[#allocation8 + $0x78] ss:$20 sps:$4 sm:$0xff]  }
 0x21b   : > { %1622 = vmatpush1.bf16.msra.mxu1 %v6821_v2  ;;  %1648 = vmatprep.subr.bf16.mxu0 %v6838_v23  ;;  %v6338_v23 = vld [vmem:[#allocation8 + $0xb0] ss:$20 sps:$4 sm:$0xff]  }
 0x21c   : > { %1623 = vmatprep.subr.bf16.mxu1 %v6822_v3 }
 0x21e   : > { %1649 = vmatpush1.bf16.msra.mxu0 %v6839_v24  ;;  %v6342_v24 = vld [vmem:[#allocation8 + $0x218] ss:$20 sps:$4 sm:$0xff]  }
 0x21f   : > { %1624 = vmatpush1.bf16.msra.mxu1 %v6823_v4  ;;  %1650 = vmatprep.subr.bf16.mxu0 %v6840_v25  ;;  %v6343_v25 = vld [vmem:[#allocation8 + $0xd8] ss:$20 sps:$4 sm:$0xff]  }
 0x220   : > { %1625 = vmatprep.subr.bf16.mxu1 %v6824_v5  ;;  %v5409_v5 = vld [vmem:[%s7328_s26 + $0x10] sm:$0xff] }
 0x222   : > { %1651 = vmatpush1.bf16.msra.mxu0 %v6841_v26 }
 0x223   : > { %1626 = vmatpush1.bf16.msra.mxu1 %v6825_v6  ;;  %1652 = vmatprep.subr.bf16.mxu0 %v6842_v27 }
 0x224   : > { %1627 = vmatprep.subr.bf16.mxu1 %v6826_v7  ;;  %v7620_v7 = vpack.c.bf16 %v5409_v5, %v5409_v5  ;;  %v7741_v5 = vld [vmem:[#allocation8 + $0x124] ss:$20 sps:$4 sm:$0xff]  }
 0x226   : > { %1653 = vmatpush1.bf16.msra.mxu0 %v6843_v29 }
 0x227   : > { %1628 = vmatpush1.bf16.msra.mxu1 %v6827_v8  ;;  %1654 = vmatprep.subr.bf16.mxu0 %v6844_v30 }
 0x228   : > { %5956 = vmatprep.subr.bf16.mxu1 %v6323_v48  ;;  %v7678_v48 = vld [vmem:[#allocation8 + $0x11c] ss:$20 sps:$4 sm:$0xff]  }
 0x22a   : > { %1655 = vmatpush1.bf16.msra.mxu0 %v6845_v31 }
 0x22b   : > { %1656 = vmatprep.subr.bf16.mxu0 %v6846_v32  ;;  %v6347_v32 = vld [vmem:[#allocation8 + $0x240] ss:$20 sps:$4 sm:$0xff]  }
 0x22e   : > { %1657 = vmatpush1.bf16.msra.mxu0 %v6847_v33  ;;  %v6348_v33 = vld [vmem:[#allocation8 + $0x100] ss:$20 sps:$4 sm:$0xff]  }
 0x22f   : > { %1658 = vmatprep.subr.bf16.mxu0 %v6848_v34  ;;  %v7648_v34 = vld [vmem:[#allocation8 + $0xa4] ss:$20 sps:$4 sm:$0xff]  }
 0x232   : > { %1659 = vmatpush1.bf16.msra.mxu0 %v6849_v35  ;;  %v7650_v35 = vld [vmem:[#allocation8 + $0xa0] ss:$20 sps:$4 sm:$0xff]  }
 0x233   : > { %1660 = vmatprep.subr.bf16.mxu0 %v6850_v36  ;;  %v6352_v36 = vld [vmem:[#allocation8 + $0x268] ss:$20 sps:$4 sm:$0xff]  }
 0x236   : > { %1661 = vmatpush1.bf16.msra.mxu0 %v6851_v38  ;;  %v6353_v38 = vld [vmem:[#allocation8 + $0x128] ss:$20 sps:$4 sm:$0xff]  }
 0x237   : > { %1662 = vmatprep.subr.bf16.mxu0 %v6852_v39  ;;  %v7654_v39 = vld [vmem:[#allocation8 + $0xcc] ss:$20 sps:$4 sm:$0xff]  }
 0x23a   : > { %1663 = vmatpush1.bf16.msra.mxu0 %v6853_v41  ;;  %v7656_v41 = vld [vmem:[#allocation8 + $0xc8] ss:$20 sps:$4 sm:$0xff]  }
 0x23b   : > { %1664 = vmatprep.subr.bf16.mxu0 %v6854_v42  ;;  %v7659_v42 = vld [vmem:[#allocation8 + $0xc] ss:$20 sps:$4 sm:$0xff]  }
 0x23e   : > { %1665 = vmatpush1.bf16.msra.mxu0 %v6855_v43  ;;  %v7662_v43 = vld [vmem:[#allocation8 + $0x8] ss:$20 sps:$4 sm:$0xff]  }
 0x23f   : > { %1666 = vmatprep.subr.bf16.mxu0 %v6856_v44  ;;  %v7666_v44 = vld [vmem:[#allocation8 + $0xf4] ss:$20 sps:$4 sm:$0xff]  }
 0x242   : > { %1667 = vmatpush1.bf16.msra.mxu0 %v6857_v45  ;;  %v7669_v45 = vld [vmem:[#allocation8 + $0xf0] ss:$20 sps:$4 sm:$0xff]  }
 0x243   : > { %1668 = vmatprep.subr.bf16.mxu0 %v6858_v46  ;;  %v7672_v46 = vld [vmem:[#allocation8 + $0x34] ss:$20 sps:$4 sm:$0xff]  }
 0x246   : > { %1669 = vmatpush1.bf16.msra.mxu0 %v6859_v47  ;;  %v7675_v47 = vld [vmem:[#allocation8 + $0x30] ss:$20 sps:$4 sm:$0xff]  }
 0x247   : > { %2255 = vmatprep.subr.bf16.mxu0 %v7613_v49 }
 0x2bc   : > { %v974_v50 = vpop.f32.mrb[4].mxu0  ;;  %v1015_v51 = vpop.f32.mrb[4].mxu1 }
 0x2bd   : > { %v5407_v52 = vmul.f32 -1.442695, %v974_v50  ;;  %v976_v53 = vpop.f32.mrb[5].mxu0  ;;  %v1017_v54 = vpop.f32.mrb[5].mxu1  ;;  %v7681_v50 = vld [vmem:[#allocation8 + $0x118] ss:$20 sps:$4 sm:$0xff]  }
 0x2be   : > { %v978_v55 = vpop.f32.mrb[6].mxu0  ;;  %v1019_v56 = vpop.f32.mrb[6].mxu1  ;;  %v5408_v59 = vmul.f32 -1.442695, %v976_v53  ;;  %v7690_v53 = vld [vmem:[#allocation8 + $0x140] ss:$20 sps:$4 sm:$0xff]  }
 0x2bf   : > { %6725 = vpow2.f32 %v5407_v52  ;;  %v979_v57 = vpop.f32.mrb[7].mxu0  ;;  %v1020_v58 = vpop.f32.mrb[7].mxu1  ;;  %v7687_v52 = vld [vmem:[#allocation8 + $0x58] ss:$20 sps:$4 sm:$0xff]   ;;  %v7695_v55 = vld [vmem:[#allocation8 + $0x80] ss:$20 sps:$4 sm:$0xff]  }
 0x2c0   : > { %6727 = vpow2.f32 %v5408_v59  ;;  %v7697_v56 = vld [vmem:[#allocation8 + $0x84] ss:$20 sps:$4 sm:$0xff]   ;;  %v7702_v57 = vld [vmem:[#allocation8 + $0x16c] ss:$20 sps:$4 sm:$0xff]   ;;  %v7705_v58 = vld [vmem:[#allocation8 + $0x168] ss:$20 sps:$4 sm:$0xff]  }
 0x2c1   : > { %v7708_v59 = vld [vmem:[#allocation8 + $0xac] ss:$20 sps:$4 sm:$0xff]  }
 0x2c9   : > { %v6726_v60 = vpop.eup %6725 }
 0x2ca   : > { %v1065_v61 = vadd.f32 1.0, %v6726_v60  ;;  %v6728_v62 = vpop.eup %6727  ;;  %v7711_v60 = vld [vmem:[#allocation8 + $0xa8] ss:$20 sps:$4 sm:$0xff]  }
 0x2cb   : > { %v1071_v37 = vadd.f32 1.0, %v6728_v62  ;;  %v7717_v62 = vld [vmem:[#allocation8 + $0x190] ss:$20 sps:$4 sm:$0xff]  }
 0x2cc   : > { %6729 = vrcp.f32 %v1065_v61  ;;  %v7714_v61 = vld [vmem:[#allocation8 + $0x194] ss:$20 sps:$4 sm:$0xff]  }
 0x2d6   : > { %v6730_v63 = vpop.eup %6729 }
 0x2d7   : > { %v1074_v0 = vmul.f32 %v6730_v63, %v1017_v54  ;;  %v7692_v54 = vld [vmem:[#allocation8 + $0x144] ss:$20 sps:$4 sm:$0xff]   ;;  %v7720_v63 = vld [vmem:[#allocation8 + $0xd4] ss:$20 sps:$4 sm:$0xff]  }
 0x2d9   : > { %v1075_v40 = vadd.f32 %v1074_v0, %v1015_v51  ;;  %v7684_v51 = vld [vmem:[#allocation8 + $0x5c] ss:$20 sps:$4 sm:$0xff]  }
 0x2da   : > { %v7723_v0 = vld [vmem:[#allocation8 + $0xd0] ss:$20 sps:$4 sm:$0xff]  }
 0x2db   : > { %6731 = vtanh.f32 %v1075_v40  ;;  %v7729_v40 = vld [vmem:[#allocation8 + $0x1b8] ss:$20 sps:$4 sm:$0xff]  }
 0x2dc   : > { %6733 = vrcp.f32 %v1071_v37  ;;  %v5950_v26 = vpop.f32.mrb[8].mxu0  ;;  %v7726_v37 = vld [vmem:[#allocation8 + $0x1bc] ss:$20 sps:$4 sm:$0xff]  }
 0x2dd   : > { %v5951_v27 = vpop.f32.mrb[9].mxu0 }
 0x2de   : > { %v5952_v29 = vadd.f32 %v5951_v27, %v5950_v26  ;;  %v5953_v30 = vpop.f32.mrb[10].mxu0  ;;  %v7787_v26 = vld [vmem:[#allocation8 + $0x1c4] ss:$20 sps:$4 sm:$0xff]   ;;  %v7789_v27 = vld [vmem:[#allocation8 + $0x1c0] ss:$20 sps:$4 sm:$0xff]  }
 0x2df   : > { %v5954_v31 = vpop.f32.mrb[11].mxu0  ;;  %8374 = vst [vmem:[#allocation29_spill] sm:$0xff] %v7787_v26  ;;  %8375 = vst [vmem:[#allocation30_spill] sm:$0xff] %v7789_v27  ;;  %v7795_v30 = vld [vmem:[#allocation8 + $0x1e8] ss:$20 sps:$4 sm:$0xff]  }
 0x2e0   : > { %1080 = vst [vmem:[%s7342_s0] sm:$0xff] %v5952_v29  ;;  %v7791_v29 = vld [vmem:[#allocation8 + $0x1ec] ss:$20 sps:$4 sm:$0xff]   ;;  %8377 = vst [vmem:[#allocation32_spill] sm:$0xff] %v7795_v30  ;;  %v7798_v31 = vld [vmem:[#allocation8 + $0x214] ss:$20 sps:$4 sm:$0xff]  }
 0x2e1   : > { %8376 = vst [vmem:[#allocation31_spill] sm:$0xff] %v7791_v29  ;;  %8378 = vst [vmem:[#allocation33_spill] sm:$0xff] %v7798_v31 }
 0x2e5   : > { %v6732_v1 = vpop.eup %6731 }
 0x2e6   : > { %v1077_v2 = vsub.f32 %v7604_v28, %v6732_v1  ;;  %v6734_v3 = vpop.eup %6733  ;;  %v6326_v28 = vld [vmem:[#allocation8 + $0x38] ss:$20 sps:$4 sm:$0xff]  }
 0x2e8   : > { %v1078_v4 = vmul.f32 %v6734_v3, %v1077_v2  ;;  %v7734_v2 = vld [vmem:[#allocation8 + $0xfc] ss:$20 sps:$4 sm:$0xff]   ;;  %v7737_v3 = vld [vmem:[#allocation8 + $0x1e0] ss:$20 sps:$4 sm:$0xff]  }
 0x2ea   : > { %v7618_v6 = vadd.f32 %v6732_v1, %v1078_v4  ;;  %v7732_v1 = vld [vmem:[#allocation8 + $0xf8] ss:$20 sps:$4 sm:$0xff]  }
 0x2eb   : > { %v7739_v4 = vld [vmem:[#allocation8 + $0x1e4] ss:$20 sps:$4 sm:$0xff]  }
 0x2ec   : > { %v1084_v8 = vpack.c.bf16 %v7618_v6, %v7618_v6 }
 0x2ee   : > { %1629 = vmatprep.mubr.bf16.mxu1 %v1084_v8  ;;  %1670 = vmatprep.mubr.bf16.mxu0 %v1084_v8 }
 0x2ef   : > { %1630 = vmatmul.mubr.bf16.vlgmr.msra.gmra.mrb[8].mxu1 %v7620_v7  ;;  %1671 = vmatmul.mubr.bf16.vlgmr.msra.gmra.mrb[12].mxu0 %v7620_v7 }
 0x2f0   : > { %1711 = vmatprep.mubr.bf16.mxu1 %v1084_v8  ;;  %5957 = vmatpush3.bf16.msra.mxu1 %v6324_v9  ;;  %v7748_v8 = vld [vmem:[#allocation8 + $0x120] ss:$20 sps:$4 sm:$0xff]  }
 0x2f1   : > { %5958 = vmatprep.subr.bf16.mxu1 %v6325_v10  ;;  %2256 = vmatpush1.bf16.msra.mxu0 %v7624_v11  ;;  %8367 = vst [vmem:[#allocation22_spill] sm:$0xff] %v7748_v8  ;;  %v7751_v9 = vld [vmem:[#allocation8 + $0x14c] ss:$20 sps:$4 sm:$0xff]   ;;  %v7754_v10 = vld [vmem:[#allocation8 + $0x208] ss:$20 sps:$4 sm:$0xff]  }
 0x2f2   : > { %2257 = vmatprep.subr.bf16.mxu0 %v7626_v12  ;;  %8368 = vst [vmem:[#allocation23_spill] sm:$0xff] %v7751_v9 }
 0x2f4   : > { %5959 = vmatpush3.bf16.msra.mxu1 %v6326_v28  ;;  %v7757_v28 = vld [vmem:[#allocation8 + $0x234] ss:$20 sps:$4 sm:$0xff]  }
 0x2f5   : > { %5960 = vmatprep.subr.bf16.mxu1 %v6327_v13  ;;  %2258 = vmatpush1.bf16.msra.mxu0 %v7631_v14  ;;  %v7760_v13 = vld [vmem:[#allocation8 + $0x148] ss:$20 sps:$4 sm:$0xff]  }
 0x2f6   : > { %2259 = vmatprep.subr.bf16.mxu0 %v7634_v15  ;;  %8369 = vst [vmem:[#allocation24_spill] sm:$0xff] %v7760_v13 }
 0x2f8   : > { %5961 = vmatpush3.bf16.msra.mxu1 %v6328_v16  ;;  %v7763_v16 = vld [vmem:[#allocation8 + $0x174] ss:$20 sps:$4 sm:$0xff]  }
 0x2f9   : > { %5962 = vmatprep.subr.bf16.mxu1 %v6332_v17  ;;  %2260 = vmatpush1.bf16.msra.mxu0 %v7637_v18  ;;  %8370 = vst [vmem:[#allocation25_spill] sm:$0xff] %v7763_v16  ;;  %v7766_v17 = vld [vmem:[#allocation8 + $0x230] ss:$20 sps:$4 sm:$0xff]  }
 0x2fa   : > { %2261 = vmatprep.subr.bf16.mxu0 %v7640_v19 }
 0x2fc   : > { %5963 = vmatpush3.bf16.msra.mxu1 %v6333_v20  ;;  %v7769_v20 = vld [vmem:[#allocation8 + $0x25c] ss:$20 sps:$4 sm:$0xff]  }
 0x2fd   : > { %5964 = vmatprep.subr.bf16.mxu1 %v6337_v21  ;;  %2262 = vmatpush1.bf16.msra.mxu0 %v7643_v22  ;;  %v7772_v21 = vld [vmem:[#allocation8 + $0x170] ss:$20 sps:$4 sm:$0xff]  }
 0x2fe   : > { %2263 = vmatprep.subr.bf16.mxu0 %v7648_v34  ;;  %8371 = vst [vmem:[#allocation26_spill] sm:$0xff] %v7772_v21 }
 0x300   : > { %5965 = vmatpush3.bf16.msra.mxu1 %v6338_v23  ;;  %v7775_v23 = vld [vmem:[#allocation8 + $0x19c] ss:$20 sps:$4 sm:$0xff]  }
 0x301   : > { %5966 = vmatprep.subr.bf16.mxu1 %v6342_v24  ;;  %2264 = vmatpush1.bf16.msra.mxu0 %v7650_v35  ;;  %8372 = vst [vmem:[#allocation27_spill] sm:$0xff] %v7775_v23  ;;  %v7778_v24 = vld [vmem:[#allocation8 + $0x258] ss:$20 sps:$4 sm:$0xff]  }
 0x302   : > { %2265 = vmatprep.subr.bf16.mxu0 %v7654_v39 }
 0x304   : > { %5967 = vmatpush3.bf16.msra.mxu1 %v6343_v25  ;;  %v7782_v25 = vld [vmem:[#allocation8 + $0x198] ss:$20 sps:$4 sm:$0xff]  }
 0x305   : > { %5968 = vmatprep.subr.bf16.mxu1 %v6347_v32  ;;  %2266 = vmatpush1.bf16.msra.mxu0 %v7656_v41  ;;  %8373 = vst [vmem:[#allocation28_spill] sm:$0xff] %v7782_v25  ;;  %v7801_v32 = vld [vmem:[#allocation8 + $0x210] ss:$20 sps:$4 sm:$0xff]  }
 0x306   : > { %2267 = vmatprep.subr.bf16.mxu0 %v7666_v44  ;;  %8379 = vst [vmem:[#allocation34_spill] sm:$0xff] %v7801_v32 }
 0x308   : > { %5969 = vmatpush3.bf16.msra.mxu1 %v6348_v33  ;;  %v7804_v33 = vld [vmem:[#allocation8 + $0x23c] ss:$20 sps:$4 sm:$0xff]  }
 0x309   : > { %5970 = vmatprep.subr.bf16.mxu1 %v6352_v36  ;;  %2268 = vmatpush1.bf16.msra.mxu0 %v7669_v45  ;;  %8380 = vst [vmem:[#allocation35_spill] sm:$0xff] %v7804_v33  ;;  %v7807_v36 = vld [vmem:[#allocation8 + $0x238] ss:$20 sps:$4 sm:$0xff]  }
 0x30a   : > { %2269 = vmatprep.subr.bf16.mxu0 %v7678_v48  ;;  %8381 = vst [vmem:[#allocation36_spill] sm:$0xff] %v7807_v36 }
 0x30c   : > { %5971 = vmatpush3.bf16.msra.mxu1 %v6353_v38  ;;  %v7810_v38 = vld [vmem:[#allocation8 + $0x264] ss:$20 sps:$4 sm:$0xff]  }
 0x30d   : > { %2296 = vmatprep.subr.bf16.mxu1 %v7659_v42  ;;  %2270 = vmatpush1.bf16.msra.mxu0 %v7681_v50  ;;  %8382 = vst [vmem:[#allocation37_spill] sm:$0xff] %v7810_v38 }
 0x30e   : > { %2271 = vmatprep.subr.bf16.mxu0 %v7692_v54 }
 0x30f   : > { %1712 = vmatmul.mubr.bf16.vlgmr.msra.gmra.mrb[12].mxu1 %v7620_v7  ;;  %v7744_v7 = vld [vmem:[#allocation8 + $0x20c] ss:$20 sps:$4 sm:$0xff]  }
 0x310   : > { %2297 = vmatpush1.bf16.msra.mxu1 %v7662_v43 }
 0x311   : > { %2298 = vmatprep.subr.bf16.mxu1 %v7672_v46  ;;  %2272 = vmatpush1.bf16.msra.mxu0 %v7690_v53 }
 0x312   : > { %2273 = vmatprep.subr.bf16.mxu0 %v7702_v57 }
 0x314   : > { %2299 = vmatpush1.bf16.msra.mxu1 %v7675_v47 }
 0x315   : > { %2300 = vmatprep.subr.bf16.mxu1 %v7684_v51  ;;  %2274 = vmatpush1.bf16.msra.mxu0 %v7705_v58 }
 0x316   : > { %2275 = vmatprep.subr.bf16.mxu0 %v7714_v61 }
 0x318   : > { %2301 = vmatpush1.bf16.msra.mxu1 %v7687_v52 }
 0x319   : > { %2302 = vmatprep.subr.bf16.mxu1 %v7697_v56  ;;  %2276 = vmatpush1.bf16.msra.mxu0 %v7717_v62 }
 0x31a   : > { %2277 = vmatprep.subr.bf16.mxu0 %v7726_v37 }
 0x31c   : > { %2303 = vmatpush1.bf16.msra.mxu1 %v7695_v55 }
 0x31d   : > { %2304 = vmatprep.subr.bf16.mxu1 %v7708_v59  ;;  %2278 = vmatpush1.bf16.msra.mxu0 %v7729_v40 }
 0x31e   : > { %2279 = vmatprep.subr.bf16.mxu0 %v7739_v4 }
 0x320   : > { %2305 = vmatpush1.bf16.msra.mxu1 %v7711_v60 }
 0x321   : > { %2306 = vmatprep.subr.bf16.mxu1 %v7720_v63  ;;  %2280 = vmatpush1.bf16.msra.mxu0 %v7737_v3 }
 0x322   : > { %2281 = vmatprep.subr.bf16.mxu0 %v7744_v7 }
 0x324   : > { %2307 = vmatpush1.bf16.msra.mxu1 %v7723_v0 }
 0x325   : > { %2308 = vmatprep.subr.bf16.mxu1 %v7734_v2  ;;  %2282 = vmatpush1.bf16.msra.mxu0 %v7754_v10 }
 0x326   : > { %2283 = vmatprep.subr.bf16.mxu0 %v7757_v28 }
 0x328   : > { %2309 = vmatpush1.bf16.msra.mxu1 %v7732_v1 }
 0x329   : > { %2310 = vmatprep.subr.bf16.mxu1 %v7741_v5  ;;  %2284 = vmatpush1.bf16.msra.mxu0 %v7766_v17 }
 0x32a   : > { %2285 = vmatprep.subr.bf16.mxu0 %v7769_v20 }
 0x32c   : > { %2311 = vmatpush1.bf16.msra.mxu1 %v7748_v8 }
 0x32d   : > { %2312 = vmatprep.subr.bf16.mxu1 %v7751_v9  ;;  %2286 = vmatpush1.bf16.msra.mxu0 %v7778_v24 }
 0x330   : > { %2313 = vmatpush1.bf16.msra.mxu1 %v7760_v13 }
 0x331   : > { %2314 = vmatprep.subr.bf16.mxu1 %v7763_v16 }
 0x334   : > { %2315 = vmatpush1.bf16.msra.mxu1 %v7772_v21 }
 0x335   : > { %2316 = vmatprep.subr.bf16.mxu1 %v7775_v23 }
 0x338   : > { %2317 = vmatpush1.bf16.msra.mxu1 %v7782_v25 }
 0x339   : > { %2318 = vmatprep.subr.bf16.mxu1 %v7787_v26 }
 0x33c   : > { %2319 = vmatpush1.bf16.msra.mxu1 %v7789_v27 }
 0x33d   : > { %2320 = vmatprep.subr.bf16.mxu1 %v7791_v29  ;;  %v7813_v29 = vld [vmem:[#allocation8 + $0x260] ss:$20 sps:$4 sm:$0xff]  }
 0x33e   : > { %8383 = vst [vmem:[#allocation38_spill] sm:$0xff] %v7813_v29 }
 0x340   : > { %2321 = vmatpush1.bf16.msra.mxu1 %v7795_v30 }
 0x341   : > { %2322 = vmatprep.subr.bf16.mxu1 %v7798_v31  ;;  %v6435_v31 = vld [vmem:[#allocation8 + $0x150] ss:$20 sps:$4 sm:$0xff]  }
 0x342   : > { %5978 = vmatprep.subr.bf16.mxu0 %v6435_v31 }
 0x344   : > { %2323 = vmatpush1.bf16.msra.mxu1 %v7801_v32 }
 0x345   : > { %2324 = vmatprep.subr.bf16.mxu1 %v7804_v33 }
 0x348   : > { %2325 = vmatpush1.bf16.msra.mxu1 %v7807_v36 }
 0x349   : > { %2326 = vmatprep.subr.bf16.mxu1 %v7810_v38 }
 0x34c   : > { %2327 = vmatpush1.bf16.msra.mxu1 %v7813_v29 }
 0x34d   : > { %2913 = vmatprep.subr.bf16.mxu1 %v7613_v49 }
 0x3c2   : > { %v1631_v30 = vpop.f32.mrb[8].mxu1  ;;  %v1672_v32 = vpop.f32.mrb[12].mxu0 }
 0x3c3   : > { %v5490_v27 = vmul.f32 -1.442695, %v1631_v30  ;;  %v1633_v26 = vpop.f32.mrb[9].mxu1  ;;  %v1674_v25 = vpop.f32.mrb[13].mxu0 }
 0x3c4   : > { %v1635_v33 = vpop.f32.mrb[10].mxu1  ;;  %v1676_v23 = vpop.f32.mrb[14].mxu0  ;;  %v5491_v16 = vmul.f32 -1.442695, %v1633_v26 }
 0x3c5   : > { %6735 = vpow2.f32 %v5490_v27  ;;  %v1636_v21 = vpop.f32.mrb[11].mxu1  ;;  %v1677_v36 = vpop.f32.mrb[15].mxu0 }
 0x3c6   : > { %6737 = vpow2.f32 %v5491_v16  ;;  %v5493_v21 = vld [vmem:[%s7328_s26 + $0x18] sm:$0xff]  ;;  %v6436_v16 = vld [vmem:[#allocation8 + $0x10] ss:$20 sps:$4 sm:$0xff]  }
 0x3c7   : > { %v7822_v26 = vpack.c.bf16 %v5493_v21, %v5493_v21  ;;  %v5577_v21 = vld [vmem:[%s7328_s26 + $0x20] sm:$0xff] }
 0x3cf   : > { %v6736_v13 = vpop.eup %6735 }
 0x3d0   : > { %v1722_v38 = vadd.f32 1.0, %v6736_v13  ;;  %v6738_v29 = vpop.eup %6737 }
 0x3d1   : > { %v1728_v31 = vadd.f32 1.0, %v6738_v29  ;;  %v6442_v29 = vld [vmem:[#allocation8 + $0x88] ss:$20 sps:$4 sm:$0xff]  }
 0x3d2   : > { %6739 = vrcp.f32 %v1722_v38  ;;  %v6437_v38 = vld [vmem:[#allocation8 + $0x178] ss:$20 sps:$4 sm:$0xff]  }
 0x3dc   : > { %v6740_v49 = vpop.eup %6739 }
 0x3dd   : > { %v1731_v9 = vmul.f32 %v6740_v49, %v1674_v25  ;;  %v6441_v25 = vld [vmem:[#allocation8 + $0x1c8] ss:$20 sps:$4 sm:$0xff]  }
 0x3df   : > { %v1732_v8 = vadd.f32 %v1731_v9, %v1672_v32  ;;  %v6440_v9 = vld [vmem:[#allocation8 + $0x60] ss:$20 sps:$4 sm:$0xff]   ;;  %v6443_v32 = vld [vmem:[#allocation8 + $0x1f0] ss:$20 sps:$4 sm:$0xff]  }
 0x3e1   : > { %6741 = vtanh.f32 %v1732_v8  ;;  %v6439_v8 = vld [vmem:[#allocation8 + $0x1a0] ss:$20 sps:$4 sm:$0xff]  }
 0x3e2   : > { %6743 = vrcp.f32 %v1728_v31 }
 0x3eb   : > { %v6742_v30 = vpop.eup %6741 }
 0x3ec   : > { %v1734_v33 = vsub.f32 %v7618_v6, %v6742_v30  ;;  %v6744_v23 = vpop.eup %6743  ;;  %v6438_v6 = vld [vmem:[#allocation8 + $0x38] ss:$20 sps:$4 sm:$0xff]  }
 0x3ee   : > { %v1735_v27 = vmul.f32 %v6744_v23, %v1734_v33 }
 0x3f0   : > { %v7820_v36 = vadd.f32 %v6742_v30, %v1735_v27 }
 0x3f2   : > { %v1742_v13 = vpack.c.bf16 %v7820_v36, %v7820_v36 }
 0x3f4   : > { %2287 = vmatprep.mubr.bf16.mxu0 %v1742_v13  ;;  %2328 = vmatprep.mubr.bf16.mxu1 %v1742_v13 }
 0x3f5   : > { %2288 = vmatmul.mubr.bf16.vlgmr.msra.gmra.mrb[16].mxu0 %v7822_v26  ;;  %2329 = vmatmul.mubr.bf16.vlgmr.msra.gmra.mrb[16].mxu1 %v7822_v26 }
 0x3f6   : > { %2369 = vmatprep.mubr.bf16.mxu0 %v1742_v13  ;;  %5979 = vmatpush3.bf16.msra.mxu0 %v6436_v16  ;;  %v7900_v13 = vpack.c.bf16 %v5577_v21, %v5577_v21  ;;  %v8021_v21 = vld [vmem:[#allocation8 + $0x124] ss:$20 sps:$4 sm:$0xff]  }
 0x3f7   : > { %5980 = vmatprep.subr.bf16.mxu0 %v6437_v38  ;;  %2914 = vmatpush1.bf16.msra.mxu1 %v7624_v11  ;;  %v6444_v11 = vld [vmem:[#allocation8 + $0xb0] ss:$20 sps:$4 sm:$0xff]  }
 0x3f8   : > { %2915 = vmatprep.subr.bf16.mxu1 %v7626_v12  ;;  %v6445_v12 = vld [vmem:[#allocation8 + $0x218] ss:$20 sps:$4 sm:$0xff]   ;;  %v6452_v38 = vld [vmem:[#allocation8 + $0x10] ss:$20 sps:$4 sm:$0xff]  }
 0x3fa   : > { %5981 = vmatpush3.bf16.msra.mxu0 %v6438_v6  ;;  %v6453_v6 = vld [vmem:[#allocation8 + $0x178] ss:$20 sps:$4 sm:$0xff]  }
 0x3fb   : > { %5982 = vmatprep.subr.bf16.mxu0 %v6439_v8  ;;  %2916 = vmatpush1.bf16.msra.mxu1 %v7631_v14  ;;  %v6446_v14 = vld [vmem:[#allocation8 + $0xd8] ss:$20 sps:$4 sm:$0xff]   ;;  %v7904_v8 = vld [vmem:[#allocation8] ss:$20 sps:$4 sm:$0xff]  }
 0x3fc   : > { %2917 = vmatprep.subr.bf16.mxu1 %v7634_v15  ;;  %v5972_v15 = vpop.f32.mrb[12].mxu1 }
 0x3fe   : > { %5983 = vmatpush3.bf16.msra.mxu0 %v6440_v9  ;;  %v7906_v9 = vld [vmem:[#allocation8 + $0x2c] ss:$20 sps:$4 sm:$0xff]  }
 0x3ff   : > { %5984 = vmatprep.subr.bf16.mxu0 %v6441_v25  ;;  %2918 = vmatpush1.bf16.msra.mxu1 %v7637_v18  ;;  %v5973_v18 = vpop.f32.mrb[13].mxu1  ;;  %v6455_v25 = vld [vmem:[#allocation8 + $0x1a0] ss:$20 sps:$4 sm:$0xff]  }
 0x400   : > { %2919 = vmatprep.subr.bf16.mxu1 %v7640_v19  ;;  %v5974_v19 = vadd.f32 %v5973_v18, %v5972_v15  ;;  %v7920_v15 = vld [vmem:[#allocation8 + $0x7c] ss:$20 sps:$4 sm:$0xff]  }
 0x401   : > { %v6461_v18 = vld [vmem:[#allocation8 + $0x88] ss:$20 sps:$4 sm:$0xff]  }
 0x402   : > { %5985 = vmatpush3.bf16.msra.mxu0 %v6442_v29  ;;  %5492 = vst [vmem:[%s7342_s0 + $0x8] sm:$0xff] %v5974_v19  ;;  %v7911_v29 = vld [vmem:[#allocation8 + $0x28] ss:$20 sps:$4 sm:$0xff]   ;;  %v6465_v19 = vld [vmem:[#allocation8 + $0x1f0] ss:$20 sps:$4 sm:$0xff]  }
 0x403   : > { %5986 = vmatprep.subr.bf16.mxu0 %v6443_v32  ;;  %2920 = vmatpush1.bf16.msra.mxu1 %v7643_v22  ;;  %v5975_v22 = vpop.f32.mrb[14].mxu1  ;;  %v7914_v32 = vld [vmem:[#allocation8 + $0x54] ss:$20 sps:$4 sm:$0xff]  }
 0x404   : > { %2921 = vmatprep.subr.bf16.mxu1 %v7648_v34  ;;  %v5976_v34 = vpop.f32.mrb[15].mxu1  ;;  %v7923_v22 = vld [vmem:[#allocation8 + $0x78] ss:$20 sps:$4 sm:$0xff]  }
 0x405   : > { %v6466_v34 = vld [vmem:[#allocation8 + $0xb0] ss:$20 sps:$4 sm:$0xff]  }
 0x406   : > { %5987 = vmatpush3.bf16.msra.mxu0 %v6444_v11  ;;  %v6456_v11 = vld [vmem:[#allocation8 + $0x60] ss:$20 sps:$4 sm:$0xff]  }
 0x407   : > { %5988 = vmatprep.subr.bf16.mxu0 %v6445_v12  ;;  %2922 = vmatpush1.bf16.msra.mxu1 %v7650_v35  ;;  %v6447_v35 = vld [vmem:[#allocation8 + $0x240] ss:$20 sps:$4 sm:$0xff]   ;;  %v6460_v12 = vld [vmem:[#allocation8 + $0x1c8] ss:$20 sps:$4 sm:$0xff]  }
 0x408   : > { %2923 = vmatprep.subr.bf16.mxu1 %v7654_v39  ;;  %v6448_v39 = vld [vmem:[#allocation8 + $0x100] ss:$20 sps:$4 sm:$0xff]  }
 0x40a   : > { %5989 = vmatpush3.bf16.msra.mxu0 %v6446_v14  ;;  %v7917_v14 = vld [vmem:[#allocation8 + $0x50] ss:$20 sps:$4 sm:$0xff]  }
 0x40b   : > { %2924 = vmatpush1.bf16.msra.mxu1 %v7656_v41  ;;  %5990 = vmatprep.subr.bf16.mxu0 %v6447_v35  ;;  %v6449_v41 = vld [vmem:[#allocation8 + $0x268] ss:$20 sps:$4 sm:$0xff]   ;;  %v6470_v35 = vld [vmem:[#allocation8 + $0x218] ss:$20 sps:$4 sm:$0xff]  }
 0x40c   : > { %2925 = vmatprep.subr.bf16.mxu1 %v7666_v44  ;;  %v6450_v44 = vld [vmem:[#allocation8 + $0x128] ss:$20 sps:$4 sm:$0xff]  }
 0x40e   : > { %5991 = vmatpush3.bf16.msra.mxu0 %v6448_v39  ;;  %v6471_v39 = vld [vmem:[#allocation8 + $0xd8] ss:$20 sps:$4 sm:$0xff]  }
 0x40f   : > { %2926 = vmatpush1.bf16.msra.mxu1 %v7669_v45  ;;  %5992 = vmatprep.subr.bf16.mxu0 %v6449_v41  ;;  %v8386_v45 = vld [vmem:[#allocation24_spill] sm:$0xff] }
 0x410   : > { %2927 = vmatprep.subr.bf16.mxu1 %v7678_v48  ;;  %v8389_v48 = vld [vmem:[#allocation27_spill] sm:$0xff] }
 0x412   : > { %5993 = vmatpush3.bf16.msra.mxu0 %v6450_v44 }
 0x413   : > { %2928 = vmatpush1.bf16.msra.mxu1 %v7681_v50  ;;  %2954 = vmatprep.subr.bf16.mxu0 %v7659_v42  ;;  %v8384_v42 = vld [vmem:[#allocation22_spill] sm:$0xff]  ;;  %v8390_v50 = vld [vmem:[#allocation28_spill] sm:$0xff] }
 0x414   : > { %2929 = vmatprep.subr.bf16.mxu1 %v7692_v54  ;;  %v8394_v54 = vld [vmem:[#allocation32_spill] sm:$0xff] }
 0x415   : > { %2370 = vmatmul.mubr.bf16.vlgmr.msra.gmra.mrb[20].mxu0 %v7822_v26 }
 0x416   : > { %2955 = vmatpush1.bf16.msra.mxu0 %v7662_v43  ;;  %v8385_v43 = vld [vmem:[#allocation23_spill] sm:$0xff] }
 0x417   : > { %2930 = vmatpush1.bf16.msra.mxu1 %v7690_v53  ;;  %2956 = vmatprep.subr.bf16.mxu0 %v7672_v46  ;;  %v8387_v46 = vld [vmem:[#allocation25_spill] sm:$0xff]  ;;  %v8393_v53 = vld [vmem:[#allocation31_spill] sm:$0xff] }
 0x418   : > { %2931 = vmatprep.subr.bf16.mxu1 %v7702_v57  ;;  %v8397_v57 = vld [vmem:[#allocation35_spill] sm:$0xff] }
 0x41a   : > { %2957 = vmatpush1.bf16.msra.mxu0 %v7675_v47  ;;  %v8388_v47 = vld [vmem:[#allocation26_spill] sm:$0xff] }
 0x41b   : > { %2932 = vmatpush1.bf16.msra.mxu1 %v7705_v58  ;;  %2958 = vmatprep.subr.bf16.mxu0 %v7684_v51  ;;  %v8391_v51 = vld [vmem:[#allocation29_spill] sm:$0xff]  ;;  %v8398_v58 = vld [vmem:[#allocation36_spill] sm:$0xff] }
 0x41c   : > { %2933 = vmatprep.subr.bf16.mxu1 %v7714_v61  ;;  %v6451_v61 = vld [vmem:[#allocation8 + $0x150] ss:$20 sps:$4 sm:$0xff]  }
 0x41e   : > { %2959 = vmatpush1.bf16.msra.mxu0 %v7687_v52  ;;  %v8392_v52 = vld [vmem:[#allocation30_spill] sm:$0xff] }
 0x41f   : > { %2934 = vmatpush1.bf16.msra.mxu1 %v7717_v62  ;;  %2960 = vmatprep.subr.bf16.mxu0 %v7697_v56  ;;  %v8396_v56 = vld [vmem:[#allocation34_spill] sm:$0xff]  ;;  %v7893_v62 = vld [vmem:[#allocation8 + $0x4] ss:$20 sps:$4 sm:$0xff]  }
 0x420   : > { %2935 = vmatprep.subr.bf16.mxu1 %v7726_v37 }
 0x422   : > { %2961 = vmatpush1.bf16.msra.mxu0 %v7695_v55  ;;  %v8395_v55 = vld [vmem:[#allocation33_spill] sm:$0xff] }
 0x423   : > { %2936 = vmatpush1.bf16.msra.mxu1 %v7729_v40  ;;  %2962 = vmatprep.subr.bf16.mxu0 %v7708_v59  ;;  %v8399_v59 = vld [vmem:[#allocation37_spill] sm:$0xff] }
 0x424   : > { %2937 = vmatprep.subr.bf16.mxu1 %v7739_v4 }
 0x426   : > { %2963 = vmatpush1.bf16.msra.mxu0 %v7711_v60  ;;  %v8400_v60 = vld [vmem:[#allocation38_spill] sm:$0xff] }
 0x427   : > { %2938 = vmatpush1.bf16.msra.mxu1 %v7737_v3  ;;  %2964 = vmatprep.subr.bf16.mxu0 %v7720_v63 }
 0x428   : > { %2939 = vmatprep.subr.bf16.mxu1 %v7744_v7 }
 0x42a   : > { %2965 = vmatpush1.bf16.msra.mxu0 %v7723_v0 }
 0x42b   : > { %2940 = vmatpush1.bf16.msra.mxu1 %v7754_v10  ;;  %2966 = vmatprep.subr.bf16.mxu0 %v7734_v2 }
 0x42c   : > { %2941 = vmatprep.subr.bf16.mxu1 %v7757_v28 }
 0x42e   : > { %2967 = vmatpush1.bf16.msra.mxu0 %v7732_v1 }
 0x42f   : > { %2942 = vmatpush1.bf16.msra.mxu1 %v7766_v17  ;;  %2968 = vmatprep.subr.bf16.mxu0 %v7741_v5 }
 0x430   : > { %2943 = vmatprep.subr.bf16.mxu1 %v7769_v20 }
 0x432   : > { %2969 = vmatpush1.bf16.msra.mxu0 %v8384_v42 }
 0x433   : > { %2944 = vmatpush1.bf16.msra.mxu1 %v7778_v24  ;;  %2970 = vmatprep.subr.bf16.mxu0 %v8385_v43 }
 0x434   : > { %6000 = vmatprep.subr.bf16.mxu1 %v6451_v61  ;;  %v7958_v61 = vld [vmem:[#allocation8 + $0x11c] ss:$20 sps:$4 sm:$0xff]  }
 0x436   : > { %2971 = vmatpush1.bf16.msra.mxu0 %v8386_v45 }
 0x437   : > { %2972 = vmatprep.subr.bf16.mxu0 %v8387_v46  ;;  %v6475_v46 = vld [vmem:[#allocation8 + $0x240] ss:$20 sps:$4 sm:$0xff]  }
 0x43a   : > { %2973 = vmatpush1.bf16.msra.mxu0 %v8388_v47  ;;  %v6476_v47 = vld [vmem:[#allocation8 + $0x100] ss:$20 sps:$4 sm:$0xff]  }
 0x43b   : > { %2974 = vmatprep.subr.bf16.mxu0 %v8389_v48  ;;  %v7928_v48 = vld [vmem:[#allocation8 + $0xa4] ss:$20 sps:$4 sm:$0xff]  }
 0x43e   : > { %2975 = vmatpush1.bf16.msra.mxu0 %v8390_v50  ;;  %v7930_v50 = vld [vmem:[#allocation8 + $0xa0] ss:$20 sps:$4 sm:$0xff]  }
 0x43f   : > { %2976 = vmatprep.subr.bf16.mxu0 %v8391_v51  ;;  %v6480_v51 = vld [vmem:[#allocation8 + $0x268] ss:$20 sps:$4 sm:$0xff]  }
 0x442   : > { %2977 = vmatpush1.bf16.msra.mxu0 %v8392_v52  ;;  %v6481_v52 = vld [vmem:[#allocation8 + $0x128] ss:$20 sps:$4 sm:$0xff]  }
 0x443   : > { %2978 = vmatprep.subr.bf16.mxu0 %v8393_v53  ;;  %v7934_v53 = vld [vmem:[#allocation8 + $0xcc] ss:$20 sps:$4 sm:$0xff]  }
 0x446   : > { %2979 = vmatpush1.bf16.msra.mxu0 %v8394_v54  ;;  %v7936_v54 = vld [vmem:[#allocation8 + $0xc8] ss:$20 sps:$4 sm:$0xff]  }
 0x447   : > { %2980 = vmatprep.subr.bf16.mxu0 %v8395_v55  ;;  %v7939_v55 = vld [vmem:[#allocation8 + $0xc] ss:$20 sps:$4 sm:$0xff]  }
 0x44a   : > { %2981 = vmatpush1.bf16.msra.mxu0 %v8396_v56  ;;  %v7942_v56 = vld [vmem:[#allocation8 + $0x8] ss:$20 sps:$4 sm:$0xff]  }
 0x44b   : > { %2982 = vmatprep.subr.bf16.mxu0 %v8397_v57  ;;  %v7946_v57 = vld [vmem:[#allocation8 + $0xf4] ss:$20 sps:$4 sm:$0xff]  }
 0x44e   : > { %2983 = vmatpush1.bf16.msra.mxu0 %v8398_v58  ;;  %v7949_v58 = vld [vmem:[#allocation8 + $0xf0] ss:$20 sps:$4 sm:$0xff]  }
 0x44f   : > { %2984 = vmatprep.subr.bf16.mxu0 %v8399_v59  ;;  %v7952_v59 = vld [vmem:[#allocation8 + $0x34] ss:$20 sps:$4 sm:$0xff]  }
 0x452   : > { %2985 = vmatpush1.bf16.msra.mxu0 %v8400_v60  ;;  %v7955_v60 = vld [vmem:[#allocation8 + $0x30] ss:$20 sps:$4 sm:$0xff]  }
 0x453   : > { %3571 = vmatprep.subr.bf16.mxu0 %v7893_v62 }
 0x4c8   : > { %v2289_v63 = vpop.f32.mrb[16].mxu0  ;;  %v2330_v0 = vpop.f32.mrb[16].mxu1 }
 0x4c9   : > { %v5574_v37 = vmul.f32 -1.442695, %v2289_v63  ;;  %v2291_v40 = vpop.f32.mrb[17].mxu0  ;;  %v2332_v1 = vpop.f32.mrb[17].mxu1  ;;  %v7961_v63 = vld [vmem:[#allocation8 + $0x118] ss:$20 sps:$4 sm:$0xff]  }
 0x4ca   : > { %v2293_v2 = vpop.f32.mrb[18].mxu0  ;;  %v2334_v3 = vpop.f32.mrb[18].mxu1  ;;  %v5575_v7 = vmul.f32 -1.442695, %v2291_v40  ;;  %v7970_v40 = vld [vmem:[#allocation8 + $0x140] ss:$20 sps:$4 sm:$0xff]  }
 0x4cb   : > { %6745 = vpow2.f32 %v5574_v37  ;;  %v2294_v4 = vpop.f32.mrb[19].mxu0  ;;  %v2335_v5 = vpop.f32.mrb[19].mxu1  ;;  %v7967_v37 = vld [vmem:[#allocation8 + $0x58] ss:$20 sps:$4 sm:$0xff]   ;;  %v7975_v2 = vld [vmem:[#allocation8 + $0x80] ss:$20 sps:$4 sm:$0xff]  }
 0x4cc   : > { %6747 = vpow2.f32 %v5575_v7  ;;  %v7977_v3 = vld [vmem:[#allocation8 + $0x84] ss:$20 sps:$4 sm:$0xff]   ;;  %v7982_v4 = vld [vmem:[#allocation8 + $0x16c] ss:$20 sps:$4 sm:$0xff]   ;;  %v7985_v5 = vld [vmem:[#allocation8 + $0x168] ss:$20 sps:$4 sm:$0xff]  }
 0x4cd   : > { %v7988_v7 = vld [vmem:[#allocation8 + $0xac] ss:$20 sps:$4 sm:$0xff]  }
 0x4d5   : > { %v6746_v10 = vpop.eup %6745 }
 0x4d6   : > { %v2380_v28 = vadd.f32 1.0, %v6746_v10  ;;  %v6748_v17 = vpop.eup %6747  ;;  %v7991_v10 = vld [vmem:[#allocation8 + $0xa8] ss:$20 sps:$4 sm:$0xff]  }
 0x4d7   : > { %v2386_v49 = vadd.f32 1.0, %v6748_v17  ;;  %v7997_v17 = vld [vmem:[#allocation8 + $0x190] ss:$20 sps:$4 sm:$0xff]  }
 0x4d8   : > { %6749 = vrcp.f32 %v2380_v28  ;;  %v7994_v28 = vld [vmem:[#allocation8 + $0x194] ss:$20 sps:$4 sm:$0xff]  }
 0x4e2   : > { %v6750_v20 = vpop.eup %6749 }
 0x4e3   : > { %v2389_v24 = vmul.f32 %v6750_v20, %v2332_v1  ;;  %v7972_v1 = vld [vmem:[#allocation8 + $0x144] ss:$20 sps:$4 sm:$0xff]   ;;  %v8000_v20 = vld [vmem:[#allocation8 + $0xd4] ss:$20 sps:$4 sm:$0xff]  }
 0x4e5   : > { %v2390_v31 = vadd.f32 %v2389_v24, %v2330_v0  ;;  %v7964_v0 = vld [vmem:[#allocation8 + $0x5c] ss:$20 sps:$4 sm:$0xff]  }
 0x4e6   : > { %v8003_v24 = vld [vmem:[#allocation8 + $0xd0] ss:$20 sps:$4 sm:$0xff]  }
 0x4e7   : > { %6751 = vtanh.f32 %v2390_v31  ;;  %v8009_v31 = vld [vmem:[#allocation8 + $0x1b8] ss:$20 sps:$4 sm:$0xff]  }
 0x4e8   : > { %6753 = vrcp.f32 %v2386_v49  ;;  %v5994_v41 = vpop.f32.mrb[20].mxu0  ;;  %v8006_v49 = vld [vmem:[#allocation8 + $0x1bc] ss:$20 sps:$4 sm:$0xff]  }
 0x4e9   : > { %v5995_v44 = vpop.f32.mrb[21].mxu0 }
 0x4ea   : > { %v5996_v42 = vadd.f32 %v5995_v44, %v5994_v41  ;;  %v5997_v43 = vpop.f32.mrb[22].mxu0  ;;  %v8067_v41 = vld [vmem:[#allocation8 + $0x1c4] ss:$20 sps:$4 sm:$0xff]   ;;  %v8069_v44 = vld [vmem:[#allocation8 + $0x1c0] ss:$20 sps:$4 sm:$0xff]  }
 0x4eb   : > { %v5998_v45 = vpop.f32.mrb[23].mxu0  ;;  %8408 = vst [vmem:[#allocation29_spill] sm:$0xff] %v8067_v41  ;;  %8409 = vst [vmem:[#allocation30_spill] sm:$0xff] %v8069_v44  ;;  %v8075_v43 = vld [vmem:[#allocation8 + $0x1e8] ss:$20 sps:$4 sm:$0xff]  }
 0x4ec   : > { %5576 = vst [vmem:[%s7342_s0 + $0x10] sm:$0xff] %v5996_v42  ;;  %v8071_v42 = vld [vmem:[#allocation8 + $0x1ec] ss:$20 sps:$4 sm:$0xff]   ;;  %8411 = vst [vmem:[#allocation32_spill] sm:$0xff] %v8075_v43  ;;  %v8078_v45 = vld [vmem:[#allocation8 + $0x214] ss:$20 sps:$4 sm:$0xff]  }
 0x4ed   : > { %8410 = vst [vmem:[#allocation31_spill] sm:$0xff] %v8071_v42  ;;  %8412 = vst [vmem:[#allocation33_spill] sm:$0xff] %v8078_v45 }
 0x4f1   : > { %v6752_v30 = vpop.eup %6751 }
 0x4f2   : > { %v2392_v33 = vsub.f32 %v7820_v36, %v6752_v30  ;;  %v6754_v23 = vpop.eup %6753  ;;  %v6454_v36 = vld [vmem:[#allocation8 + $0x38] ss:$20 sps:$4 sm:$0xff]  }
 0x4f4   : > { %v2393_v27 = vmul.f32 %v6754_v23, %v2392_v33  ;;  %v8014_v33 = vld [vmem:[#allocation8 + $0xfc] ss:$20 sps:$4 sm:$0xff]   ;;  %v8017_v23 = vld [vmem:[#allocation8 + $0x1e0] ss:$20 sps:$4 sm:$0xff]  }
 0x4f6   : > { %v7898_v26 = vadd.f32 %v6752_v30, %v2393_v27  ;;  %v8012_v30 = vld [vmem:[#allocation8 + $0xf8] ss:$20 sps:$4 sm:$0xff]  }
 0x4f7   : > { %v8019_v27 = vld [vmem:[#allocation8 + $0x1e4] ss:$20 sps:$4 sm:$0xff]  }
 0x4f8   : > { %v2400_v16 = vpack.c.bf16 %v7898_v26, %v7898_v26 }
 0x4fa   : > { %2945 = vmatprep.mubr.bf16.mxu1 %v2400_v16  ;;  %2986 = vmatprep.mubr.bf16.mxu0 %v2400_v16 }
 0x4fb   : > { %2946 = vmatmul.mubr.bf16.vlgmr.msra.gmra.mrb[20].mxu1 %v7900_v13  ;;  %2987 = vmatmul.mubr.bf16.vlgmr.msra.gmra.mrb[24].mxu0 %v7900_v13 }
 0x4fc   : > { %3027 = vmatprep.mubr.bf16.mxu1 %v2400_v16  ;;  %6001 = vmatpush3.bf16.msra.mxu1 %v6452_v38  ;;  %v8028_v16 = vld [vmem:[#allocation8 + $0x120] ss:$20 sps:$4 sm:$0xff]  }
 0x4fd   : > { %6002 = vmatprep.subr.bf16.mxu1 %v6453_v6  ;;  %3572 = vmatpush1.bf16.msra.mxu0 %v7904_v8  ;;  %8401 = vst [vmem:[#allocation22_spill] sm:$0xff] %v8028_v16  ;;  %v8031_v38 = vld [vmem:[#allocation8 + $0x14c] ss:$20 sps:$4 sm:$0xff]   ;;  %v8034_v6 = vld [vmem:[#allocation8 + $0x208] ss:$20 sps:$4 sm:$0xff]  }
 0x4fe   : > { %3573 = vmatprep.subr.bf16.mxu0 %v7906_v9  ;;  %8402 = vst [vmem:[#allocation23_spill] sm:$0xff] %v8031_v38 }
 0x500   : > { %6003 = vmatpush3.bf16.msra.mxu1 %v6454_v36  ;;  %v8037_v36 = vld [vmem:[#allocation8 + $0x234] ss:$20 sps:$4 sm:$0xff]  }
 0x501   : > { %6004 = vmatprep.subr.bf16.mxu1 %v6455_v25  ;;  %3574 = vmatpush1.bf16.msra.mxu0 %v7911_v29  ;;  %v8040_v25 = vld [vmem:[#allocation8 + $0x148] ss:$20 sps:$4 sm:$0xff]  }
 0x502   : > { %3575 = vmatprep.subr.bf16.mxu0 %v7914_v32  ;;  %8403 = vst [vmem:[#allocation24_spill] sm:$0xff] %v8040_v25 }
 0x504   : > { %6005 = vmatpush3.bf16.msra.mxu1 %v6456_v11  ;;  %v8043_v11 = vld [vmem:[#allocation8 + $0x174] ss:$20 sps:$4 sm:$0xff]  }
 0x505   : > { %6006 = vmatprep.subr.bf16.mxu1 %v6460_v12  ;;  %3576 = vmatpush1.bf16.msra.mxu0 %v7917_v14  ;;  %8404 = vst [vmem:[#allocation25_spill] sm:$0xff] %v8043_v11  ;;  %v8046_v12 = vld [vmem:[#allocation8 + $0x230] ss:$20 sps:$4 sm:$0xff]  }
 0x506   : > { %3577 = vmatprep.subr.bf16.mxu0 %v7920_v15 }
 0x508   : > { %6007 = vmatpush3.bf16.msra.mxu1 %v6461_v18  ;;  %v8049_v18 = vld [vmem:[#allocation8 + $0x25c] ss:$20 sps:$4 sm:$0xff]  }
 0x509   : > { %6008 = vmatprep.subr.bf16.mxu1 %v6465_v19  ;;  %3578 = vmatpush1.bf16.msra.mxu0 %v7923_v22  ;;  %v8052_v19 = vld [vmem:[#allocation8 + $0x170] ss:$20 sps:$4 sm:$0xff]  }
 0x50a   : > { %3579 = vmatprep.subr.bf16.mxu0 %v7928_v48  ;;  %8405 = vst [vmem:[#allocation26_spill] sm:$0xff] %v8052_v19 }
 0x50c   : > { %6009 = vmatpush3.bf16.msra.mxu1 %v6466_v34  ;;  %v8055_v34 = vld [vmem:[#allocation8 + $0x19c] ss:$20 sps:$4 sm:$0xff]  }
 0x50d   : > { %6010 = vmatprep.subr.bf16.mxu1 %v6470_v35  ;;  %3580 = vmatpush1.bf16.msra.mxu0 %v7930_v50  ;;  %8406 = vst [vmem:[#allocation27_spill] sm:$0xff] %v8055_v34  ;;  %v8058_v35 = vld [vmem:[#allocation8 + $0x258] ss:$20 sps:$4 sm:$0xff]  }
 0x50e   : > { %3581 = vmatprep.subr.bf16.mxu0 %v7934_v53 }
 0x510   : > { %6011 = vmatpush3.bf16.msra.mxu1 %v6471_v39  ;;  %v8062_v39 = vld [vmem:[#allocation8 + $0x198] ss:$20 sps:$4 sm:$0xff]  }
 0x511   : > { %6012 = vmatprep.subr.bf16.mxu1 %v6475_v46  ;;  %3582 = vmatpush1.bf16.msra.mxu0 %v7936_v54  ;;  %8407 = vst [vmem:[#allocation28_spill] sm:$0xff] %v8062_v39  ;;  %v8081_v46 = vld [vmem:[#allocation8 + $0x210] ss:$20 sps:$4 sm:$0xff]  }
 0x512   : > { %3583 = vmatprep.subr.bf16.mxu0 %v7946_v57  ;;  %8413 = vst [vmem:[#allocation34_spill] sm:$0xff] %v8081_v46 }
 0x514   : > { %6013 = vmatpush3.bf16.msra.mxu1 %v6476_v47  ;;  %v8084_v47 = vld [vmem:[#allocation8 + $0x23c] ss:$20 sps:$4 sm:$0xff]  }
 0x515   : > { %6014 = vmatprep.subr.bf16.mxu1 %v6480_v51  ;;  %3584 = vmatpush1.bf16.msra.mxu0 %v7949_v58  ;;  %8414 = vst [vmem:[#allocation35_spill] sm:$0xff] %v8084_v47  ;;  %v8087_v51 = vld [vmem:[#allocation8 + $0x238] ss:$20 sps:$4 sm:$0xff]  }
 0x516   : > { %3585 = vmatprep.subr.bf16.mxu0 %v7958_v61  ;;  %8415 = vst [vmem:[#allocation36_spill] sm:$0xff] %v8087_v51 }
 0x518   : > { %6015 = vmatpush3.bf16.msra.mxu1 %v6481_v52  ;;  %v8090_v52 = vld [vmem:[#allocation8 + $0x264] ss:$20 sps:$4 sm:$0xff]  }
 0x519   : > { %3612 = vmatprep.subr.bf16.mxu1 %v7939_v55  ;;  %3586 = vmatpush1.bf16.msra.mxu0 %v7961_v63  ;;  %8416 = vst [vmem:[#allocation37_spill] sm:$0xff] %v8090_v52 }
 0x51a   : > { %3587 = vmatprep.subr.bf16.mxu0 %v7972_v1 }
 0x51b   : > { %3028 = vmatmul.mubr.bf16.vlgmr.msra.gmra.mrb[24].mxu1 %v7900_v13  ;;  %v8024_v13 = vld [vmem:[#allocation8 + $0x20c] ss:$20 sps:$4 sm:$0xff]  }
 0x51c   : > { %3613 = vmatpush1.bf16.msra.mxu1 %v7942_v56 }
 0x51d   : > { %3614 = vmatprep.subr.bf16.mxu1 %v7952_v59  ;;  %3588 = vmatpush1.bf16.msra.mxu0 %v7970_v40 }
 0x51e   : > { %3589 = vmatprep.subr.bf16.mxu0 %v7982_v4 }
 0x520   : > { %3615 = vmatpush1.bf16.msra.mxu1 %v7955_v60 }
 0x521   : > { %3616 = vmatprep.subr.bf16.mxu1 %v7964_v0  ;;  %3590 = vmatpush1.bf16.msra.mxu0 %v7985_v5 }
 0x522   : > { %3591 = vmatprep.subr.bf16.mxu0 %v7994_v28 }
 0x524   : > { %3617 = vmatpush1.bf16.msra.mxu1 %v7967_v37 }
 0x525   : > { %3618 = vmatprep.subr.bf16.mxu1 %v7977_v3  ;;  %3592 = vmatpush1.bf16.msra.mxu0 %v7997_v17 }
 0x526   : > { %3593 = vmatprep.subr.bf16.mxu0 %v8006_v49 }
 0x528   : > { %3619 = vmatpush1.bf16.msra.mxu1 %v7975_v2 }
 0x529   : > { %3620 = vmatprep.subr.bf16.mxu1 %v7988_v7  ;;  %3594 = vmatpush1.bf16.msra.mxu0 %v8009_v31 }
 0x52a   : > { %3595 = vmatprep.subr.bf16.mxu0 %v8019_v27 }
 0x52c   : > { %3621 = vmatpush1.bf16.msra.mxu1 %v7991_v10 }
 0x52d   : > { %3622 = vmatprep.subr.bf16.mxu1 %v8000_v20  ;;  %3596 = vmatpush1.bf16.msra.mxu0 %v8017_v23 }
 0x52e   : > { %3597 = vmatprep.subr.bf16.mxu0 %v8024_v13 }
 0x530   : > { %3623 = vmatpush1.bf16.msra.mxu1 %v8003_v24 }
 0x531   : > { %3624 = vmatprep.subr.bf16.mxu1 %v8014_v33  ;;  %3598 = vmatpush1.bf16.msra.mxu0 %v8034_v6 }
 0x532   : > { %3599 = vmatprep.subr.bf16.mxu0 %v8037_v36 }
 0x534   : > { %3625 = vmatpush1.bf16.msra.mxu1 %v8012_v30 }
 0x535   : > { %3626 = vmatprep.subr.bf16.mxu1 %v8021_v21  ;;  %3600 = vmatpush1.bf16.msra.mxu0 %v8046_v12 }
 0x536   : > { %3601 = vmatprep.subr.bf16.mxu0 %v8049_v18 }
 0x538   : > { %3627 = vmatpush1.bf16.msra.mxu1 %v8028_v16 }
 0x539   : > { %3628 = vmatprep.subr.bf16.mxu1 %v8031_v38  ;;  %3602 = vmatpush1.bf16.msra.mxu0 %v8058_v35 }
 0x53c   : > { %3629 = vmatpush1.bf16.msra.mxu1 %v8040_v25 }
 0x53d   : > { %3630 = vmatprep.subr.bf16.mxu1 %v8043_v11 }
 0x540   : > { %3631 = vmatpush1.bf16.msra.mxu1 %v8052_v19 }
 0x541   : > { %3632 = vmatprep.subr.bf16.mxu1 %v8055_v34 }
 0x544   : > { %3633 = vmatpush1.bf16.msra.mxu1 %v8062_v39 }
 0x545   : > { %3634 = vmatprep.subr.bf16.mxu1 %v8067_v41 }
 0x548   : > { %3635 = vmatpush1.bf16.msra.mxu1 %v8069_v44 }
 0x549   : > { %3636 = vmatprep.subr.bf16.mxu1 %v8071_v42  ;;  %v8093_v42 = vld [vmem:[#allocation8 + $0x260] ss:$20 sps:$4 sm:$0xff]  }
 0x54a   : > { %8417 = vst [vmem:[#allocation38_spill] sm:$0xff] %v8093_v42 }
 0x54c   : > { %3637 = vmatpush1.bf16.msra.mxu1 %v8075_v43 }
 0x54d   : > { %3638 = vmatprep.subr.bf16.mxu1 %v8078_v45  ;;  %v6563_v45 = vld [vmem:[#allocation8 + $0x150] ss:$20 sps:$4 sm:$0xff]  }
 0x54e   : > { %6022 = vmatprep.subr.bf16.mxu0 %v6563_v45 }
 0x550   : > { %3639 = vmatpush1.bf16.msra.mxu1 %v8081_v46 }
 0x551   : > { %3640 = vmatprep.subr.bf16.mxu1 %v8084_v47 }
 0x554   : > { %3641 = vmatpush1.bf16.msra.mxu1 %v8087_v51 }
 0x555   : > { %3642 = vmatprep.subr.bf16.mxu1 %v8090_v52 }
 0x558   : > { %3643 = vmatpush1.bf16.msra.mxu1 %v8093_v42 }
 0x559   : > { %4236 = vmatprep.subr.bf16.mxu1 %v7893_v62 }
 0x5ce   : > { %v2947_v43 = vpop.f32.mrb[20].mxu1  ;;  %v2988_v46 = vpop.f32.mrb[24].mxu0 }
 0x5cf   : > { %v5658_v44 = vmul.f32 -1.442695, %v2947_v43  ;;  %v2949_v41 = vpop.f32.mrb[21].mxu1  ;;  %v2990_v39 = vpop.f32.mrb[25].mxu0 }
 0x5d0   : > { %v2951_v47 = vpop.f32.mrb[22].mxu1  ;;  %v2992_v34 = vpop.f32.mrb[26].mxu0  ;;  %v5659_v11 = vmul.f32 -1.442695, %v2949_v41 }
 0x5d1   : > { %6755 = vpow2.f32 %v5658_v44  ;;  %v2952_v19 = vpop.f32.mrb[23].mxu1  ;;  %v2993_v51 = vpop.f32.mrb[27].mxu0 }
 0x5d2   : > { %6757 = vpow2.f32 %v5659_v11  ;;  %v5661_v19 = vld [vmem:[%s7328_s26 + $0x28] sm:$0xff]  ;;  %v6564_v11 = vld [vmem:[#allocation8 + $0x10] ss:$20 sps:$4 sm:$0xff]  }
 0x5d3   : > { %v8102_v41 = vpack.c.bf16 %v5661_v19, %v5661_v19 }
 0x5db   : > { %v6756_v25 = vpop.eup %6755 }
 0x5dc   : > { %v3038_v52 = vadd.f32 1.0, %v6756_v25  ;;  %v6758_v42 = vpop.eup %6757 }
 0x5dd   : > { %v3044_v45 = vadd.f32 1.0, %v6758_v42  ;;  %v6570_v42 = vld [vmem:[#allocation8 + $0x88] ss:$20 sps:$4 sm:$0xff]  }
 0x5de   : > { %6759 = vrcp.f32 %v3038_v52  ;;  %v6565_v52 = vld [vmem:[#allocation8 + $0x178] ss:$20 sps:$4 sm:$0xff]  }
 0x5e8   : > { %v6760_v62 = vpop.eup %6759 }
 0x5e9   : > { %v3047_v38 = vmul.f32 %v6760_v62, %v2990_v39  ;;  %v6569_v39 = vld [vmem:[#allocation8 + $0x1c8] ss:$20 sps:$4 sm:$0xff]  }
 0x5eb   : > { %v3048_v16 = vadd.f32 %v3047_v38, %v2988_v46  ;;  %v6568_v38 = vld [vmem:[#allocation8 + $0x60] ss:$20 sps:$4 sm:$0xff]   ;;  %v6571_v46 = vld [vmem:[#allocation8 + $0x1f0] ss:$20 sps:$4 sm:$0xff]  }
 0x5ed   : > { %6761 = vtanh.f32 %v3048_v16  ;;  %v6567_v16 = vld [vmem:[#allocation8 + $0x1a0] ss:$20 sps:$4 sm:$0xff]  }
 0x5ee   : > { %6763 = vrcp.f32 %v3044_v45 }
 0x5f7   : > { %v6762_v43 = vpop.eup %6761 }
 0x5f8   : > { %v3050_v47 = vsub.f32 %v7898_v26, %v6762_v43  ;;  %v6764_v34 = vpop.eup %6763  ;;  %v6566_v26 = vld [vmem:[#allocation8 + $0x38] ss:$20 sps:$4 sm:$0xff]  }
 0x5fa   : > { %v3051_v44 = vmul.f32 %v6764_v34, %v3050_v47  ;;  %v3715_v34 = vstv %s3714_s7 }
 0x5fb   : > { %vm3716_vm0 = vcmp.eq.s32.totalorder %v3715_v34, 1  ;;  %v6649_v34 = vld [vmem:[#allocation8 + $0xf8] ss:$20 sps:$4 sm:$0xff]  }
 0x5fc   : > { %v8100_v51 = vadd.f32 %v6762_v43, %v3051_v44 }
 0x5fe   : > { %v3058_v25 = vpack.c.bf16 %v8100_v51, %v8100_v51 }
 0x600   : > { %3603 = vmatprep.mubr.bf16.mxu0 %v3058_v25  ;;  %3644 = vmatprep.mubr.bf16.mxu1 %v3058_v25 }
 0x601   : > { %3604 = vmatmul.mubr.bf16.vlgmr.msra.gmra.mrb[28].mxu0 %v8102_v41  ;;  %3645 = vmatmul.mubr.bf16.vlgmr.msra.gmra.mrb[28].mxu1 %v8102_v41 }
 0x602   : > { %3685 = vmatprep.mubr.bf16.mxu0 %v3058_v25  ;;  %6023 = vmatpush3.bf16.msra.mxu0 %v6564_v11 }
 0x603   : > { %6024 = vmatprep.subr.bf16.mxu0 %v6565_v52  ;;  %4237 = vmatpush1.bf16.msra.mxu1 %v7904_v8  ;;  %v6572_v8 = vld [vmem:[#allocation8 + $0xb0] ss:$20 sps:$4 sm:$0xff]  }
 0x604   : > { %4238 = vmatprep.subr.bf16.mxu1 %v7906_v9  ;;  %v6573_v9 = vld [vmem:[#allocation8 + $0x218] ss:$20 sps:$4 sm:$0xff]  }
 0x606   : > { %6025 = vmatpush3.bf16.msra.mxu0 %v6566_v26 }
 0x607   : > { %6026 = vmatprep.subr.bf16.mxu0 %v6567_v16  ;;  %4239 = vmatpush1.bf16.msra.mxu1 %v7911_v29  ;;  %v6574_v29 = vld [vmem:[#allocation8 + $0xd8] ss:$20 sps:$4 sm:$0xff]   ;;  %v6580_v16 = vld [vmem:[#allocation8 + $0x10] ss:$20 sps:$4 sm:$0xff]  }
 0x608   : > { %4240 = vmatprep.subr.bf16.mxu1 %v7914_v32  ;;  %v6016_v32 = vpop.f32.mrb[24].mxu1 }
 0x60a   : > { %6027 = vmatpush3.bf16.msra.mxu0 %v6568_v38  ;;  %v6581_v38 = vld [vmem:[#allocation8 + $0x178] ss:$20 sps:$4 sm:$0xff]  }
 0x60b   : > { %6028 = vmatprep.subr.bf16.mxu0 %v6569_v39  ;;  %4241 = vmatpush1.bf16.msra.mxu1 %v7917_v14  ;;  %v6017_v14 = vpop.f32.mrb[25].mxu1  ;;  %v6585_v39 = vld [vmem:[#allocation8] ss:$20 sps:$4 sm:$0xff]  }
 0x60c   : > { %4242 = vmatprep.subr.bf16.mxu1 %v7920_v15  ;;  %v6018_v15 = vadd.f32 %v6017_v14, %v6016_v32  ;;  %v6588_v32 = vld [vmem:[#allocation8 + $0x1c8] ss:$20 sps:$4 sm:$0xff]   ;;  %v6595_v14 = vld [vmem:[#allocation8 + $0x50] ss:$20 sps:$4 sm:$0xff]  }
 0x60e   : > { %6029 = vmatpush3.bf16.msra.mxu0 %v6570_v42  ;;  %5660 = vst [vmem:[%s7342_s0 + $0x18] sm:$0xff] %v6018_v15  ;;  %v6592_v42 = vld [vmem:[#allocation8 + $0x2c] ss:$20 sps:$4 sm:$0xff]   ;;  %v6589_v15 = vld [vmem:[#allocation8 + $0x88] ss:$20 sps:$4 sm:$0xff]  }
 0x60f   : > { %6030 = vmatprep.subr.bf16.mxu0 %v6571_v46  ;;  %4243 = vmatpush1.bf16.msra.mxu1 %v7923_v22  ;;  %v6019_v22 = vpop.f32.mrb[26].mxu1  ;;  %v6582_v46 = vld [vmem:[#allocation8 + $0x38] ss:$20 sps:$4 sm:$0xff]  }
 0x610   : > { %4244 = vmatprep.subr.bf16.mxu1 %v7928_v48  ;;  %v6020_v48 = vpop.f32.mrb[27].mxu1  ;;  %v6593_v22 = vld [vmem:[#allocation8 + $0x1f0] ss:$20 sps:$4 sm:$0xff]  }
 0x611   : > { %v6594_v48 = vld [vmem:[#allocation8 + $0xb0] ss:$20 sps:$4 sm:$0xff]  }
 0x612   : > { %6031 = vmatpush3.bf16.msra.mxu0 %v6572_v8  ;;  %v6590_v8 = vld [vmem:[#allocation8 + $0x28] ss:$20 sps:$4 sm:$0xff]  }
 0x613   : > { %6032 = vmatprep.subr.bf16.mxu0 %v6573_v9  ;;  %4245 = vmatpush1.bf16.msra.mxu1 %v7930_v50  ;;  %v6575_v50 = vld [vmem:[#allocation8 + $0x240] ss:$20 sps:$4 sm:$0xff]  }
 0x614   : > { %4246 = vmatprep.subr.bf16.mxu1 %v7934_v53  ;;  %v6576_v53 = vld [vmem:[#allocation8 + $0x100] ss:$20 sps:$4 sm:$0xff]  }
 0x615   : > { %v6597_v9 = vld [vmem:[#allocation8 + $0x54] ss:$20 sps:$4 sm:$0xff]  }
 0x616   : > { %6033 = vmatpush3.bf16.msra.mxu0 %v6574_v29  ;;  %v6584_v29 = vld [vmem:[#allocation8 + $0x60] ss:$20 sps:$4 sm:$0xff]  }
 0x617   : > { %4247 = vmatpush1.bf16.msra.mxu1 %v7936_v54  ;;  %6034 = vmatprep.subr.bf16.mxu0 %v6575_v50  ;;  %v6577_v54 = vld [vmem:[#allocation8 + $0x268] ss:$20 sps:$4 sm:$0xff]   ;;  %v6598_v50 = vld [vmem:[#allocation8 + $0x218] ss:$20 sps:$4 sm:$0xff]  }
 0x618   : > { %4248 = vmatprep.subr.bf16.mxu1 %v7946_v57  ;;  %v6578_v57 = vld [vmem:[#allocation8 + $0x128] ss:$20 sps:$4 sm:$0xff]  }
 0x61a   : > { %6035 = vmatpush3.bf16.msra.mxu0 %v6576_v53  ;;  %v6599_v53 = vld [vmem:[#allocation8 + $0xd8] ss:$20 sps:$4 sm:$0xff]  }
 0x61b   : > { %4249 = vmatpush1.bf16.msra.mxu1 %v7949_v58  ;;  %6036 = vmatprep.subr.bf16.mxu0 %v6577_v54  ;;  %v8420_v58 = vld [vmem:[#allocation24_spill] sm:$0xff] }
 0x61c   : > { %4250 = vmatprep.subr.bf16.mxu1 %v7958_v61  ;;  %v8423_v61 = vld [vmem:[#allocation27_spill] sm:$0xff] }
 0x61e   : > { %6037 = vmatpush3.bf16.msra.mxu0 %v6578_v57 }
 0x61f   : > { %4251 = vmatpush1.bf16.msra.mxu1 %v7961_v63  ;;  %4277 = vmatprep.subr.bf16.mxu0 %v7939_v55  ;;  %v8418_v55 = vld [vmem:[#allocation22_spill] sm:$0xff]  ;;  %v8424_v63 = vld [vmem:[#allocation28_spill] sm:$0xff] }
 0x620   : > { %4252 = vmatprep.subr.bf16.mxu1 %v7972_v1  ;;  %v8428_v1 = vld [vmem:[#allocation32_spill] sm:$0xff] }
 0x621   : > { %3686 = vmatmul.mubr.bf16.vlgmr.msra.gmra.mrb[32].mxu0 %v8102_v41  ;;  %v5746_v41 = vld [vmem:[%s7328_s26 + $0x30] sm:$0xff] }
 0x622   : > { %4278 = vmatpush1.bf16.msra.mxu0 %v7942_v56  ;;  %v8419_v56 = vld [vmem:[#allocation23_spill] sm:$0xff]  ;;  %v8182_v52 = vpack.c.bf16 %v5746_v41, %v5746_v41  ;;  %v6657_v41 = vld [vmem:[#allocation8 + $0x124] ss:$20 sps:$4 sm:$0xff]  }
 0x623   : > { %4253 = vmatpush1.bf16.msra.mxu1 %v7970_v40  ;;  %4279 = vmatprep.subr.bf16.mxu0 %v7952_v59  ;;  %v8421_v59 = vld [vmem:[#allocation25_spill] sm:$0xff]  ;;  %v8427_v40 = vld [vmem:[#allocation31_spill] sm:$0xff] }
 0x624   : > { %4254 = vmatprep.subr.bf16.mxu1 %v7982_v4  ;;  %v8431_v4 = vld [vmem:[#allocation35_spill] sm:$0xff] }
 0x626   : > { %4280 = vmatpush1.bf16.msra.mxu0 %v7955_v60  ;;  %v8422_v60 = vld [vmem:[#allocation26_spill] sm:$0xff] }
 0x627   : > { %4255 = vmatpush1.bf16.msra.mxu1 %v7985_v5  ;;  %4281 = vmatprep.subr.bf16.mxu0 %v7964_v0  ;;  %v8425_v0 = vld [vmem:[#allocation29_spill] sm:$0xff]  ;;  %v8432_v5 = vld [vmem:[#allocation36_spill] sm:$0xff] }
 0x628   : > { %4256 = vmatprep.subr.bf16.mxu1 %v7994_v28  ;;  %v6579_v28 = vld [vmem:[#allocation8 + $0x150] ss:$20 sps:$4 sm:$0xff]  }
 0x62a   : > { %4282 = vmatpush1.bf16.msra.mxu0 %v7967_v37  ;;  %v8426_v37 = vld [vmem:[#allocation30_spill] sm:$0xff] }
 0x62b   : > { %4257 = vmatpush1.bf16.msra.mxu1 %v7997_v17  ;;  %4283 = vmatprep.subr.bf16.mxu0 %v7977_v3  ;;  %v8430_v3 = vld [vmem:[#allocation34_spill] sm:$0xff]  ;;  %v6587_v17 = vld [vmem:[#allocation8 + $0x4] ss:$20 sps:$4 sm:$0xff]  }
 0x62c   : > { %4258 = vmatprep.subr.bf16.mxu1 %v8006_v49 }
 0x62e   : > { %4284 = vmatpush1.bf16.msra.mxu0 %v7975_v2  ;;  %v8429_v2 = vld [vmem:[#allocation33_spill] sm:$0xff] }
 0x62f   : > { %4259 = vmatpush1.bf16.msra.mxu1 %v8009_v31  ;;  %4285 = vmatprep.subr.bf16.mxu0 %v7988_v7  ;;  %v8433_v7 = vld [vmem:[#allocation37_spill] sm:$0xff] }
 0x630   : > { %4260 = vmatprep.subr.bf16.mxu1 %v8019_v27 }
 0x632   : > { %4286 = vmatpush1.bf16.msra.mxu0 %v7991_v10  ;;  %v8434_v10 = vld [vmem:[#allocation38_spill] sm:$0xff] }
 0x633   : > { %4261 = vmatpush1.bf16.msra.mxu1 %v8017_v23  ;;  %4287 = vmatprep.subr.bf16.mxu0 %v8000_v20 }
 0x634   : > { %4262 = vmatprep.subr.bf16.mxu1 %v8024_v13 }
 0x636   : > { %4288 = vmatpush1.bf16.msra.mxu0 %v8003_v24 }
 0x637   : > { %4263 = vmatpush1.bf16.msra.mxu1 %v8034_v6  ;;  %4289 = vmatprep.subr.bf16.mxu0 %v8014_v33 }
 0x638   : > { %4264 = vmatprep.subr.bf16.mxu1 %v8037_v36 }
 0x63a   : > { %4290 = vmatpush1.bf16.msra.mxu0 %v8012_v30 }
 0x63b   : > { %4265 = vmatpush1.bf16.msra.mxu1 %v8046_v12  ;;  %4291 = vmatprep.subr.bf16.mxu0 %v8021_v21 }
 0x63c   : > { %4266 = vmatprep.subr.bf16.mxu1 %v8049_v18 }
 0x63e   : > { %4292 = vmatpush1.bf16.msra.mxu0 %v8418_v55 }
 0x63f   : > { %4267 = vmatpush1.bf16.msra.mxu1 %v8058_v35  ;;  %4293 = vmatprep.subr.bf16.mxu0 %v8419_v56 }
 0x640   : > { %6044 = vmatprep.subr.bf16.mxu1 %v6579_v28  ;;  %v6621_v28 = vld [vmem:[#allocation8 + $0x34] ss:$20 sps:$4 sm:$0xff]  }
 0x642   : > { %4294 = vmatpush1.bf16.msra.mxu0 %v8420_v58 }
 0x643   : > { %4295 = vmatprep.subr.bf16.mxu0 %v8421_v59  ;;  %v6602_v59 = vld [vmem:[#allocation8 + $0x7c] ss:$20 sps:$4 sm:$0xff]  }
 0x646   : > { %4296 = vmatpush1.bf16.msra.mxu0 %v8422_v60  ;;  %v6600_v60 = vld [vmem:[#allocation8 + $0x78] ss:$20 sps:$4 sm:$0xff]  }
 0x647   : > { %4297 = vmatprep.subr.bf16.mxu0 %v8423_v61  ;;  %v6603_v61 = vld [vmem:[#allocation8 + $0x240] ss:$20 sps:$4 sm:$0xff]  }
 0x64a   : > { %4298 = vmatpush1.bf16.msra.mxu0 %v8424_v63  ;;  %v6604_v63 = vld [vmem:[#allocation8 + $0x100] ss:$20 sps:$4 sm:$0xff]  }
 0x64b   : > { %4299 = vmatprep.subr.bf16.mxu0 %v8425_v0  ;;  %v6607_v0 = vld [vmem:[#allocation8 + $0xa4] ss:$20 sps:$4 sm:$0xff]  }
 0x64e   : > { %4300 = vmatpush1.bf16.msra.mxu0 %v8426_v37  ;;  %v6605_v37 = vld [vmem:[#allocation8 + $0xa0] ss:$20 sps:$4 sm:$0xff]  }
 0x64f   : > { %4301 = vmatprep.subr.bf16.mxu0 %v8427_v40  ;;  %v6608_v40 = vld [vmem:[#allocation8 + $0x268] ss:$20 sps:$4 sm:$0xff]  }
 0x652   : > { %4302 = vmatpush1.bf16.msra.mxu0 %v8428_v1  ;;  %v6609_v1 = vld [vmem:[#allocation8 + $0x128] ss:$20 sps:$4 sm:$0xff]  }
 0x653   : > { %4303 = vmatprep.subr.bf16.mxu0 %v8429_v2  ;;  %v6612_v2 = vld [vmem:[#allocation8 + $0xcc] ss:$20 sps:$4 sm:$0xff]  }
 0x656   : > { %4304 = vmatpush1.bf16.msra.mxu0 %v8430_v3  ;;  %v6610_v3 = vld [vmem:[#allocation8 + $0xc8] ss:$20 sps:$4 sm:$0xff]  }
 0x657   : > { %4305 = vmatprep.subr.bf16.mxu0 %v8431_v4  ;;  %v6615_v4 = vld [vmem:[#allocation8 + $0xc] ss:$20 sps:$4 sm:$0xff]  }
 0x65a   : > { %4306 = vmatpush1.bf16.msra.mxu0 %v8432_v5  ;;  %v6613_v5 = vld [vmem:[#allocation8 + $0x8] ss:$20 sps:$4 sm:$0xff]  }
 0x65b   : > { %4307 = vmatprep.subr.bf16.mxu0 %v8433_v7  ;;  %v6618_v7 = vld [vmem:[#allocation8 + $0xf4] ss:$20 sps:$4 sm:$0xff]  }
 0x65e   : > { %4308 = vmatpush1.bf16.msra.mxu0 %v8434_v10  ;;  %v6616_v10 = vld [vmem:[#allocation8 + $0xf0] ss:$20 sps:$4 sm:$0xff]  }
 0x65f   : > { %4900 = vmatprep.subr.bf16.mxu0 %v6587_v17  ;;  %v6619_v17 = vld [vmem:[#allocation8 + $0x30] ss:$20 sps:$4 sm:$0xff]  }
 0x6d4   : > { %v3605_v20 = vpop.f32.mrb[28].mxu0  ;;  %v3646_v24 = vpop.f32.mrb[28].mxu1 }
 0x6d5   : > { %v5742_v49 = vmul.f32 -1.442695, %v3605_v20  ;;  %v3607_v31 = vpop.f32.mrb[29].mxu0  ;;  %v3648_v30 = vpop.f32.mrb[29].mxu1  ;;  %v6624_v20 = vld [vmem:[#allocation8 + $0x11c] ss:$20 sps:$4 sm:$0xff]  }
 0x6d6   : > { %v3609_v33 = vpop.f32.mrb[30].mxu0  ;;  %v3650_v23 = vpop.f32.mrb[30].mxu1  ;;  %v5743_v13 = vmul.f32 -1.442695, %v3607_v31  ;;  %v6625_v31 = vld [vmem:[#allocation8 + $0x58] ss:$20 sps:$4 sm:$0xff]  }
 0x6d7   : > { %6765 = vpow2.f32 %v5742_v49  ;;  %v3610_v27 = vpop.f32.mrb[31].mxu0  ;;  %v3651_v21 = vpop.f32.mrb[31].mxu1  ;;  %v6627_v49 = vld [vmem:[#allocation8 + $0x5c] ss:$20 sps:$4 sm:$0xff]   ;;  %v6630_v33 = vld [vmem:[#allocation8 + $0x144] ss:$20 sps:$4 sm:$0xff]  }
 0x6d8   : > { %6767 = vpow2.f32 %v5743_v13  ;;  %v6633_v23 = vld [vmem:[#allocation8 + $0x84] ss:$20 sps:$4 sm:$0xff]   ;;  %v6631_v27 = vld [vmem:[#allocation8 + $0x80] ss:$20 sps:$4 sm:$0xff]   ;;  %v6634_v13 = vld [vmem:[#allocation8 + $0x168] ss:$20 sps:$4 sm:$0xff]  }
 0x6d9   : > { %v6636_v21 = vld [vmem:[#allocation8 + $0x16c] ss:$20 sps:$4 sm:$0xff]  }
 0x6e1   : > { %v6766_v6 = vpop.eup %6765 }
 0x6e2   : > { %v3696_v36 = vadd.f32 1.0, %v6766_v6  ;;  %v6768_v12 = vpop.eup %6767  ;;  %v6639_v6 = vld [vmem:[#allocation8 + $0xac] ss:$20 sps:$4 sm:$0xff]  }
 0x6e3   : > { %v3702_v62 = vadd.f32 1.0, %v6768_v12  ;;  %v6642_v12 = vld [vmem:[#allocation8 + $0x194] ss:$20 sps:$4 sm:$0xff]  }
 0x6e4   : > { %6769 = vrcp.f32 %v3696_v36  ;;  %v6637_v36 = vld [vmem:[#allocation8 + $0xa8] ss:$20 sps:$4 sm:$0xff]  }
 0x6ee   : > { %v6770_v18 = vpop.eup %6769 }
 0x6ef   : > { %v3705_v35 = vmul.f32 %v6770_v18, %v3648_v30  ;;  %v6628_v30 = vld [vmem:[#allocation8 + $0x140] ss:$20 sps:$4 sm:$0xff]   ;;  %v6640_v18 = vld [vmem:[#allocation8 + $0x190] ss:$20 sps:$4 sm:$0xff]  }
 0x6f1   : > { %v3706_v45 = vadd.f32 %v3705_v35, %v3646_v24  ;;  %v6622_v24 = vld [vmem:[#allocation8 + $0x118] ss:$20 sps:$4 sm:$0xff]   ;;  %v6645_v35 = vld [vmem:[#allocation8 + $0xd4] ss:$20 sps:$4 sm:$0xff]  }
 0x6f3   : > { %6771 = vtanh.f32 %v3706_v45  ;;  %v6648_v45 = vld [vmem:[#allocation8 + $0x1bc] ss:$20 sps:$4 sm:$0xff]  }
 0x6f4   : > { %6773 = vrcp.f32 %v3702_v62  ;;  %v6038_v54 = vpop.f32.mrb[32].mxu0  ;;  %v6643_v62 = vld [vmem:[#allocation8 + $0xd0] ss:$20 sps:$4 sm:$0xff]  }
 0x6f5   : > { %v6039_v57 = vpop.f32.mrb[33].mxu0 }
 0x6f6   : > { %v6040_v55 = vadd.f32 %v6039_v57, %v6038_v54  ;;  %v6041_v56 = vpop.f32.mrb[34].mxu0  ;;  %v6687_v54 = vld [vmem:[#allocation8 + $0x23c] ss:$20 sps:$4 sm:$0xff]   ;;  %v6685_v57 = vld [vmem:[#allocation8 + $0x238] ss:$20 sps:$4 sm:$0xff]  }
 0x6f7   : > { %v6042_v58 = vpop.f32.mrb[35].mxu0  ;;  %v6688_v56 = vld [vmem:[#allocation8 + $0x260] ss:$20 sps:$4 sm:$0xff]  }
 0x6f8   : > { %5745 = vst [vmem:[%s7342_s0 + $0x20] sm:$0xff] %v6040_v55  ;;  %v6690_v55 = vld [vmem:[#allocation8 + $0x264] ss:$20 sps:$4 sm:$0xff]  }
 0x6fd   : > { %v6772_v43 = vpop.eup %6771 }
 0x6fe   : > { %v3708_v47 = vsub.f32 %v8100_v51, %v6772_v43  ;;  %v6774_v44 = vpop.eup %6773 }
 0x700   : > { %v3709_v19 = vmul.f32 %v6774_v44, %v3708_v47  ;;  %v6651_v47 = vld [vmem:[#allocation8 + $0xfc] ss:$20 sps:$4 sm:$0xff]   ;;  %v6654_v44 = vld [vmem:[#allocation8 + $0x1e4] ss:$20 sps:$4 sm:$0xff]  }
 0x702   : > { %v3710_v25 = vadd.f32 %v6772_v43, %v3709_v19  ;;  %v6646_v43 = vld [vmem:[#allocation8 + $0x1b8] ss:$20 sps:$4 sm:$0xff]   ;;  %v6652_v19 = vld [vmem:[#allocation8 + $0x1e0] ss:$20 sps:$4 sm:$0xff]  }
 0x704   : > { %v8180_v11 = vsel %vm3716_vm0, %v3710_v25, %v8100_v51  ;;  %v6583_v51 = vld [vmem:[#allocation8 + $0x1a0] ss:$20 sps:$4 sm:$0xff]  }
 0x705   : > { %v3723_v26 = vpack.c.bf16 %v8180_v11, %v8180_v11  ;;  %v6655_v25 = vld [vmem:[#allocation8 + $0x120] ss:$20 sps:$4 sm:$0xff]  }
 0x707   : > { %4268 = vmatprep.mubr.bf16.mxu1 %v3723_v26  ;;  %4309 = vmatprep.mubr.bf16.mxu0 %v3723_v26 }
 0x708   : > { %4269 = vmatmul.mubr.bf16.vlgmr.msra.gmra.mrb[32].mxu1 %v8182_v52  ;;  %4310 = vmatmul.mubr.bf16.vlgmr.msra.gmra.mrb[36].mxu0 %v8182_v52 }
 0x709   : > { %4350 = vmatprep.mubr.bf16.mxu1 %v3723_v26  ;;  %6045 = vmatpush3.bf16.msra.mxu1 %v6580_v16  ;;  %v6658_v26 = vld [vmem:[#allocation8 + $0x208] ss:$20 sps:$4 sm:$0xff]   ;;  %v6663_v16 = vld [vmem:[#allocation8 + $0x14c] ss:$20 sps:$4 sm:$0xff]  }
 0x70a   : > { %6046 = vmatprep.subr.bf16.mxu1 %v6581_v38  ;;  %4901 = vmatpush1.bf16.msra.mxu0 %v6585_v39  ;;  %v6661_v38 = vld [vmem:[#allocation8 + $0x148] ss:$20 sps:$4 sm:$0xff]   ;;  %v6664_v39 = vld [vmem:[#allocation8 + $0x230] ss:$20 sps:$4 sm:$0xff]  }
 0x70b   : > { %4902 = vmatprep.subr.bf16.mxu0 %v6592_v42  ;;  %v6666_v42 = vld [vmem:[#allocation8 + $0x234] ss:$20 sps:$4 sm:$0xff]  }
 0x70d   : > { %6047 = vmatpush3.bf16.msra.mxu1 %v6582_v46  ;;  %v6667_v46 = vld [vmem:[#allocation8 + $0x170] ss:$20 sps:$4 sm:$0xff]  }
 0x70e   : > { %6048 = vmatprep.subr.bf16.mxu1 %v6583_v51  ;;  %4903 = vmatpush1.bf16.msra.mxu0 %v6590_v8  ;;  %v6669_v51 = vld [vmem:[#allocation8 + $0x174] ss:$20 sps:$4 sm:$0xff]   ;;  %v6672_v8 = vld [vmem:[#allocation8 + $0x25c] ss:$20 sps:$4 sm:$0xff]  }
 0x70f   : > { %4904 = vmatprep.subr.bf16.mxu0 %v6597_v9  ;;  %v6675_v9 = vld [vmem:[#allocation8 + $0x19c] ss:$20 sps:$4 sm:$0xff]  }
 0x711   : > { %6049 = vmatpush3.bf16.msra.mxu1 %v6584_v29  ;;  %v6670_v29 = vld [vmem:[#allocation8 + $0x258] ss:$20 sps:$4 sm:$0xff]  }
 0x712   : > { %6050 = vmatprep.subr.bf16.mxu1 %v6588_v32  ;;  %4905 = vmatpush1.bf16.msra.mxu0 %v6595_v14  ;;  %v6673_v32 = vld [vmem:[#allocation8 + $0x198] ss:$20 sps:$4 sm:$0xff]  }
 0x713   : > { %4906 = vmatprep.subr.bf16.mxu0 %v6602_v59  ;;  %v6678_v14 = vld [vmem:[#allocation8 + $0x1c4] ss:$20 sps:$4 sm:$0xff]  }
 0x715   : > { %6051 = vmatpush3.bf16.msra.mxu1 %v6589_v15  ;;  %v6676_v15 = vld [vmem:[#allocation8 + $0x1c0] ss:$20 sps:$4 sm:$0xff]  }
 0x716   : > { %6052 = vmatprep.subr.bf16.mxu1 %v6593_v22  ;;  %4907 = vmatpush1.bf16.msra.mxu0 %v6600_v60  ;;  %v6681_v22 = vld [vmem:[#allocation8 + $0x1ec] ss:$20 sps:$4 sm:$0xff]  }
 0x717   : > { %4908 = vmatprep.subr.bf16.mxu0 %v6607_v0 }
 0x719   : > { %6053 = vmatpush3.bf16.msra.mxu1 %v6594_v48  ;;  %v6679_v48 = vld [vmem:[#allocation8 + $0x1e8] ss:$20 sps:$4 sm:$0xff]  }
 0x71a   : > { %6054 = vmatprep.subr.bf16.mxu1 %v6598_v50  ;;  %4909 = vmatpush1.bf16.msra.mxu0 %v6605_v37  ;;  %v6684_v50 = vld [vmem:[#allocation8 + $0x214] ss:$20 sps:$4 sm:$0xff]  }
 0x71b   : > { %4910 = vmatprep.subr.bf16.mxu0 %v6612_v2 }
 0x71d   : > { %6055 = vmatpush3.bf16.msra.mxu1 %v6599_v53  ;;  %v6682_v53 = vld [vmem:[#allocation8 + $0x210] ss:$20 sps:$4 sm:$0xff]  }
 0x71e   : > { %6056 = vmatprep.subr.bf16.mxu1 %v6603_v61  ;;  %4911 = vmatpush1.bf16.msra.mxu0 %v6610_v3 }
 0x71f   : > { %4912 = vmatprep.subr.bf16.mxu0 %v6618_v7 }
 0x721   : > { %6057 = vmatpush3.bf16.msra.mxu1 %v6604_v63 }
 0x722   : > { %6058 = vmatprep.subr.bf16.mxu1 %v6608_v40  ;;  %4913 = vmatpush1.bf16.msra.mxu0 %v6616_v10 }
 0x723   : > { %4914 = vmatprep.subr.bf16.mxu0 %v6624_v20 }
 0x725   : > { %6059 = vmatpush3.bf16.msra.mxu1 %v6609_v1 }
 0x726   : > { %4941 = vmatprep.subr.bf16.mxu1 %v6615_v4  ;;  %4915 = vmatpush1.bf16.msra.mxu0 %v6622_v24 }
 0x727   : > { %4916 = vmatprep.subr.bf16.mxu0 %v6630_v33  ;;  %v5830_v33 = vld [vmem:[%s7328_s26 + $0x38] sm:$0xff] }
 0x728   : > { %4351 = vmatmul.mubr.bf16.vlgmr.msra.gmra.mrb[36].mxu1 %v8182_v52  ;;  %v6660_v52 = vld [vmem:[#allocation8 + $0x20c] ss:$20 sps:$4 sm:$0xff]  }
 0x729   : > { %4942 = vmatpush1.bf16.msra.mxu1 %v6613_v5 }
 0x72a   : > { %4943 = vmatprep.subr.bf16.mxu1 %v6621_v28  ;;  %4917 = vmatpush1.bf16.msra.mxu0 %v6628_v30 }
 0x72b   : > { %4918 = vmatprep.subr.bf16.mxu0 %v6636_v21  ;;  %v8196_v21 = vpack.c.bf16 %v5830_v33, %v5830_v33 }
 0x72d   : > { %4944 = vmatpush1.bf16.msra.mxu1 %v6619_v17 }
 0x72e   : > { %4945 = vmatprep.subr.bf16.mxu1 %v6627_v49  ;;  %4919 = vmatpush1.bf16.msra.mxu0 %v6634_v13  ;;  %v4379_v49 = vstv %s4378_s20 }
 0x72f   : > { %4920 = vmatprep.subr.bf16.mxu0 %v6642_v12  ;;  %vm4380_vm1 = vcmp.eq.s32.totalorder %v4379_v49, 1 }
 0x731   : > { %4946 = vmatpush1.bf16.msra.mxu1 %v6625_v31 }
 0x732   : > { %4947 = vmatprep.subr.bf16.mxu1 %v6633_v23  ;;  %4921 = vmatpush1.bf16.msra.mxu0 %v6640_v18 }
 0x733   : > { %4922 = vmatprep.subr.bf16.mxu0 %v6648_v45  ;;  %v6693_v45 = vld [vmem:[#allocation8 + $0x178] ss:$20 sps:$4 sm:$0xff]  }
 0x735   : > { %4948 = vmatpush1.bf16.msra.mxu1 %v6631_v27 }
 0x736   : > { %4949 = vmatprep.subr.bf16.mxu1 %v6639_v6  ;;  %4923 = vmatpush1.bf16.msra.mxu0 %v6646_v43  ;;  %v6694_v43 = vld [vmem:[#allocation8 + $0x38] ss:$20 sps:$4 sm:$0xff]  }
 0x737   : > { %4924 = vmatprep.subr.bf16.mxu0 %v6654_v44  ;;  %v6696_v44 = vld [vmem:[#allocation8 + $0x1a0] ss:$20 sps:$4 sm:$0xff]  }
 0x739   : > { %4950 = vmatpush1.bf16.msra.mxu1 %v6637_v36 }
 0x73a   : > { %4951 = vmatprep.subr.bf16.mxu1 %v6645_v35  ;;  %4925 = vmatpush1.bf16.msra.mxu0 %v6652_v19  ;;  %v6697_v19 = vld [vmem:[#allocation8 + $0x60] ss:$20 sps:$4 sm:$0xff]  }
 0x73b   : > { %4926 = vmatprep.subr.bf16.mxu0 %v6660_v52  ;;  %v6700_v52 = vld [vmem:[#allocation8 + $0x88] ss:$20 sps:$4 sm:$0xff]  }
 0x73d   : > { %4952 = vmatpush1.bf16.msra.mxu1 %v6643_v62  ;;  %v6692_v62 = vld [vmem:[#allocation8 + $0x10] ss:$20 sps:$4 sm:$0xff]  }
 0x73e   : > { %4953 = vmatprep.subr.bf16.mxu1 %v6651_v47  ;;  %4927 = vmatpush1.bf16.msra.mxu0 %v6658_v26  ;;  %v6695_v47 = vld [vmem:[#allocation9] sm:$0xff]   ;;  %v6701_v26 = vld [vmem:[#allocation9 + $0x10] sm:$0xff]  }
 0x73f   : > { %4928 = vmatprep.subr.bf16.mxu0 %v6666_v42  ;;  %v6705_v42 = vld [vmem:[#allocation8 + $0x218] ss:$20 sps:$4 sm:$0xff]  }
 0x741   : > { %4954 = vmatpush1.bf16.msra.mxu1 %v6649_v34  ;;  %v7094_v34 = vmov 0.0  }
 0x742   : > { %4955 = vmatprep.subr.bf16.mxu1 %v6657_v41  ;;  %4929 = vmatpush1.bf16.msra.mxu0 %v6664_v39  ;;  %v6698_v41 = vld [vmem:[#allocation9 + $0x8] sm:$0xff]   ;;  %v6704_v39 = vld [vmem:[#allocation9 + $0x18] sm:$0xff]  }
 0x743   : > { %4930 = vmatprep.subr.bf16.mxu0 %v6672_v8  ;;  %v6708_v8 = vld [vmem:[#allocation8 + $0x240] ss:$20 sps:$4 sm:$0xff]  }
 0x745   : > { %4956 = vmatpush1.bf16.msra.mxu1 %v6655_v25  ;;  %v6699_v25 = vld [vmem:[#allocation8 + $0x1c8] ss:$20 sps:$4 sm:$0xff]  }
 0x746   : > { %4957 = vmatprep.subr.bf16.mxu1 %v6663_v16  ;;  %4931 = vmatpush1.bf16.msra.mxu0 %v6670_v29  ;;  %v6702_v16 = vld [vmem:[#allocation8 + $0x1f0] ss:$20 sps:$4 sm:$0xff]   ;;  %v6710_v29 = vld [vmem:[#allocation9 + $0x28] sm:$0xff]  }
 0x749   : > { %4958 = vmatpush1.bf16.msra.mxu1 %v6661_v38  ;;  %v6703_v38 = vld [vmem:[#allocation8 + $0xb0] ss:$20 sps:$4 sm:$0xff]  }
 0x74a   : > { %4959 = vmatprep.subr.bf16.mxu1 %v6669_v51  ;;  %v6707_v51 = vld [vmem:[#allocation9 + $0x20] sm:$0xff]  }
 0x74d   : > { %4960 = vmatpush1.bf16.msra.mxu1 %v6667_v46  ;;  %v6706_v46 = vld [vmem:[#allocation8 + $0xd8] ss:$20 sps:$4 sm:$0xff]  }
 0x74e   : > { %4961 = vmatprep.subr.bf16.mxu1 %v6675_v9  ;;  %v6709_v9 = vld [vmem:[#allocation8 + $0x100] ss:$20 sps:$4 sm:$0xff]  }
 0x751   : > { %4962 = vmatpush1.bf16.msra.mxu1 %v6673_v32  ;;  %v6711_v32 = vld [vmem:[#allocation8 + $0x268] ss:$20 sps:$4 sm:$0xff]  }
 0x752   : > { %4963 = vmatprep.subr.bf16.mxu1 %v6678_v14  ;;  %v6712_v14 = vld [vmem:[#allocation8 + $0x128] ss:$20 sps:$4 sm:$0xff]  }
 0x755   : > { %4964 = vmatpush1.bf16.msra.mxu1 %v6676_v15  ;;  %v6713_v15 = vld [vmem:[#allocation9 + $0x30] sm:$0xff]  }
 0x756   : > { %4965 = vmatprep.subr.bf16.mxu1 %v6681_v22  ;;  %v6714_v22 = vld [vmem:[#allocation9 + $0x38] sm:$0xff]  }
 0x759   : > { %4966 = vmatpush1.bf16.msra.mxu1 %v6679_v48 }
 0x75a   : > { %4967 = vmatprep.subr.bf16.mxu1 %v6684_v50 }
 0x75d   : > { %4968 = vmatpush1.bf16.msra.mxu1 %v6682_v53 }
 0x75e   : > { %4969 = vmatprep.subr.bf16.mxu1 %v6687_v54 }
 0x761   : > { %4970 = vmatpush1.bf16.msra.mxu1 %v6685_v57 }
 0x762   : > { %4971 = vmatprep.subr.bf16.mxu1 %v6690_v55 }
 0x765   : > { %4972 = vmatpush1.bf16.msra.mxu1 %v6688_v56 }
 0x766   : > { %6097 = vmatprep.subr.bf16.mxu1 %v7094_v34 }
 0x7db   : > { %v4270_v58 = vpop.f32.mrb[32].mxu1  ;;  %v4311_v59 = vpop.f32.mrb[36].mxu0 }
 0x7dc   : > { %v5827_v60 = vmul.f32 -1.442695, %v4270_v58  ;;  %v4272_v61 = vpop.f32.mrb[33].mxu1  ;;  %v4313_v63 = vpop.f32.mrb[37].mxu0 }
 0x7dd   : > { %v4274_v0 = vpop.f32.mrb[34].mxu1  ;;  %v4315_v37 = vpop.f32.mrb[38].mxu0  ;;  %v5828_v2 = vmul.f32 -1.442695, %v4272_v61 }
 0x7de   : > { %6775 = vpow2.f32 %v5827_v60  ;;  %v4275_v40 = vpop.f32.mrb[35].mxu1  ;;  %v4316_v1 = vpop.f32.mrb[39].mxu0 }
 0x7df   : > { %6777 = vpow2.f32 %v5828_v2 }
 0x7e8   : > { %v6776_v3 = vpop.eup %6775 }
 0x7e9   : > { %v4361_v4 = vadd.f32 1.0, %v6776_v3  ;;  %v6778_v5 = vpop.eup %6777 }
 0x7ea   : > { %v4367_v28 = vadd.f32 1.0, %v6778_v5  ;;  %v5043_v5 = vstv %s5042_s28 }
 0x7eb   : > { %6779 = vrcp.f32 %v4361_v4  ;;  %vm5044_vm3 = vcmp.eq.s32.totalorder %v5043_v5, 1 }
 0x7f5   : > { %v6780_v7 = vpop.eup %6779 }
 0x7f6   : > { %v4370_v10 = vmul.f32 %v6780_v7, %v4313_v63 }
 0x7f8   : > { %v4371_v17 = vadd.f32 %v4370_v10, %v4311_v59 }
 0x7fa   : > { %6781 = vtanh.f32 %v4371_v17 }
 0x7fb   : > { %6783 = vrcp.f32 %v4367_v28  ;;  %v6060_v6 = vpop.f32.mrb[36].mxu1 }
 0x7fc   : > { %v6061_v36 = vpop.f32.mrb[37].mxu1 }
 0x7fd   : > { %v6062_v12 = vadd.f32 %v6061_v36, %v6060_v6  ;;  %v6063_v18 = vpop.f32.mrb[38].mxu1 }
 0x7fe   : > { %v6064_v35 = vpop.f32.mrb[39].mxu1 }
 0x7ff   : > { %5829 = vst [vmem:[%s7342_s0 + $0x28] sm:$0xff] %v6062_v12 }
 0x804   : > { %v6782_v20 = vpop.eup %6781 }
 0x805   : > { %v4373_v24 = vsub.f32 %v8180_v11, %v6782_v20  ;;  %v6784_v31 = vpop.eup %6783 }
 0x807   : > { %v4374_v30 = vmul.f32 %v6784_v31, %v4373_v24 }
 0x809   : > { %v4375_v23 = vadd.f32 %v6782_v20, %v4374_v30 }
 0x80b   : > { %v8194_v27 = vsel %vm4380_vm1, %v4375_v23, %v8180_v11  ;;  %v6691_v11 = vld [vmem:[#allocation8 + $0x150] ss:$20 sps:$4 sm:$0xff]  }
 0x80c   : > { %v4387_v13 = vpack.c.bf16 %v8194_v27, %v8194_v27  ;;  %6066 = vmatprep.subr.bf16.mxu0 %v6691_v11  ;;  %v5914_v23 = vld [vmem:[%s8292_s4] ss:$0 sm:$0xff] }
 0x80e   : > { %4932 = vmatprep.mubr.bf16.mxu0 %v4387_v13  ;;  %4973 = vmatprep.mubr.bf16.mxu1 %v4387_v13 }
 0x80f   : > { %4933 = vmatmul.mubr.bf16.vlgmr.msra.gmra.mrb[40].mxu0 %v8196_v21  ;;  %4974 = vmatmul.mubr.bf16.vlgmr.msra.gmra.mrb[40].mxu1 %v8196_v21 }
 0x810   : > { %5014 = vmatprep.mubr.bf16.mxu0 %v4387_v13  ;;  %6067 = vmatpush3.bf16.msra.mxu0 %v6692_v62 }
 0x811   : > { %6068 = vmatprep.subr.bf16.mxu0 %v6693_v45  ;;  %6098 = vmatpush3.bf16.msra.mxu1 %v6695_v47 }
 0x812   : > { %6099 = vmatprep.subr.bf16.mxu1 %v7094_v34  ;;  %6113 = vmatprep.mubr.msk.bf16.mxu1 %vm7095_vm2, %v7094_v34 }
 0x814   : > { %6069 = vmatpush3.bf16.msra.mxu0 %v6694_v43 }
 0x815   : > { %6070 = vmatprep.subr.bf16.mxu0 %v6696_v44  ;;  %6100 = vmatpush3.bf16.msra.mxu1 %v6698_v41 }
 0x816   : > { %6101 = vmatprep.subr.bf16.mxu1 %v7094_v34 }
 0x818   : > { %6071 = vmatpush3.bf16.msra.mxu0 %v6697_v19 }
 0x819   : > { %6072 = vmatprep.subr.bf16.mxu0 %v6699_v25  ;;  %6102 = vmatpush3.bf16.msra.mxu1 %v6701_v26 }
 0x81a   : > { %6103 = vmatprep.subr.bf16.mxu1 %v7094_v34 }
 0x81c   : > { %6073 = vmatpush3.bf16.msra.mxu0 %v6700_v52 }
 0x81d   : > { %6074 = vmatprep.subr.bf16.mxu0 %v6702_v16  ;;  %6104 = vmatpush3.bf16.msra.mxu1 %v6704_v39 }
 0x81e   : > { %6105 = vmatprep.subr.bf16.mxu1 %v7094_v34 }
 0x820   : > { %6075 = vmatpush3.bf16.msra.mxu0 %v6703_v38 }
 0x821   : > { %6076 = vmatprep.subr.bf16.mxu0 %v6705_v42  ;;  %6106 = vmatpush3.bf16.msra.mxu1 %v6707_v51 }
 0x822   : > { %6107 = vmatprep.subr.bf16.mxu1 %v7094_v34 }
 0x824   : > { %6077 = vmatpush3.bf16.msra.mxu0 %v6706_v46 }
 0x825   : > { %6078 = vmatprep.subr.bf16.mxu0 %v6708_v8  ;;  %6108 = vmatpush3.bf16.msra.mxu1 %v6710_v29 }
 0x826   : > { %6109 = vmatprep.subr.bf16.mxu1 %v7094_v34 }
 0x828   : > { %6079 = vmatpush3.bf16.msra.mxu0 %v6709_v9 }
 0x829   : > { %6080 = vmatprep.subr.bf16.mxu0 %v6711_v32  ;;  %6110 = vmatpush3.bf16.msra.mxu1 %v6713_v15 }
 0x82a   : > { %6111 = vmatprep.subr.bf16.mxu1 %v7094_v34 }
 0x82c   : > { %6081 = vmatpush3.bf16.msra.mxu0 %v6712_v14 }
 0x82d   : > { %6112 = vmatpush3.bf16.msra.mxu1 %v6714_v22 }
 0x82f   : > { %5015 = vmatmul.mubr.bf16.vlgmr.msra.gmra.mrb[44].mxu0 %v8196_v21 }
 0x8e2   : > { %v4934_v48 = vpop.f32.mrb[40].mxu0  ;;  %v4975_v50 = vpop.f32.mrb[40].mxu1 }
 0x8e3   : > { %v5911_v53 = vmul.f32 -1.442695, %v4934_v48  ;;  %v4936_v54 = vpop.f32.mrb[41].mxu0  ;;  %v4977_v57 = vpop.f32.mrb[41].mxu1 }
 0x8e4   : > { %v4938_v55 = vpop.f32.mrb[42].mxu0  ;;  %v4979_v56 = vpop.f32.mrb[42].mxu1  ;;  %v5912_v60 = vmul.f32 -1.442695, %v4936_v54 }
 0x8e5   : > { %6785 = vpow2.f32 %v5911_v53  ;;  %v4939_v58 = vpop.f32.mrb[43].mxu0  ;;  %v4980_v59 = vpop.f32.mrb[43].mxu1 }
 0x8e6   : > { %6787 = vpow2.f32 %v5912_v60 }
 0x8ef   : > { %v6786_v61 = vpop.eup %6785 }
 0x8f0   : > { %v5025_v63 = vadd.f32 1.0, %v6786_v61  ;;  %v6788_v0 = vpop.eup %6787 }
 0x8f1   : > { %v5031_v1 = vadd.f32 1.0, %v6788_v0 }
 0x8f2   : > { %6789 = vrcp.f32 %v5025_v63 }
 0x8fc   : > { %v6790_v37 = vpop.eup %6789 }
 0x8fd   : > { %v5034_v40 = vmul.f32 %v6790_v37, %v4977_v57 }
 0x8ff   : > { %v5035_v2 = vadd.f32 %v5034_v40, %v4975_v50 }
 0x901   : > { %6791 = vtanh.f32 %v5035_v2 }
 0x902   : > { %6793 = vrcp.f32 %v5031_v1  ;;  %v6082_v24 = vpop.f32.mrb[44].mxu0 }
 0x903   : > { %v6083_v49 = vpop.f32.mrb[45].mxu0 }
 0x904   : > { %v6084_v31 = vadd.f32 %v6083_v49, %v6082_v24  ;;  %v6085_v30 = vpop.f32.mrb[46].mxu0 }
 0x905   : > { %v6086_v33 = vpop.f32.mrb[47].mxu0 }
 0x906   : > { %5913 = vst [vmem:[%s7342_s0 + $0x30] sm:$0xff] %v6084_v31 }
 0x90b   : > { %v6792_v3 = vpop.eup %6791 }
 0x90c   : > { %v5037_v4 = vsub.f32 %v8194_v27, %v6792_v3  ;;  %v6794_v7 = vpop.eup %6793 }
 0x90e   : > { %v5038_v10 = vmul.f32 %v6794_v7, %v5037_v4 }
 0x910   : > { %v5039_v28 = vadd.f32 %v6792_v3, %v5038_v10 }
 0x912   : > { %v5045_v17 = vsel %vm5044_vm3, %v5039_v28, %v8194_v27 }
 0x913   : > { %v5048_v20 = vpack.c.bf16 %v5045_v17, %v5045_v17  ;;  %5162 = vst [vmem:[#allocation2] sm:$0xff] %v5045_v17  ;;  %5167 = vst [vmem:[#allocation12] sm:$0xff] (!%p5924_p11), %v5045_v17 }
 0x915   : > { %6114 = vmatmul.mubr.bf16.vlgmr.msra.gmra.mrb[44].mxu1 %v5048_v20 }
 0x9e5   : > { %5166 = sbr.rel (%p5924_p11) target bundleno = 2540 (0x9ec), region = 64 }
 0x9e8   : > { %v5154_v21 = vpop.f32.mrb[44].mxu1 }
 0x9e9   : > { %v5155_v13 = vadd.f32 %v5914_v23, %v5154_v21  ;;  %v6115_v6 = vpop.f32.mrb[45].mxu1 }
 0x9ea   : > { %v5157_v36 = vpop.f32.mrb[46].mxu1 }
 0x9eb   : > { %5923 = vst [vmem:[%s7342_s0 + $0x38] sm:$0xff] %v5155_v13  ;;  %v6116_v12 = vpop.f32.mrb[47].mxu1 }
 0x9ec PF: > { %s5933_s19 = sshll.u32 %s7156_s25, 10  ;;  %s5182_s30 = sshll.u32 %s7342_s0, 4  ;;  %s8220_s30 = int_to_ptr.vmem [resolvable:$true] %s5182_s30 }
 0x9ed   : > { %s8217_s18 = scalar_lea.hbm %s8293_s5, %s5933_s19  ;;  %s8224_s17 = scalar_lea.sflag [#allocation5], %s272_s27 }
 0x9ee   : > { %s6974_s26 = scalar_lea.vmem %s8220_s30, 1024  ;;  %p8435_p5 = scmp.ne.s32.totalorder %s8344_s9, 0 }
 0x9ef   : > { %p6975_p12 = scmp.ne.s32.totalorder %s8220_s30, %s6974_s26  ;;  %s7096_s8 = smov [#allocation11]  }
 0x9f0   : > { %s6978_s11 = sshll.u32 %s7096_s8, 4  ;;  %s6979_s11 = int_to_ptr.vmem [resolvable:$false] %s6978_s11 }
 0x9f1   : > { %p6976_p6 = pnand %p6975_p12, %p8435_p5  ;;  %s6980_s7 = scalar_lea.vmem %s6979_s11, 2048 }
 0x9f2   : > { %p6981_p10 = scmp.lt.s32.totalorder %s8220_s30, %s6979_s11  ;;  %p6982_p3 = scmp.lt.s32.totalorder %s6980_s7, %s6974_s26 }
 0x9f3   : > { %p6977_p13 = pneg %p6976_p6 }
 0x9f4   : > { %p6983_p8 = por %p6982_p3, %p6981_p10 }
 0x9f6   : > { %p6984_p9 = pnand %p6983_p8, %p6977_p13 }
 0x9f8   : > { %6987 = shalt.err (!%p6984_p9)
}
 0x9f9   : > { %s6988_s27 = scalar_lea.hbm %s8217_s18, 1024  ;;  %s6992_s20 = scalar_lea.hbm %s8293_s5, 2048 }
 0x9fa   : > { %p6989_p2 = scmp.ne.s32.totalorder %s8217_s18, %s6988_s27  ;;  %p6993_p0 = scmp.lt.u32.totalorder %s8217_s18, %s8293_s5 }
 0x9fb   : > { %p6994_p4 = scmp.lt.u32.totalorder %s6992_s20, %s6988_s27  ;;  %p6996_p12 = scmp.lt.u32.totalorder %s6988_s27, %s8217_s18 }
 0x9fc   : > { %p6990_p7 = pnand %p6989_p2, %p8435_p5 }
 0x9fd   : > { %p6995_p11 = por %p6994_p4, %p6993_p0 }
 0x9fe   : > { %p6991_p1 = pneg %p6990_p7 }
 0x9ff   : > { %p6997_p6 = por %p6996_p12, %p6995_p11 }
 0xa01   : > { %p6998_p13 = pnand %p6997_p6, %p6991_p1 }
 0xa03   : > { %7001 = shalt.err (!%p6998_p13)
}
 0xa04   : > { %s7097_s12 = smov 128   ;;  %s7098_s15 = smov 8  }
 0xa05   : > { %6131 = dma.vmem_to_hbm [thread:$0]  (%p8435_p5), %s8220_s30, 1024, %s8217_s18, %s8224_s17, %s7097_s12, %s7097_s12, %s7098_s15  }
 0xa06   : > { %s7099_s19 = smov [#allocation12]   ;;  %p8436_p3 = scmp.eq.s32.totalorder %s7156_s25, 1 }
 0xa07   : > { %s5196_s13 = sshll.u32 %s7099_s19, 4  ;;  %s5197_s13 = int_to_ptr.vmem [resolvable:$true] %s5196_s13 }
 0xa08   : > { %s7002_s16 = scalar_lea.vmem %s5197_s13, 128  ;;  %p7009_p2 = scmp.lt.s32.totalorder %s5197_s13, %s5197_s13 }
 0xa09   : > { %p7003_p10 = scmp.ne.s32.totalorder %s5197_s13, %s7002_s16  ;;  %p7010_p7 = scmp.lt.s32.totalorder %s7002_s16, %s7002_s16 }
 0xa0b   : > { %p7004_p8 = pnand %p7003_p10, %p8436_p3  ;;  %p7011_p1 = por %p7010_p7, %p7009_p2 }
 0xa0d   : > { %p7005_p9 = pneg %p7004_p8 }
 0xa0f   : > { %p7012_p0 = pnand %p7011_p1, %p7005_p9 }
 0xa11   : > { %7015 = shalt.err (!%p7012_p0)
}
 0xa12   : > { %s7016_s11 = scalar_lea.hbm %s8294_s6, 128  ;;  %p8437_p4 = pmov %p8436_p3 }
 0xa13   : > { %p7017_p5 = scmp.ne.s32.totalorder %s8294_s6, %s7016_s11  ;;  %p7022_p6 = scmp.lt.u32.totalorder %s7016_s11, %s8294_s6 }
 0xa15   : > { %p7018_p11 = pnand %p7017_p5, %p8437_p4 }
 0xa17   : > { %p7019_p12 = pneg %p7018_p11 }
 0xa19   : > { %p7024_p13 = pnand %p7022_p6, %p7019_p12 }
 0xa1b   : > { %7027 = shalt.err (!%p7024_p13)
}
 0xa1c   : > { %p8438_p10 = pmov %p8436_p3 }
 0xa1e   : > { %6133 = dma.vmem_to_hbm [thread:$0]  (%p8438_p10), %s5197_s13, 128, %s8294_s6, [#allocation13]  }
 0xa1f   : > { %7061 = dma.done.wait (%p8436_p3), [#allocation13], 128   ;;  %p8439_p8 = pmov %p8436_p3 }
 0xa21   : > { %7063 = vsyncadd (%p8439_p8), [#allocation13], 4294967168 }
 0xa22 PF: > { %s5212_s0 = sand.u32 1, %s7070_s21   ;;  %p8440_p9 = scmp.ne.s32.totalorder %s8345_s10, 0 }
 0xa23   : > { %p8441_p2 = scmp.ge.s32.totalorder %s7082_s24, 2  ;;  %s5213_s14 = scalar_lea.sflag [#allocation5], %s5212_s0 }
 0xa25   : > { %p6152_p7 = pnand %p8441_p2, %p8440_p9 }
 0xa27   : > { %7065 = dma.done.wait (!%p6152_p7), %s5213_s14, 1024  }
 0xa28   : > { %7067 = vsyncadd (!%p6152_p7), %s5213_s14, 4294966272  ;;  %s8442_s24 = sld [smem:[#allocation20_spill]]  ;;  %s8443_s20 = sld [smem:[#allocation21_spill]] }
 0xa29   : > { %s8444_s21 = smov %s7074_s22  ;;  %s8445_s22 = smov %s7078_s23 }
 0xa2e   : > { %p23_p1 = scmp.ge.s32.totalorder %s8442_s24, 4   ;;  %s8446_s23 = smov %s8443_s20 }
 0xa30   :  { %25 = sbr.rel (!%p23_p1) target bundleno = 10 (0xa), region = 128 }
 0xa37   :  { %5218 = vsyncpa [#allocation4], 1 }
 0xa38   :  { %5220 = vsyncpa [#allocation4 + $0x1], 1 }
 0xa39   :  { %5221 = vsyncpa [#allocation7], 1 }
 0xa3a   :  { %5223 = vsyncpa [#allocation7 + $0x1], 1 }
 0xa3b   :  { %5224 = vsyncpa [#allocation10], 1 }
 0xa3c   :  { %5225 = vsyncpa [#allocation5], 1 }
 0xa3d   :  { %5227 = vsyncpa [#allocation5 + $0x1], 1 }
 0xa3e   :  { %5228 = vsyncpa [#allocation13], 1 }

</bundles_post_ra>
